<compile_context>
chip_gen: v5e
topology: v5e:2x2
jax: 0.10.0
libtpu: 0.0.40
codegen_flags: <defaults>
</compile_context>

<pallas_src>
import math

import jax
import jax.numpy as jnp
from jax.experimental import pallas as pl
from jax.experimental.pallas import tpu as pltpu

# ---- small model config (consistent with the module's constraints) ----
L = 16                      # sequence length
B = 2                       # batch size
BL = B * L                  # fused batch*seq rows
HIDDEN = 128                # hidden_size (multiple of 64)
NHEAD = HIDDEN // 64        # default nhead rule from the module
HEAD_DIM = HIDDEN // NHEAD
FF = HIDDEN * 4             # dim_feedforward default
NLAYERS = 2                 # n_layers (kept small)
RADIUS = 3.806
LN_EPS = 1e-5
NEG_INF = -1e30             # additive mask value (padding + off-diagonal blocks)
IN_DIM = 41                 # 20 (one-hot seq) + 21 (pssm)
IN_PAD = 128                # fc0 contraction dim padded to a full lane width
OUT_PAD = 128               # lane-dense kernel output (3 real SRF columns)


def _layernorm(x, w, b):
    mu = jnp.mean(x, axis=-1, keepdims=True)
    var = jnp.mean((x - mu) ** 2, axis=-1, keepdims=True)
    return (x - mu) * jax.lax.rsqrt(var + LN_EPS) * w + b


def psifold_kernel(x_ref, mask_ref,
                   w0_ref, bias0_ref,
                   wqkv_ref, bqkv_ref,
                   opw_ref, opb_ref,
                   ln1w_ref, ln1b_ref,
                   l1w_ref, l1b_ref, l2w_ref, l2b_ref,
                   ln2w_ref, ln2b_ref,
                   w1_ref, b1_ref,
                   out_ref):
    x = x_ref[...]                                    # (BL, IN_PAD) bf16

    # fc0; bias0 already contains fc0 bias + positional encoding (dropout = id)
    h = jnp.dot(x, w0_ref[...], preferred_element_type=jnp.float32)
    h = h + bias0_ref[...]                            # (BL, HIDDEN) f32

    mask = mask_ref[...]                              # (BL, BL) block-diag + key padding

    for l in range(NLAYERS):
        # ---- multi-head self attention (post-norm TransformerEncoderLayer) ----
        h_bf = h.astype(jnp.bfloat16)
        # fused QKV: one (BL,128)x(128,384) matmul; scale folded into Q weights
        qkv = jnp.dot(h_bf, wqkv_ref[l], preferred_element_type=jnp.float32) + bqkv_ref[l]
        qkv_bf = qkv.astype(jnp.bfloat16)             # (BL, 3*HIDDEN)

        head_outs = []
        for hd in range(NHEAD):
            c = hd * HEAD_DIM
            q = qkv_bf[:, c:c + HEAD_DIM]                                   # (BL, Dh)
            k = qkv_bf[:, HIDDEN + c:HIDDEN + c + HEAD_DIM]                 # (BL, Dh)
            v = qkv_bf[:, 2 * HIDDEN + c:2 * HIDDEN + c + HEAD_DIM]         # (BL, Dh)
            # batched scores over the whole (BL,BL) slab; off-block entries masked
            s = jax.lax.dot_general(
                q, k, (((1,), (1,)), ((), ())),
                preferred_element_type=jnp.float32) + mask                  # (BL, BL)
            m = jnp.max(s, axis=-1, keepdims=True)
            e = jnp.exp(s - m)
            denom = jnp.sum(e, axis=-1, keepdims=True)
            p = e * pl.reciprocal(denom, approx=True)
            head_outs.append(jnp.dot(p.astype(jnp.bfloat16), v,
                                     preferred_element_type=jnp.float32))   # (BL, Dh)
        attn = jnp.concatenate(head_outs, axis=-1)    # (BL, HIDDEN) lane concat
        attn = jnp.dot(attn.astype(jnp.bfloat16), opw_ref[l],
                       preferred_element_type=jnp.float32) + opb_ref[l]
        h = _layernorm(h + attn, ln1w_ref[l], ln1b_ref[l])

        # ---- feed forward (linear -> relu -> linear) ----
        h_bf = h.astype(jnp.bfloat16)
        ff = jnp.dot(h_bf, l1w_ref[l], preferred_element_type=jnp.float32) + l1b_ref[l]
        ff = jnp.maximum(ff, 0.0)
        ff = jnp.dot(ff.astype(jnp.bfloat16), l2w_ref[l],
                     preferred_element_type=jnp.float32) + l2b_ref[l]
        h = _layernorm(h + ff, ln2w_ref[l], ln2b_ref[l])

    # ---- fc1 + SRF head (lane-dense padded output) ----
    angles = jnp.dot(h.astype(jnp.bfloat16), w1_ref[...],
                     preferred_element_type=jnp.float32) + b1_ref[...]      # (BL, OUT_PAD)
    theta = angles[:, 0:1]
    phi = angles[:, 1:2]
    r_cos_t = RADIUS * jnp.cos(theta)
    r_sin_t = RADIUS * jnp.sin(theta)
    v0 = r_cos_t
    v1 = r_sin_t * jnp.cos(phi)
    v2 = r_sin_t * jnp.sin(phi)
    lane = jax.lax.broadcasted_iota(jnp.int32, (BL, OUT_PAD), 1)
    out_ref[...] = jnp.where(lane == 0, v0,
                             jnp.where(lane == 1, v1,
                                       jnp.where(lane == 2, v2, 0.0)))


def make_positional_encoding(length, d_model):
    position = jnp.arange(length, dtype=jnp.float32)[:, None]
    div_term = jnp.exp(jnp.arange(0, d_model, 2, dtype=jnp.float32)
                       * (-math.log(10000.0) / d_model))
    pe = jnp.zeros((length, d_model), jnp.float32)
    pe = pe.at[:, 0::2].set(jnp.sin(position * div_term))
    pe = pe.at[:, 1::2].set(jnp.cos(position * div_term))
    return pe


def init_params(key):
    # Deterministic synthetic parameters.  Matmul weights are bf16 (f32 accum in
    # kernel); biases / LayerNorm params stay f32.  QKV is stored fused as a
    # (HIDDEN, 3*HIDDEN) weight with 1/sqrt(head_dim) baked into the Q portion.
    ks = jax.random.split(key, 16)
    s = 0.05
    f32, bf16 = jnp.float32, jnp.bfloat16
    scale = 1.0 / math.sqrt(HEAD_DIM)
    p = {}
    w0 = s * jax.random.normal(ks[0], (IN_DIM, HIDDEN), f32)
    p["w0"] = jnp.pad(w0, ((0, IN_PAD - IN_DIM), (0, 0))).astype(bf16)       # (IN_PAD, H)
    p["b0"] = s * jax.random.normal(ks[1], (1, HIDDEN), f32)

    wq = s * scale * jax.random.normal(ks[2], (NLAYERS, HIDDEN, HIDDEN), f32)
    wk = s * jax.random.normal(ks[3], (NLAYERS, HIDDEN, HIDDEN), f32)
    wv = s * jax.random.normal(ks[4], (NLAYERS, HIDDEN, HIDDEN), f32)
    p["wqkv"] = jnp.concatenate([wq, wk, wv], axis=-1).astype(bf16)          # (Ly, H, 3H)
    bq = s * scale * jax.random.normal(ks[5], (NLAYERS, 1, HIDDEN), f32)
    bk = s * jax.random.normal(ks[6], (NLAYERS, 1, HIDDEN), f32)
    bv = s * jax.random.normal(ks[7], (NLAYERS, 1, HIDDEN), f32)
    p["bqkv"] = jnp.concatenate([bq, bk, bv], axis=-1)                       # (Ly, 1, 3H)

    p["opw"] = (s * jax.random.normal(ks[8], (NLAYERS, HIDDEN, HIDDEN), f32)).astype(bf16)
    p["opb"] = s * jax.random.normal(ks[9], (NLAYERS, 1, HIDDEN), f32)
    p["ln1w"] = jnp.ones((NLAYERS, 1, HIDDEN), f32)
    p["ln1b"] = jnp.zeros((NLAYERS, 1, HIDDEN), f32)
    p["l1w"] = (s * jax.random.normal(ks[10], (NLAYERS, HIDDEN, FF), f32)).astype(bf16)
    p["l1b"] = s * jax.random.normal(ks[11], (NLAYERS, 1, FF), f32)
    p["l2w"] = (s * jax.random.normal(ks[12], (NLAYERS, FF, HIDDEN), f32)).astype(bf16)
    p["l2b"] = s * jax.random.normal(ks[13], (NLAYERS, 1, HIDDEN), f32)
    p["ln2w"] = jnp.ones((NLAYERS, 1, HIDDEN), f32)
    p["ln2b"] = jnp.zeros((NLAYERS, 1, HIDDEN), f32)
    w1 = s * jax.random.normal(ks[14], (HIDDEN, 2), f32)
    p["w1"] = jnp.pad(w1, ((0, 0), (0, OUT_PAD - 2))).astype(bf16)           # (H, OUT_PAD)
    b1 = s * jax.random.normal(ks[15], (1, 2), f32)
    p["b1"] = jnp.pad(b1, ((0, 0), (0, OUT_PAD - 2)))                        # (1, OUT_PAD)
    return p


def _full_spec(shape):
    nd = len(shape)
    return pl.BlockSpec(shape, lambda i, nd=nd: (0,) * nd)


def psifold_forward(params, seq, pssm, length):
    # seq: (L, B) int32, pssm: (L, B, 21) f32, length: (B,) int32
    one_hot = jax.nn.one_hot(seq, 20, dtype=jnp.float32)                   # (L, B, 20)
    enc_in = jnp.concatenate([one_hot, pssm.astype(jnp.float32)], axis=2)  # (L, B, 41)
    x = jnp.transpose(enc_in, (1, 0, 2)).reshape(BL, IN_DIM)               # (BL, 41)
    x = jnp.pad(x, ((0, 0), (0, IN_PAD - IN_DIM))).astype(jnp.bfloat16)    # (BL, IN_PAD)

    # block-diagonal additive mask over the fused (BL, BL) score matrix:
    # 0 where (same batch block) AND (key position < length), else NEG_INF
    idx = jnp.arange(BL, dtype=jnp.int32)
    blk = idx // L                                                         # batch id per row/col
    pos = idx % L                                                          # seq position per col
    same_block = blk[:, None] == blk[None, :]
    valid_key = pos < length[blk]                                          # (BL,)
    mask = jnp.where(same_block & valid_key[None, :], 0.0, NEG_INF).astype(jnp.float32)

    # fc0 bias + positional encoding fused into a single (BL, HIDDEN) bias
    bias0 = jnp.tile(make_positional_encoding(L, HIDDEN), (B, 1)) + params["b0"]

    args = (x, mask,
            params["w0"], bias0,
            params["wqkv"], params["bqkv"],
            params["opw"], params["opb"],
            params["ln1w"], params["ln1b"],
            params["l1w"], params["l1b"], params["l2w"], params["l2b"],
            params["ln2w"], params["ln2b"],
            params["w1"], params["b1"])

    out = pl.pallas_call(
        psifold_kernel,
        out_shape=jax.ShapeDtypeStruct((BL, OUT_PAD), jnp.float32),
        grid=(1,),                                    # whole batch in one step
        in_specs=[_full_spec(a.shape) for a in args],
        out_specs=_full_spec((BL, OUT_PAD)),
        compiler_params=pltpu.CompilerParams(
            dimension_semantics=("arbitrary",)),
    )(*args)

    srf = out.reshape(B, L, OUT_PAD)[:, :, :3]        # drop lane padding
    return jnp.transpose(srf, (1, 0, 2))              # (L, B, 3), matching PyTorch output


if __name__ == "__main__":
    key = jax.random.PRNGKey(0)
    k_param, k_seq, k_pssm = jax.random.split(key, 3)
    params = init_params(k_param)

    seq = jax.random.randint(k_seq, (L, B), 0, 20, dtype=jnp.int32)        # amino-acid ids
    pssm = jax.random.uniform(k_pssm, (L, B, 21), dtype=jnp.float32)       # pssm features
    length = jnp.array([L, L - 4], dtype=jnp.int32)                        # per-seq lengths

    srf = psifold_forward(params, seq, pssm, length)
    srf = jax.block_until_ready(srf)
    assert srf.shape == (L, B, 3), srf.shape
    assert bool(jnp.all(jnp.isfinite(srf)))
    print("KERNEL_OK")
</pallas_src>

<mosaic_0001>
module attributes {stable_mosaic.version = 11 : i64} {
  func.func @psifold_kernel(%arg0: i32, %arg1: memref<32x128xbf16, #tpu.memory_space<vmem>>, %arg2: memref<32x32xf32, #tpu.memory_space<vmem>>, %arg3: memref<128x128xbf16, #tpu.memory_space<vmem>>, %arg4: memref<32x128xf32, #tpu.memory_space<vmem>>, %arg5: memref<2x128x384xbf16, #tpu.memory_space<vmem>>, %arg6: memref<2x1x384xf32, #tpu.memory_space<vmem>>, %arg7: memref<2x128x128xbf16, #tpu.memory_space<vmem>>, %arg8: memref<2x1x128xf32, #tpu.memory_space<vmem>>, %arg9: memref<2x1x128xf32, #tpu.memory_space<vmem>>, %arg10: memref<2x1x128xf32, #tpu.memory_space<vmem>>, %arg11: memref<2x128x512xbf16, #tpu.memory_space<vmem>>, %arg12: memref<2x1x512xf32, #tpu.memory_space<vmem>>, %arg13: memref<2x512x128xbf16, #tpu.memory_space<vmem>>, %arg14: memref<2x1x128xf32, #tpu.memory_space<vmem>>, %arg15: memref<2x1x128xf32, #tpu.memory_space<vmem>>, %arg16: memref<2x1x128xf32, #tpu.memory_space<vmem>>, %arg17: memref<128x128xbf16, #tpu.memory_space<vmem>>, %arg18: memref<1x128xf32, #tpu.memory_space<vmem>>, %arg19: memref<32x128xf32, #tpu.memory_space<vmem>>) attributes {dimension_semantics = [#tpu.dimension_semantics<arbitrary>], iteration_bounds = array<i64: 1>, scalar_prefetch = 0 : i64, scratch_operands = 0 : i64, tpu.core_type = #tpu.core_type<tc>, window_params = [{pipeline_mode = #tpu.pipeline_mode<synchronous>, transform_indices = @transform_0, window_bounds = array<i64: 32, 128>}, {pipeline_mode = #tpu.pipeline_mode<synchronous>, transform_indices = @transform_1, window_bounds = array<i64: 32, 32>}, {pipeline_mode = #tpu.pipeline_mode<synchronous>, transform_indices = @transform_2, window_bounds = array<i64: 128, 128>}, {pipeline_mode = #tpu.pipeline_mode<synchronous>, transform_indices = @transform_3, window_bounds = array<i64: 32, 128>}, {pipeline_mode = #tpu.pipeline_mode<synchronous>, transform_indices = @transform_4, window_bounds = array<i64: 2, 128, 384>}, {pipeline_mode = #tpu.pipeline_mode<synchronous>, transform_indices = @transform_5, window_bounds = array<i64: 2, 1, 384>}, {pipeline_mode = #tpu.pipeline_mode<synchronous>, transform_indices = @transform_6, window_bounds = array<i64: 2, 128, 128>}, {pipeline_mode = #tpu.pipeline_mode<synchronous>, transform_indices = @transform_7, window_bounds = array<i64: 2, 1, 128>}, {pipeline_mode = #tpu.pipeline_mode<synchronous>, transform_indices = @transform_8, window_bounds = array<i64: 2, 1, 128>}, {pipeline_mode = #tpu.pipeline_mode<synchronous>, transform_indices = @transform_9, window_bounds = array<i64: 2, 1, 128>}, {pipeline_mode = #tpu.pipeline_mode<synchronous>, transform_indices = @transform_10, window_bounds = array<i64: 2, 128, 512>}, {pipeline_mode = #tpu.pipeline_mode<synchronous>, transform_indices = @transform_11, window_bounds = array<i64: 2, 1, 512>}, {pipeline_mode = #tpu.pipeline_mode<synchronous>, transform_indices = @transform_12, window_bounds = array<i64: 2, 512, 128>}, {pipeline_mode = #tpu.pipeline_mode<synchronous>, transform_indices = @transform_13, window_bounds = array<i64: 2, 1, 128>}, {pipeline_mode = #tpu.pipeline_mode<synchronous>, transform_indices = @transform_14, window_bounds = array<i64: 2, 1, 128>}, {pipeline_mode = #tpu.pipeline_mode<synchronous>, transform_indices = @transform_15, window_bounds = array<i64: 2, 1, 128>}, {pipeline_mode = #tpu.pipeline_mode<synchronous>, transform_indices = @transform_16, window_bounds = array<i64: 128, 128>}, {pipeline_mode = #tpu.pipeline_mode<synchronous>, transform_indices = @transform_17, window_bounds = array<i64: 1, 128>}, {pipeline_mode = #tpu.pipeline_mode<synchronous>, transform_indices = @transform_18, window_bounds = array<i64: 32, 128>}]} {
    %c0 = arith.constant 0 : index
    %c0_0 = arith.constant 0 : index
    %0 = vector.load %arg1[%c0, %c0_0] : memref<32x128xbf16, #tpu.memory_space<vmem>>, vector<32x128xbf16>
    %c0_1 = arith.constant 0 : index
    %c0_2 = arith.constant 0 : index
    %1 = vector.load %arg3[%c0_1, %c0_2] : memref<128x128xbf16, #tpu.memory_space<vmem>>, vector<128x128xbf16>
    %cst = arith.constant dense<0.000000e+00> : vector<32x128xf32>
    %2 = tpu.matmul %0, %1, %cst {dimension_numbers = #tpu.dot_dimension_numbers<[1], [0], [0], [1], [0, 0, 1, 1], [], []>} : vector<32x128xbf16>, vector<128x128xbf16>, vector<32x128xf32> -> vector<32x128xf32>
    %c0_3 = arith.constant 0 : index
    %c0_4 = arith.constant 0 : index
    %3 = vector.load %arg4[%c0_3, %c0_4] : memref<32x128xf32, #tpu.memory_space<vmem>>, vector<32x128xf32>
    %4 = arith.addf %2, %3 : vector<32x128xf32>
    %c0_5 = arith.constant 0 : index
    %c0_6 = arith.constant 0 : index
    %5 = vector.load %arg2[%c0_5, %c0_6] : memref<32x32xf32, #tpu.memory_space<vmem>>, vector<32x32xf32>
    %6 = arith.truncf %4 : vector<32x128xf32> to vector<32x128xbf16>
    %c0_7 = arith.constant 0 : index
    %c0_8 = arith.constant 0 : index
    %c0_9 = arith.constant 0 : index
    %7 = vector.load %arg5[%c0_7, %c0_8, %c0_9] : memref<2x128x384xbf16, #tpu.memory_space<vmem>>, vector<1x128x384xbf16>
    %8 = vector.shape_cast %7 : vector<1x128x384xbf16> to vector<128x384xbf16>
    %cst_10 = arith.constant dense<0.000000e+00> : vector<32x384xf32>
    %9 = tpu.matmul %6, %8, %cst_10 {dimension_numbers = #tpu.dot_dimension_numbers<[1], [0], [0], [1], [0, 0, 1, 1], [], []>} : vector<32x128xbf16>, vector<128x384xbf16>, vector<32x384xf32> -> vector<32x384xf32>
    %c0_11 = arith.constant 0 : index
    %c0_12 = arith.constant 0 : index
    %c0_13 = arith.constant 0 : index
    %10 = vector.load %arg6[%c0_11, %c0_12, %c0_13] : memref<2x1x384xf32, #tpu.memory_space<vmem>>, vector<1x1x384xf32>
    %11 = vector.shape_cast %10 : vector<1x1x384xf32> to vector<1x384xf32>
    %12 = vector.broadcast %11 : vector<1x384xf32> to vector<32x384xf32>
    %13 = arith.addf %9, %12 : vector<32x384xf32>
    %14 = arith.truncf %13 : vector<32x384xf32> to vector<32x384xbf16>
    %15 = vector.extract_strided_slice %14 {offsets = [0, 0], sizes = [32, 64], strides = [1, 1]} : vector<32x384xbf16> to vector<32x64xbf16>
    %16 = vector.extract_strided_slice %14 {offsets = [0, 128], sizes = [32, 64], strides = [1, 1]} : vector<32x384xbf16> to vector<32x64xbf16>
    %17 = vector.extract_strided_slice %14 {offsets = [0, 256], sizes = [32, 64], strides = [1, 1]} : vector<32x384xbf16> to vector<32x64xbf16>
    %cst_14 = arith.constant dense<0.000000e+00> : vector<32x32xf32>
    %18 = tpu.matmul %15, %16, %cst_14 {dimension_numbers = #tpu.dot_dimension_numbers<[1], [1], [0], [0], [0, 0, 1, 0], [], []>} : vector<32x64xbf16>, vector<32x64xbf16>, vector<32x32xf32> -> vector<32x32xf32>
    %19 = arith.addf %18, %5 : vector<32x32xf32>
    %cst_15 = arith.constant dense<0xFF800000> : vector<32xf32>
    %20 = vector.multi_reduction <maximumf>, %19, %cst_15 [1] : vector<32x32xf32> to vector<32xf32>
    %21 = vector.shape_cast %20 : vector<32xf32> to vector<32x1xf32>
    %22 = vector.broadcast %21 : vector<32x1xf32> to vector<32x32xf32>
    %23 = arith.subf %19, %22 : vector<32x32xf32>
    %24 = math.exp %23 : vector<32x32xf32>
    %cst_16 = arith.constant dense<0.000000e+00> : vector<32xf32>
    %25 = vector.multi_reduction <add>, %24, %cst_16 [1] : vector<32x32xf32> to vector<32xf32>
    %26 = vector.shape_cast %25 : vector<32xf32> to vector<32x1xf32>
    %27 = tpu.reciprocal %26 {approx = true} : vector<32x1xf32> -> vector<32x1xf32>
    %28 = vector.broadcast %27 : vector<32x1xf32> to vector<32x32xf32>
    %29 = arith.mulf %24, %28 : vector<32x32xf32>
    %30 = arith.truncf %29 : vector<32x32xf32> to vector<32x32xbf16>
    %cst_17 = arith.constant dense<0.000000e+00> : vector<32x64xf32>
    %31 = tpu.matmul %30, %17, %cst_17 {dimension_numbers = #tpu.dot_dimension_numbers<[1], [0], [0], [1], [0, 0, 1, 1], [], []>} : vector<32x32xbf16>, vector<32x64xbf16>, vector<32x64xf32> -> vector<32x64xf32>
    %32 = vector.extract_strided_slice %14 {offsets = [0, 64], sizes = [32, 64], strides = [1, 1]} : vector<32x384xbf16> to vector<32x64xbf16>
    %33 = vector.extract_strided_slice %14 {offsets = [0, 192], sizes = [32, 64], strides = [1, 1]} : vector<32x384xbf16> to vector<32x64xbf16>
    %34 = vector.extract_strided_slice %14 {offsets = [0, 320], sizes = [32, 64], strides = [1, 1]} : vector<32x384xbf16> to vector<32x64xbf16>
    %cst_18 = arith.constant dense<0.000000e+00> : vector<32x32xf32>
    %35 = tpu.matmul %32, %33, %cst_18 {dimension_numbers = #tpu.dot_dimension_numbers<[1], [1], [0], [0], [0, 0, 1, 0], [], []>} : vector<32x64xbf16>, vector<32x64xbf16>, vector<32x32xf32> -> vector<32x32xf32>
    %36 = arith.addf %35, %5 : vector<32x32xf32>
    %cst_19 = arith.constant dense<0xFF800000> : vector<32xf32>
    %37 = vector.multi_reduction <maximumf>, %36, %cst_19 [1] : vector<32x32xf32> to vector<32xf32>
    %38 = vector.shape_cast %37 : vector<32xf32> to vector<32x1xf32>
    %39 = vector.broadcast %38 : vector<32x1xf32> to vector<32x32xf32>
    %40 = arith.subf %36, %39 : vector<32x32xf32>
    %41 = math.exp %40 : vector<32x32xf32>
    %cst_20 = arith.constant dense<0.000000e+00> : vector<32xf32>
    %42 = vector.multi_reduction <add>, %41, %cst_20 [1] : vector<32x32xf32> to vector<32xf32>
    %43 = vector.shape_cast %42 : vector<32xf32> to vector<32x1xf32>
    %44 = tpu.reciprocal %43 {approx = true} : vector<32x1xf32> -> vector<32x1xf32>
    %45 = vector.broadcast %44 : vector<32x1xf32> to vector<32x32xf32>
    %46 = arith.mulf %41, %45 : vector<32x32xf32>
    %47 = arith.truncf %46 : vector<32x32xf32> to vector<32x32xbf16>
    %cst_21 = arith.constant dense<0.000000e+00> : vector<32x64xf32>
    %48 = tpu.matmul %47, %34, %cst_21 {dimension_numbers = #tpu.dot_dimension_numbers<[1], [0], [0], [1], [0, 0, 1, 1], [], []>} : vector<32x32xbf16>, vector<32x64xbf16>, vector<32x64xf32> -> vector<32x64xf32>
    %49 = tpu.concatenate %31, %48 in 1 : vector<32x64xf32>, vector<32x64xf32> -> vector<32x128xf32>
    %50 = arith.truncf %49 : vector<32x128xf32> to vector<32x128xbf16>
    %c0_22 = arith.constant 0 : index
    %c0_23 = arith.constant 0 : index
    %c0_24 = arith.constant 0 : index
    %51 = vector.load %arg7[%c0_22, %c0_23, %c0_24] : memref<2x128x128xbf16, #tpu.memory_space<vmem>>, vector<1x128x128xbf16>
    %52 = vector.shape_cast %51 : vector<1x128x128xbf16> to vector<128x128xbf16>
    %cst_25 = arith.constant dense<0.000000e+00> : vector<32x128xf32>
    %53 = tpu.matmul %50, %52, %cst_25 {dimension_numbers = #tpu.dot_dimension_numbers<[1], [0], [0], [1], [0, 0, 1, 1], [], []>} : vector<32x128xbf16>, vector<128x128xbf16>, vector<32x128xf32> -> vector<32x128xf32>
    %c0_26 = arith.constant 0 : index
    %c0_27 = arith.constant 0 : index
    %c0_28 = arith.constant 0 : index
    %54 = vector.load %arg8[%c0_26, %c0_27, %c0_28] : memref<2x1x128xf32, #tpu.memory_space<vmem>>, vector<1x1x128xf32>
    %55 = vector.shape_cast %54 : vector<1x1x128xf32> to vector<1x128xf32>
    %56 = vector.broadcast %55 : vector<1x128xf32> to vector<32x128xf32>
    %57 = arith.addf %53, %56 : vector<32x128xf32>
    %58 = arith.addf %4, %57 : vector<32x128xf32>
    %c0_29 = arith.constant 0 : index
    %c0_30 = arith.constant 0 : index
    %c0_31 = arith.constant 0 : index
    %59 = vector.load %arg9[%c0_29, %c0_30, %c0_31] : memref<2x1x128xf32, #tpu.memory_space<vmem>>, vector<1x1x128xf32>
    %60 = vector.shape_cast %59 : vector<1x1x128xf32> to vector<1x128xf32>
    %c0_32 = arith.constant 0 : index
    %c0_33 = arith.constant 0 : index
    %c0_34 = arith.constant 0 : index
    %61 = vector.load %arg10[%c0_32, %c0_33, %c0_34] : memref<2x1x128xf32, #tpu.memory_space<vmem>>, vector<1x1x128xf32>
    %62 = vector.shape_cast %61 : vector<1x1x128xf32> to vector<1x128xf32>
    %cst_35 = arith.constant dense<0.000000e+00> : vector<32xf32>
    %63 = vector.multi_reduction <add>, %58, %cst_35 [1] : vector<32x128xf32> to vector<32xf32>
    %64 = vector.shape_cast %63 : vector<32xf32> to vector<32x1xf32>
    %cst_36 = arith.constant 1.280000e+02 : f32
    %65 = vector.broadcast %cst_36 : f32 to vector<32x1xf32>
    %66 = arith.divf %64, %65 : vector<32x1xf32>
    %67 = vector.broadcast %66 : vector<32x1xf32> to vector<32x128xf32>
    %68 = arith.subf %58, %67 : vector<32x128xf32>
    %69 = arith.mulf %68, %68 : vector<32x128xf32>
    %cst_37 = arith.constant dense<0.000000e+00> : vector<32xf32>
    %70 = vector.multi_reduction <add>, %69, %cst_37 [1] : vector<32x128xf32> to vector<32xf32>
    %71 = vector.shape_cast %70 : vector<32xf32> to vector<32x1xf32>
    %cst_38 = arith.constant 1.280000e+02 : f32
    %72 = vector.broadcast %cst_38 : f32 to vector<32x1xf32>
    %73 = arith.divf %71, %72 : vector<32x1xf32>
    %74 = vector.broadcast %66 : vector<32x1xf32> to vector<32x128xf32>
    %75 = arith.subf %58, %74 : vector<32x128xf32>
    %cst_39 = arith.constant 9.99999974E-6 : f32
    %76 = vector.broadcast %cst_39 : f32 to vector<32x1xf32>
    %77 = arith.addf %73, %76 : vector<32x1xf32>
    %78 = math.rsqrt %77 : vector<32x1xf32>
    %79 = vector.broadcast %78 : vector<32x1xf32> to vector<32x128xf32>
    %80 = arith.mulf %75, %79 : vector<32x128xf32>
    %81 = vector.broadcast %60 : vector<1x128xf32> to vector<32x128xf32>
    %82 = arith.mulf %80, %81 : vector<32x128xf32>
    %83 = vector.broadcast %62 : vector<1x128xf32> to vector<32x128xf32>
    %84 = arith.addf %82, %83 : vector<32x128xf32>
    %85 = arith.truncf %84 : vector<32x128xf32> to vector<32x128xbf16>
    %c0_40 = arith.constant 0 : index
    %c0_41 = arith.constant 0 : index
    %c0_42 = arith.constant 0 : index
    %86 = vector.load %arg11[%c0_40, %c0_41, %c0_42] : memref<2x128x512xbf16, #tpu.memory_space<vmem>>, vector<1x128x512xbf16>
    %87 = vector.shape_cast %86 : vector<1x128x512xbf16> to vector<128x512xbf16>
    %cst_43 = arith.constant dense<0.000000e+00> : vector<32x512xf32>
    %88 = tpu.matmul %85, %87, %cst_43 {dimension_numbers = #tpu.dot_dimension_numbers<[1], [0], [0], [1], [0, 0, 1, 1], [], []>} : vector<32x128xbf16>, vector<128x512xbf16>, vector<32x512xf32> -> vector<32x512xf32>
    %c0_44 = arith.constant 0 : index
    %c0_45 = arith.constant 0 : index
    %c0_46 = arith.constant 0 : index
    %89 = vector.load %arg12[%c0_44, %c0_45, %c0_46] : memref<2x1x512xf32, #tpu.memory_space<vmem>>, vector<1x1x512xf32>
    %90 = vector.shape_cast %89 : vector<1x1x512xf32> to vector<1x512xf32>
    %91 = vector.broadcast %90 : vector<1x512xf32> to vector<32x512xf32>
    %92 = arith.addf %88, %91 : vector<32x512xf32>
    %cst_47 = arith.constant 0.000000e+00 : f32
    %93 = vector.broadcast %cst_47 : f32 to vector<32x512xf32>
    %94 = arith.maximumf %92, %93 : vector<32x512xf32>
    %95 = arith.truncf %94 : vector<32x512xf32> to vector<32x512xbf16>
    %c0_48 = arith.constant 0 : index
    %c0_49 = arith.constant 0 : index
    %c0_50 = arith.constant 0 : index
    %96 = vector.load %arg13[%c0_48, %c0_49, %c0_50] : memref<2x512x128xbf16, #tpu.memory_space<vmem>>, vector<1x512x128xbf16>
    %97 = vector.shape_cast %96 : vector<1x512x128xbf16> to vector<512x128xbf16>
    %cst_51 = arith.constant dense<0.000000e+00> : vector<32x128xf32>
    %98 = tpu.matmul %95, %97, %cst_51 {dimension_numbers = #tpu.dot_dimension_numbers<[1], [0], [0], [1], [0, 0, 1, 1], [], []>} : vector<32x512xbf16>, vector<512x128xbf16>, vector<32x128xf32> -> vector<32x128xf32>
    %c0_52 = arith.constant 0 : index
    %c0_53 = arith.constant 0 : index
    %c0_54 = arith.constant 0 : index
    %99 = vector.load %arg14[%c0_52, %c0_53, %c0_54] : memref<2x1x128xf32, #tpu.memory_space<vmem>>, vector<1x1x128xf32>
    %100 = vector.shape_cast %99 : vector<1x1x128xf32> to vector<1x128xf32>
    %101 = vector.broadcast %100 : vector<1x128xf32> to vector<32x128xf32>
    %102 = arith.addf %98, %101 : vector<32x128xf32>
    %103 = arith.addf %84, %102 : vector<32x128xf32>
    %c0_55 = arith.constant 0 : index
    %c0_56 = arith.constant 0 : index
    %c0_57 = arith.constant 0 : index
    %104 = vector.load %arg15[%c0_55, %c0_56, %c0_57] : memref<2x1x128xf32, #tpu.memory_space<vmem>>, vector<1x1x128xf32>
    %105 = vector.shape_cast %104 : vector<1x1x128xf32> to vector<1x128xf32>
    %c0_58 = arith.constant 0 : index
    %c0_59 = arith.constant 0 : index
    %c0_60 = arith.constant 0 : index
    %106 = vector.load %arg16[%c0_58, %c0_59, %c0_60] : memref<2x1x128xf32, #tpu.memory_space<vmem>>, vector<1x1x128xf32>
    %107 = vector.shape_cast %106 : vector<1x1x128xf32> to vector<1x128xf32>
    %cst_61 = arith.constant dense<0.000000e+00> : vector<32xf32>
    %108 = vector.multi_reduction <add>, %103, %cst_61 [1] : vector<32x128xf32> to vector<32xf32>
    %109 = vector.shape_cast %108 : vector<32xf32> to vector<32x1xf32>
    %cst_62 = arith.constant 1.280000e+02 : f32
    %110 = vector.broadcast %cst_62 : f32 to vector<32x1xf32>
    %111 = arith.divf %109, %110 : vector<32x1xf32>
    %112 = vector.broadcast %111 : vector<32x1xf32> to vector<32x128xf32>
    %113 = arith.subf %103, %112 : vector<32x128xf32>
    %114 = arith.mulf %113, %113 : vector<32x128xf32>
    %cst_63 = arith.constant dense<0.000000e+00> : vector<32xf32>
    %115 = vector.multi_reduction <add>, %114, %cst_63 [1] : vector<32x128xf32> to vector<32xf32>
    %116 = vector.shape_cast %115 : vector<32xf32> to vector<32x1xf32>
    %cst_64 = arith.constant 1.280000e+02 : f32
    %117 = vector.broadcast %cst_64 : f32 to vector<32x1xf32>
    %118 = arith.divf %116, %117 : vector<32x1xf32>
    %119 = vector.broadcast %111 : vector<32x1xf32> to vector<32x128xf32>
    %120 = arith.subf %103, %119 : vector<32x128xf32>
    %cst_65 = arith.constant 9.99999974E-6 : f32
    %121 = vector.broadcast %cst_65 : f32 to vector<32x1xf32>
    %122 = arith.addf %118, %121 : vector<32x1xf32>
    %123 = math.rsqrt %122 : vector<32x1xf32>
    %124 = vector.broadcast %123 : vector<32x1xf32> to vector<32x128xf32>
    %125 = arith.mulf %120, %124 : vector<32x128xf32>
    %126 = vector.broadcast %105 : vector<1x128xf32> to vector<32x128xf32>
    %127 = arith.mulf %125, %126 : vector<32x128xf32>
    %128 = vector.broadcast %107 : vector<1x128xf32> to vector<32x128xf32>
    %129 = arith.addf %127, %128 : vector<32x128xf32>
    %130 = arith.truncf %129 : vector<32x128xf32> to vector<32x128xbf16>
    %c1 = arith.constant 1 : index
    %c0_66 = arith.constant 0 : index
    %c0_67 = arith.constant 0 : index
    %131 = vector.load %arg5[%c1, %c0_66, %c0_67] : memref<2x128x384xbf16, #tpu.memory_space<vmem>>, vector<1x128x384xbf16>
    %132 = vector.shape_cast %131 : vector<1x128x384xbf16> to vector<128x384xbf16>
    %cst_68 = arith.constant dense<0.000000e+00> : vector<32x384xf32>
    %133 = tpu.matmul %130, %132, %cst_68 {dimension_numbers = #tpu.dot_dimension_numbers<[1], [0], [0], [1], [0, 0, 1, 1], [], []>} : vector<32x128xbf16>, vector<128x384xbf16>, vector<32x384xf32> -> vector<32x384xf32>
    %c1_69 = arith.constant 1 : index
    %c0_70 = arith.constant 0 : index
    %c0_71 = arith.constant 0 : index
    %134 = vector.load %arg6[%c1_69, %c0_70, %c0_71] : memref<2x1x384xf32, #tpu.memory_space<vmem>>, vector<1x1x384xf32>
    %135 = vector.shape_cast %134 : vector<1x1x384xf32> to vector<1x384xf32>
    %136 = vector.broadcast %135 : vector<1x384xf32> to vector<32x384xf32>
    %137 = arith.addf %133, %136 : vector<32x384xf32>
    %138 = arith.truncf %137 : vector<32x384xf32> to vector<32x384xbf16>
    %139 = vector.extract_strided_slice %138 {offsets = [0, 0], sizes = [32, 64], strides = [1, 1]} : vector<32x384xbf16> to vector<32x64xbf16>
    %140 = vector.extract_strided_slice %138 {offsets = [0, 128], sizes = [32, 64], strides = [1, 1]} : vector<32x384xbf16> to vector<32x64xbf16>
    %141 = vector.extract_strided_slice %138 {offsets = [0, 256], sizes = [32, 64], strides = [1, 1]} : vector<32x384xbf16> to vector<32x64xbf16>
    %cst_72 = arith.constant dense<0.000000e+00> : vector<32x32xf32>
    %142 = tpu.matmul %139, %140, %cst_72 {dimension_numbers = #tpu.dot_dimension_numbers<[1], [1], [0], [0], [0, 0, 1, 0], [], []>} : vector<32x64xbf16>, vector<32x64xbf16>, vector<32x32xf32> -> vector<32x32xf32>
    %143 = arith.addf %142, %5 : vector<32x32xf32>
    %cst_73 = arith.constant dense<0xFF800000> : vector<32xf32>
    %144 = vector.multi_reduction <maximumf>, %143, %cst_73 [1] : vector<32x32xf32> to vector<32xf32>
    %145 = vector.shape_cast %144 : vector<32xf32> to vector<32x1xf32>
    %146 = vector.broadcast %145 : vector<32x1xf32> to vector<32x32xf32>
    %147 = arith.subf %143, %146 : vector<32x32xf32>
    %148 = math.exp %147 : vector<32x32xf32>
    %cst_74 = arith.constant dense<0.000000e+00> : vector<32xf32>
    %149 = vector.multi_reduction <add>, %148, %cst_74 [1] : vector<32x32xf32> to vector<32xf32>
    %150 = vector.shape_cast %149 : vector<32xf32> to vector<32x1xf32>
    %151 = tpu.reciprocal %150 {approx = true} : vector<32x1xf32> -> vector<32x1xf32>
    %152 = vector.broadcast %151 : vector<32x1xf32> to vector<32x32xf32>
    %153 = arith.mulf %148, %152 : vector<32x32xf32>
    %154 = arith.truncf %153 : vector<32x32xf32> to vector<32x32xbf16>
    %cst_75 = arith.constant dense<0.000000e+00> : vector<32x64xf32>
    %155 = tpu.matmul %154, %141, %cst_75 {dimension_numbers = #tpu.dot_dimension_numbers<[1], [0], [0], [1], [0, 0, 1, 1], [], []>} : vector<32x32xbf16>, vector<32x64xbf16>, vector<32x64xf32> -> vector<32x64xf32>
    %156 = vector.extract_strided_slice %138 {offsets = [0, 64], sizes = [32, 64], strides = [1, 1]} : vector<32x384xbf16> to vector<32x64xbf16>
    %157 = vector.extract_strided_slice %138 {offsets = [0, 192], sizes = [32, 64], strides = [1, 1]} : vector<32x384xbf16> to vector<32x64xbf16>
    %158 = vector.extract_strided_slice %138 {offsets = [0, 320], sizes = [32, 64], strides = [1, 1]} : vector<32x384xbf16> to vector<32x64xbf16>
    %cst_76 = arith.constant dense<0.000000e+00> : vector<32x32xf32>
    %159 = tpu.matmul %156, %157, %cst_76 {dimension_numbers = #tpu.dot_dimension_numbers<[1], [1], [0], [0], [0, 0, 1, 0], [], []>} : vector<32x64xbf16>, vector<32x64xbf16>, vector<32x32xf32> -> vector<32x32xf32>
    %160 = arith.addf %159, %5 : vector<32x32xf32>
    %cst_77 = arith.constant dense<0xFF800000> : vector<32xf32>
    %161 = vector.multi_reduction <maximumf>, %160, %cst_77 [1] : vector<32x32xf32> to vector<32xf32>
    %162 = vector.shape_cast %161 : vector<32xf32> to vector<32x1xf32>
    %163 = vector.broadcast %162 : vector<32x1xf32> to vector<32x32xf32>
    %164 = arith.subf %160, %163 : vector<32x32xf32>
    %165 = math.exp %164 : vector<32x32xf32>
    %cst_78 = arith.constant dense<0.000000e+00> : vector<32xf32>
    %166 = vector.multi_reduction <add>, %165, %cst_78 [1] : vector<32x32xf32> to vector<32xf32>
    %167 = vector.shape_cast %166 : vector<32xf32> to vector<32x1xf32>
    %168 = tpu.reciprocal %167 {approx = true} : vector<32x1xf32> -> vector<32x1xf32>
    %169 = vector.broadcast %168 : vector<32x1xf32> to vector<32x32xf32>
    %170 = arith.mulf %165, %169 : vector<32x32xf32>
    %171 = arith.truncf %170 : vector<32x32xf32> to vector<32x32xbf16>
    %cst_79 = arith.constant dense<0.000000e+00> : vector<32x64xf32>
    %172 = tpu.matmul %171, %158, %cst_79 {dimension_numbers = #tpu.dot_dimension_numbers<[1], [0], [0], [1], [0, 0, 1, 1], [], []>} : vector<32x32xbf16>, vector<32x64xbf16>, vector<32x64xf32> -> vector<32x64xf32>
    %173 = tpu.concatenate %155, %172 in 1 : vector<32x64xf32>, vector<32x64xf32> -> vector<32x128xf32>
    %174 = arith.truncf %173 : vector<32x128xf32> to vector<32x128xbf16>
    %c1_80 = arith.constant 1 : index
    %c0_81 = arith.constant 0 : index
    %c0_82 = arith.constant 0 : index
    %175 = vector.load %arg7[%c1_80, %c0_81, %c0_82] : memref<2x128x128xbf16, #tpu.memory_space<vmem>>, vector<1x128x128xbf16>
    %176 = vector.shape_cast %175 : vector<1x128x128xbf16> to vector<128x128xbf16>
    %cst_83 = arith.constant dense<0.000000e+00> : vector<32x128xf32>
    %177 = tpu.matmul %174, %176, %cst_83 {dimension_numbers = #tpu.dot_dimension_numbers<[1], [0], [0], [1], [0, 0, 1, 1], [], []>} : vector<32x128xbf16>, vector<128x128xbf16>, vector<32x128xf32> -> vector<32x128xf32>
    %c1_84 = arith.constant 1 : index
    %c0_85 = arith.constant 0 : index
    %c0_86 = arith.constant 0 : index
    %178 = vector.load %arg8[%c1_84, %c0_85, %c0_86] : memref<2x1x128xf32, #tpu.memory_space<vmem>>, vector<1x1x128xf32>
    %179 = vector.shape_cast %178 : vector<1x1x128xf32> to vector<1x128xf32>
    %180 = vector.broadcast %179 : vector<1x128xf32> to vector<32x128xf32>
    %181 = arith.addf %177, %180 : vector<32x128xf32>
    %182 = arith.addf %129, %181 : vector<32x128xf32>
    %c1_87 = arith.constant 1 : index
    %c0_88 = arith.constant 0 : index
    %c0_89 = arith.constant 0 : index
    %183 = vector.load %arg9[%c1_87, %c0_88, %c0_89] : memref<2x1x128xf32, #tpu.memory_space<vmem>>, vector<1x1x128xf32>
    %184 = vector.shape_cast %183 : vector<1x1x128xf32> to vector<1x128xf32>
    %c1_90 = arith.constant 1 : index
    %c0_91 = arith.constant 0 : index
    %c0_92 = arith.constant 0 : index
    %185 = vector.load %arg10[%c1_90, %c0_91, %c0_92] : memref<2x1x128xf32, #tpu.memory_space<vmem>>, vector<1x1x128xf32>
    %186 = vector.shape_cast %185 : vector<1x1x128xf32> to vector<1x128xf32>
    %cst_93 = arith.constant dense<0.000000e+00> : vector<32xf32>
    %187 = vector.multi_reduction <add>, %182, %cst_93 [1] : vector<32x128xf32> to vector<32xf32>
    %188 = vector.shape_cast %187 : vector<32xf32> to vector<32x1xf32>
    %cst_94 = arith.constant 1.280000e+02 : f32
    %189 = vector.broadcast %cst_94 : f32 to vector<32x1xf32>
    %190 = arith.divf %188, %189 : vector<32x1xf32>
    %191 = vector.broadcast %190 : vector<32x1xf32> to vector<32x128xf32>
    %192 = arith.subf %182, %191 : vector<32x128xf32>
    %193 = arith.mulf %192, %192 : vector<32x128xf32>
    %cst_95 = arith.constant dense<0.000000e+00> : vector<32xf32>
    %194 = vector.multi_reduction <add>, %193, %cst_95 [1] : vector<32x128xf32> to vector<32xf32>
    %195 = vector.shape_cast %194 : vector<32xf32> to vector<32x1xf32>
    %cst_96 = arith.constant 1.280000e+02 : f32
    %196 = vector.broadcast %cst_96 : f32 to vector<32x1xf32>
    %197 = arith.divf %195, %196 : vector<32x1xf32>
    %198 = vector.broadcast %190 : vector<32x1xf32> to vector<32x128xf32>
    %199 = arith.subf %182, %198 : vector<32x128xf32>
    %cst_97 = arith.constant 9.99999974E-6 : f32
    %200 = vector.broadcast %cst_97 : f32 to vector<32x1xf32>
    %201 = arith.addf %197, %200 : vector<32x1xf32>
    %202 = math.rsqrt %201 : vector<32x1xf32>
    %203 = vector.broadcast %202 : vector<32x1xf32> to vector<32x128xf32>
    %204 = arith.mulf %199, %203 : vector<32x128xf32>
    %205 = vector.broadcast %184 : vector<1x128xf32> to vector<32x128xf32>
    %206 = arith.mulf %204, %205 : vector<32x128xf32>
    %207 = vector.broadcast %186 : vector<1x128xf32> to vector<32x128xf32>
    %208 = arith.addf %206, %207 : vector<32x128xf32>
    %209 = arith.truncf %208 : vector<32x128xf32> to vector<32x128xbf16>
    %c1_98 = arith.constant 1 : index
    %c0_99 = arith.constant 0 : index
    %c0_100 = arith.constant 0 : index
    %210 = vector.load %arg11[%c1_98, %c0_99, %c0_100] : memref<2x128x512xbf16, #tpu.memory_space<vmem>>, vector<1x128x512xbf16>
    %211 = vector.shape_cast %210 : vector<1x128x512xbf16> to vector<128x512xbf16>
    %cst_101 = arith.constant dense<0.000000e+00> : vector<32x512xf32>
    %212 = tpu.matmul %209, %211, %cst_101 {dimension_numbers = #tpu.dot_dimension_numbers<[1], [0], [0], [1], [0, 0, 1, 1], [], []>} : vector<32x128xbf16>, vector<128x512xbf16>, vector<32x512xf32> -> vector<32x512xf32>
    %c1_102 = arith.constant 1 : index
    %c0_103 = arith.constant 0 : index
    %c0_104 = arith.constant 0 : index
    %213 = vector.load %arg12[%c1_102, %c0_103, %c0_104] : memref<2x1x512xf32, #tpu.memory_space<vmem>>, vector<1x1x512xf32>
    %214 = vector.shape_cast %213 : vector<1x1x512xf32> to vector<1x512xf32>
    %215 = vector.broadcast %214 : vector<1x512xf32> to vector<32x512xf32>
    %216 = arith.addf %212, %215 : vector<32x512xf32>
    %cst_105 = arith.constant 0.000000e+00 : f32
    %217 = vector.broadcast %cst_105 : f32 to vector<32x512xf32>
    %218 = arith.maximumf %216, %217 : vector<32x512xf32>
    %219 = arith.truncf %218 : vector<32x512xf32> to vector<32x512xbf16>
    %c1_106 = arith.constant 1 : index
    %c0_107 = arith.constant 0 : index
    %c0_108 = arith.constant 0 : index
    %220 = vector.load %arg13[%c1_106, %c0_107, %c0_108] : memref<2x512x128xbf16, #tpu.memory_space<vmem>>, vector<1x512x128xbf16>
    %221 = vector.shape_cast %220 : vector<1x512x128xbf16> to vector<512x128xbf16>
    %cst_109 = arith.constant dense<0.000000e+00> : vector<32x128xf32>
    %222 = tpu.matmul %219, %221, %cst_109 {dimension_numbers = #tpu.dot_dimension_numbers<[1], [0], [0], [1], [0, 0, 1, 1], [], []>} : vector<32x512xbf16>, vector<512x128xbf16>, vector<32x128xf32> -> vector<32x128xf32>
    %c1_110 = arith.constant 1 : index
    %c0_111 = arith.constant 0 : index
    %c0_112 = arith.constant 0 : index
    %223 = vector.load %arg14[%c1_110, %c0_111, %c0_112] : memref<2x1x128xf32, #tpu.memory_space<vmem>>, vector<1x1x128xf32>
    %224 = vector.shape_cast %223 : vector<1x1x128xf32> to vector<1x128xf32>
    %225 = vector.broadcast %224 : vector<1x128xf32> to vector<32x128xf32>
    %226 = arith.addf %222, %225 : vector<32x128xf32>
    %227 = arith.addf %208, %226 : vector<32x128xf32>
    %c1_113 = arith.constant 1 : index
    %c0_114 = arith.constant 0 : index
    %c0_115 = arith.constant 0 : index
    %228 = vector.load %arg15[%c1_113, %c0_114, %c0_115] : memref<2x1x128xf32, #tpu.memory_space<vmem>>, vector<1x1x128xf32>
    %229 = vector.shape_cast %228 : vector<1x1x128xf32> to vector<1x128xf32>
    %c1_116 = arith.constant 1 : index
    %c0_117 = arith.constant 0 : index
    %c0_118 = arith.constant 0 : index
    %230 = vector.load %arg16[%c1_116, %c0_117, %c0_118] : memref<2x1x128xf32, #tpu.memory_space<vmem>>, vector<1x1x128xf32>
    %231 = vector.shape_cast %230 : vector<1x1x128xf32> to vector<1x128xf32>
    %cst_119 = arith.constant dense<0.000000e+00> : vector<32xf32>
    %232 = vector.multi_reduction <add>, %227, %cst_119 [1] : vector<32x128xf32> to vector<32xf32>
    %233 = vector.shape_cast %232 : vector<32xf32> to vector<32x1xf32>
    %cst_120 = arith.constant 1.280000e+02 : f32
    %234 = vector.broadcast %cst_120 : f32 to vector<32x1xf32>
    %235 = arith.divf %233, %234 : vector<32x1xf32>
    %236 = vector.broadcast %235 : vector<32x1xf32> to vector<32x128xf32>
    %237 = arith.subf %227, %236 : vector<32x128xf32>
    %238 = arith.mulf %237, %237 : vector<32x128xf32>
    %cst_121 = arith.constant dense<0.000000e+00> : vector<32xf32>
    %239 = vector.multi_reduction <add>, %238, %cst_121 [1] : vector<32x128xf32> to vector<32xf32>
    %240 = vector.shape_cast %239 : vector<32xf32> to vector<32x1xf32>
    %cst_122 = arith.constant 1.280000e+02 : f32
    %241 = vector.broadcast %cst_122 : f32 to vector<32x1xf32>
    %242 = arith.divf %240, %241 : vector<32x1xf32>
    %243 = vector.broadcast %235 : vector<32x1xf32> to vector<32x128xf32>
    %244 = arith.subf %227, %243 : vector<32x128xf32>
    %cst_123 = arith.constant 9.99999974E-6 : f32
    %245 = vector.broadcast %cst_123 : f32 to vector<32x1xf32>
    %246 = arith.addf %242, %245 : vector<32x1xf32>
    %247 = math.rsqrt %246 : vector<32x1xf32>
    %248 = vector.broadcast %247 : vector<32x1xf32> to vector<32x128xf32>
    %249 = arith.mulf %244, %248 : vector<32x128xf32>
    %250 = vector.broadcast %229 : vector<1x128xf32> to vector<32x128xf32>
    %251 = arith.mulf %249, %250 : vector<32x128xf32>
    %252 = vector.broadcast %231 : vector<1x128xf32> to vector<32x128xf32>
    %253 = arith.addf %251, %252 : vector<32x128xf32>
    %254 = arith.truncf %253 : vector<32x128xf32> to vector<32x128xbf16>
    %c0_124 = arith.constant 0 : index
    %c0_125 = arith.constant 0 : index
    %255 = vector.load %arg17[%c0_124, %c0_125] : memref<128x128xbf16, #tpu.memory_space<vmem>>, vector<128x128xbf16>
    %cst_126 = arith.constant dense<0.000000e+00> : vector<32x128xf32>
    %256 = tpu.matmul %254, %255, %cst_126 {dimension_numbers = #tpu.dot_dimension_numbers<[1], [0], [0], [1], [0, 0, 1, 1], [], []>} : vector<32x128xbf16>, vector<128x128xbf16>, vector<32x128xf32> -> vector<32x128xf32>
    %c0_127 = arith.constant 0 : index
    %c0_128 = arith.constant 0 : index
    %257 = vector.load %arg18[%c0_127, %c0_128] : memref<1x128xf32, #tpu.memory_space<vmem>>, vector<1x128xf32>
    %258 = vector.broadcast %257 : vector<1x128xf32> to vector<32x128xf32>
    %259 = arith.addf %256, %258 : vector<32x128xf32>
    %260 = vector.extract_strided_slice %259 {offsets = [0, 0], sizes = [32, 1], strides = [1, 1]} : vector<32x128xf32> to vector<32x1xf32>
    %261 = vector.extract_strided_slice %259 {offsets = [0, 1], sizes = [32, 1], strides = [1, 1]} : vector<32x128xf32> to vector<32x1xf32>
    %262 = math.cos %260 : vector<32x1xf32>
    %cst_129 = arith.constant 3.806000e+00 : f32
    %263 = vector.broadcast %cst_129 : f32 to vector<32x1xf32>
    %264 = arith.mulf %263, %262 : vector<32x1xf32>
    %265 = math.sin %260 : vector<32x1xf32>
    %cst_130 = arith.constant 3.806000e+00 : f32
    %266 = vector.broadcast %cst_130 : f32 to vector<32x1xf32>
    %267 = arith.mulf %266, %265 : vector<32x1xf32>
    %268 = math.cos %261 : vector<32x1xf32>
    %269 = arith.mulf %267, %268 : vector<32x1xf32>
    %270 = math.sin %261 : vector<32x1xf32>
    %271 = arith.mulf %267, %270 : vector<32x1xf32>
    %272 = tpu.iota {dimensions = array<i32: 1>} : vector<32x128xi32>
    %c0_i32 = arith.constant 0 : i32
    %273 = vector.broadcast %c0_i32 : i32 to vector<32x128xi32>
    %274 = arith.cmpi eq, %272, %273 : vector<32x128xi32>
    %c1_i32 = arith.constant 1 : i32
    %275 = vector.broadcast %c1_i32 : i32 to vector<32x128xi32>
    %276 = arith.cmpi eq, %272, %275 : vector<32x128xi32>
    %c2_i32 = arith.constant 2 : i32
    %277 = vector.broadcast %c2_i32 : i32 to vector<32x128xi32>
    %278 = arith.cmpi eq, %272, %277 : vector<32x128xi32>
    %cst_131 = arith.constant 0.000000e+00 : f32
    %279 = vector.shape_cast %271 : vector<32x1xf32> to vector<32x1xf32>
    %280 = vector.broadcast %279 : vector<32x1xf32> to vector<32x128xf32>
    %281 = vector.broadcast %cst_131 : f32 to vector<32x128xf32>
    %282 = arith.select %278, %280, %281 : vector<32x128xi1>, vector<32x128xf32>
    %283 = vector.shape_cast %269 : vector<32x1xf32> to vector<32x1xf32>
    %284 = vector.broadcast %283 : vector<32x1xf32> to vector<32x128xf32>
    %285 = arith.select %276, %284, %282 : vector<32x128xi1>, vector<32x128xf32>
    %286 = vector.shape_cast %264 : vector<32x1xf32> to vector<32x1xf32>
    %287 = vector.broadcast %286 : vector<32x1xf32> to vector<32x128xf32>
    %288 = arith.select %274, %287, %285 : vector<32x128xi1>, vector<32x128xf32>
    %c0_132 = arith.constant 0 : index
    %c0_133 = arith.constant 0 : index
    %289 = vector.load %arg19[%c0_132, %c0_133] : memref<32x128xf32, #tpu.memory_space<vmem>>, vector<32x128xf32>
    tpu.vector_store %arg19[%c0_132, %c0_133], %288 {strides = array<i32>} : memref<32x128xf32, #tpu.memory_space<vmem>>, vector<32x128xf32>,
    return
  }
  func.func @transform_0(%arg0: i32) -> (i32, i32) {
    %c0_i32 = arith.constant 0 : i32
    %c0_i32_0 = arith.constant 0 : i32
    %c0_i32_1 = arith.constant 0 : i32
    return %c0_i32, %c0_i32_0 : i32, i32
  }
  func.func @transform_1(%arg0: i32) -> (i32, i32) {
    %c0_i32 = arith.constant 0 : i32
    %c0_i32_0 = arith.constant 0 : i32
    %c0_i32_1 = arith.constant 0 : i32
    return %c0_i32, %c0_i32_0 : i32, i32
  }
  func.func @transform_2(%arg0: i32) -> (i32, i32) {
    %c0_i32 = arith.constant 0 : i32
    %c0_i32_0 = arith.constant 0 : i32
    %c0_i32_1 = arith.constant 0 : i32
    return %c0_i32, %c0_i32_0 : i32, i32
  }
  func.func @transform_3(%arg0: i32) -> (i32, i32) {
    %c0_i32 = arith.constant 0 : i32
    %c0_i32_0 = arith.constant 0 : i32
    %c0_i32_1 = arith.constant 0 : i32
    return %c0_i32, %c0_i32_0 : i32, i32
  }
  func.func @transform_4(%arg0: i32) -> (i32, i32, i32) {
    %c0_i32 = arith.constant 0 : i32
    %c0_i32_0 = arith.constant 0 : i32
    %c0_i32_1 = arith.constant 0 : i32
    %c0_i32_2 = arith.constant 0 : i32
    return %c0_i32, %c0_i32_0, %c0_i32_1 : i32, i32, i32
  }
  func.func @transform_5(%arg0: i32) -> (i32, i32, i32) {
    %c0_i32 = arith.constant 0 : i32
    %c0_i32_0 = arith.constant 0 : i32
    %c0_i32_1 = arith.constant 0 : i32
    %c0_i32_2 = arith.constant 0 : i32
    return %c0_i32, %c0_i32_0, %c0_i32_1 : i32, i32, i32
  }
  func.func @transform_6(%arg0: i32) -> (i32, i32, i32) {
    %c0_i32 = arith.constant 0 : i32
    %c0_i32_0 = arith.constant 0 : i32
    %c0_i32_1 = arith.constant 0 : i32
    %c0_i32_2 = arith.constant 0 : i32
    return %c0_i32, %c0_i32_0, %c0_i32_1 : i32, i32, i32
  }
  func.func @transform_7(%arg0: i32) -> (i32, i32, i32) {
    %c0_i32 = arith.constant 0 : i32
    %c0_i32_0 = arith.constant 0 : i32
    %c0_i32_1 = arith.constant 0 : i32
    %c0_i32_2 = arith.constant 0 : i32
    return %c0_i32, %c0_i32_0, %c0_i32_1 : i32, i32, i32
  }
  func.func @transform_8(%arg0: i32) -> (i32, i32, i32) {
    %c0_i32 = arith.constant 0 : i32
    %c0_i32_0 = arith.constant 0 : i32
    %c0_i32_1 = arith.constant 0 : i32
    %c0_i32_2 = arith.constant 0 : i32
    return %c0_i32, %c0_i32_0, %c0_i32_1 : i32, i32, i32
  }
  func.func @transform_9(%arg0: i32) -> (i32, i32, i32) {
    %c0_i32 = arith.constant 0 : i32
    %c0_i32_0 = arith.constant 0 : i32
    %c0_i32_1 = arith.constant 0 : i32
    %c0_i32_2 = arith.constant 0 : i32
    return %c0_i32, %c0_i32_0, %c0_i32_1 : i32, i32, i32
  }
  func.func @transform_10(%arg0: i32) -> (i32, i32, i32) {
    %c0_i32 = arith.constant 0 : i32
    %c0_i32_0 = arith.constant 0 : i32
    %c0_i32_1 = arith.constant 0 : i32
    %c0_i32_2 = arith.constant 0 : i32
    return %c0_i32, %c0_i32_0, %c0_i32_1 : i32, i32, i32
  }
  func.func @transform_11(%arg0: i32) -> (i32, i32, i32) {
    %c0_i32 = arith.constant 0 : i32
    %c0_i32_0 = arith.constant 0 : i32
    %c0_i32_1 = arith.constant 0 : i32
    %c0_i32_2 = arith.constant 0 : i32
    return %c0_i32, %c0_i32_0, %c0_i32_1 : i32, i32, i32
  }
  func.func @transform_12(%arg0: i32) -> (i32, i32, i32) {
    %c0_i32 = arith.constant 0 : i32
    %c0_i32_0 = arith.constant 0 : i32
    %c0_i32_1 = arith.constant 0 : i32
    %c0_i32_2 = arith.constant 0 : i32
    return %c0_i32, %c0_i32_0, %c0_i32_1 : i32, i32, i32
  }
  func.func @transform_13(%arg0: i32) -> (i32, i32, i32) {
    %c0_i32 = arith.constant 0 : i32
    %c0_i32_0 = arith.constant 0 : i32
    %c0_i32_1 = arith.constant 0 : i32
    %c0_i32_2 = arith.constant 0 : i32
    return %c0_i32, %c0_i32_0, %c0_i32_1 : i32, i32, i32
  }
  func.func @transform_14(%arg0: i32) -> (i32, i32, i32) {
    %c0_i32 = arith.constant 0 : i32
    %c0_i32_0 = arith.constant 0 : i32
    %c0_i32_1 = arith.constant 0 : i32
    %c0_i32_2 = arith.constant 0 : i32
    return %c0_i32, %c0_i32_0, %c0_i32_1 : i32, i32, i32
  }
  func.func @transform_15(%arg0: i32) -> (i32, i32, i32) {
    %c0_i32 = arith.constant 0 : i32
    %c0_i32_0 = arith.constant 0 : i32
    %c0_i32_1 = arith.constant 0 : i32
    %c0_i32_2 = arith.constant 0 : i32
    return %c0_i32, %c0_i32_0, %c0_i32_1 : i32, i32, i32
  }
  func.func @transform_16(%arg0: i32) -> (i32, i32) {
    %c0_i32 = arith.constant 0 : i32
    %c0_i32_0 = arith.constant 0 : i32
    %c0_i32_1 = arith.constant 0 : i32
    return %c0_i32, %c0_i32_0 : i32, i32
  }
  func.func @transform_17(%arg0: i32) -> (i32, i32) {
    %c0_i32 = arith.constant 0 : i32
    %c0_i32_0 = arith.constant 0 : i32
    %c0_i32_1 = arith.constant 0 : i32
    return %c0_i32, %c0_i32_0 : i32, i32
  }
  func.func @transform_18(%arg0: i32) -> (i32, i32) {
    %c0_i32 = arith.constant 0 : i32
    %c0_i32_0 = arith.constant 0 : i32
    %c0_i32_1 = arith.constant 0 : i32
    return %c0_i32, %c0_i32_0 : i32, i32
  }
}

</mosaic_0001>

<bundles_post_ra>
// kernel: tpu_custom_call.1
= control target key start
LH: loop header
LB: loop body
LE: loop exit
PB: predicated region body
PF: predicated region fallthrough
CT: control target
= control target key end

     0   :  { %s7592_s0 = inlined_call_operand.hbm [shape: bf16[32,128], index: 0, kind: input, shape index: {}]   ;;  %s7593_s1 = inlined_call_operand.hbm [shape: f32[32,32], index: 1, kind: input, shape index: {}]   ;;  %s7594_s2 = inlined_call_operand.hbm [shape: bf16[128,128], index: 2, kind: input, shape index: {}]   ;;  %s7595_s3 = inlined_call_operand.hbm [shape: f32[32,128], index: 3, kind: input, shape index: {}]   ;;  %s7596_s4 = inlined_call_operand.hbm [shape: bf16[2,128,384], index: 4, kind: input, shape index: {}]   ;;  %s7597_s5 = inlined_call_operand.hbm [shape: f32[2,1,384], index: 5, kind: input, shape index: {}]   ;;  %s7598_s6 = inlined_call_operand.hbm [shape: bf16[2,128,128], index: 6, kind: input, shape index: {}]   ;;  %s7599_s7 = inlined_call_operand.vmem [shape: f32[2,1,128], index: 7, kind: input, shape index: {}]   ;;  %s7600_s8 = inlined_call_operand.hbm [shape: f32[2,1,128], index: 8, kind: input, shape index: {}]   ;;  %s7601_s9 = inlined_call_operand.hbm [shape: f32[2,1,128], index: 9, kind: input, shape index: {}]   ;;  %s7602_s10 = inlined_call_operand.hbm [shape: bf16[2,128,512], index: 10, kind: input, shape index: {}]   ;;  %s7603_s11 = inlined_call_operand.vmem [shape: f32[2,1,512], index: 11, kind: input, shape index: {}]   ;;  %s7604_s12 = inlined_call_operand.hbm [shape: bf16[2,512,128], index: 12, kind: input, shape index: {}]   ;;  %s7605_s13 = inlined_call_operand.vmem [shape: f32[2,1,128], index: 13, kind: input, shape index: {}]   ;;  %s7606_s14 = inlined_call_operand.hbm [shape: f32[2,1,128], index: 14, kind: input, shape index: {}]   ;;  %s7607_s15 = inlined_call_operand.vmem [shape: f32[2,1,128], index: 15, kind: input, shape index: {}]   ;;  %s7608_s16 = inlined_call_operand.hbm [shape: bf16[128,128], index: 16, kind: input, shape index: {}]   ;;  %s7609_s17 = inlined_call_operand.vmem [shape: f32[1,128], index: 17, kind: input, shape index: {}]   ;;  %s7610_s18 = inlined_call_operand.hbm [shape: f32[32,128], index: 18, kind: output, shape index: {}]  }
   0x1   :  { %7625 = sst [smem:[#allocation35_spill]] %s7592_s0 }
   0x2   :  { %7626 = sst [smem:[#allocation36_spill]] %s7593_s1 }
   0x3   :  { %7627 = sst [smem:[#allocation37_spill]] %s7594_s2 }
   0x4   :  { %23 = vsyncpa [#allocation3], 0 }
   0x5   :  { %24 = vsyncpa [#allocation6], 0 }
   0x6   :  { %25 = vsyncpa [#allocation9], 0 }
   0x7   :  { %26 = vsyncpa [#allocation12], 0 }
   0x8   :  { %27 = vsyncpa [#allocation15], 0 }
   0x9   :  { %28 = vsyncpa [#allocation18], 0 }
   0xa   :  { %29 = vsyncpa [#allocation21], 0  ;;  %s7628_s29 = sld [smem:[#allocation36_spill]] }
  0x10   :  { %s48_s30 = sshll.u32 %s7628_s29, 4  ;;  %s49_s30 = int_to_ptr.hbm [resolvable:$true] %s48_s30 }
  0x11   :  { %30 = vsyncpa [#allocation4], 0  ;;  %s6364_s0 = smov [#allocation5]   ;;  %s74_s21 = sshll.u32 %s7595_s3, 4  ;;  %s75_s21 = int_to_ptr.hbm [resolvable:$true] %s74_s21 }
  0x12   :  { %s50_s19 = sshll.u32 %s6364_s0, 4  ;;  %s6365_s22 = smov 128   ;;  %s51_s19 = int_to_ptr.vmem [resolvable:$true] %s50_s19 }
  0x13   :  { %s6366_s2 = smov 8   ;;  %s6367_s23 = smov [#allocation8]  }
  0x14   :  { %56 = dma.hbm_to_vmem [thread:$0]  %s49_s30, 512, %s51_s19, [#allocation6], %s6365_s22, %s6365_s22, %s6366_s2  }
  0x15   :  { %s76_s24 = sshll.u32 %s6367_s23, 4  ;;  %s100_s27 = sshll.u32 %s7597_s5, 4  ;;  %s77_s24 = int_to_ptr.vmem [resolvable:$true] %s76_s24  ;;  %s101_s27 = int_to_ptr.hbm [resolvable:$true] %s100_s27 }
  0x16   :  { %82 = dma.hbm_to_vmem [thread:$0]  %s75_s21, 512, %s77_s24, [#allocation9], %s6365_s22, %s6365_s22, %s6366_s2  }
  0x17   :  { %s6368_s3 = smov [#allocation11]   ;;  %s128_s30 = sshll.u32 %s7600_s8, 4  ;;  %s129_s30 = int_to_ptr.hbm [resolvable:$true] %s128_s30 }
  0x18   :  { %s102_s28 = sshll.u32 %s6368_s3, 4  ;;  %s6369_s19 = smov 48   ;;  %s103_s28 = int_to_ptr.vmem [resolvable:$true] %s102_s28 }
  0x19   :  { %s6370_s1 = smov 3   ;;  %s6371_s20 = smov [#allocation14]  }
  0x1a   :  { %108 = dma.hbm_to_vmem [thread:$0]  %s101_s27, 96, %s103_s28, [#allocation12], %s6369_s19, %s6369_s19, %s6370_s1  }
  0x1b   :  { %s130_s23 = sshll.u32 %s6371_s20, 4  ;;  %s6372_s5 = smov 16   ;;  %s131_s23 = int_to_ptr.vmem [resolvable:$true] %s130_s23 }
  0x1c   :  { %s6373_s25 = smov 1   ;;  %s154_s26 = sshll.u32 %s7602_s10, 4  ;;  %s155_s26 = int_to_ptr.hbm [resolvable:$true] %s154_s26 }
  0x1d   :  { %136 = dma.hbm_to_vmem [thread:$0]  %s129_s30, 32, %s131_s23, [#allocation15], %s6372_s5, %s6372_s5, %s6373_s25  }
  0x1e   :  { %s6374_s3 = smov [#allocation17]   ;;  %s6375_s29 = smov 256  }
  0x1f   :  { %s156_s8 = sshll.u32 %s6374_s3, 4  ;;  %s184_s0 = sshll.u32 %s7606_s14, 4  ;;  %s157_s8 = int_to_ptr.vmem [resolvable:$true] %s156_s8  ;;  %s185_s0 = int_to_ptr.hbm [resolvable:$true] %s184_s0 }
  0x20   :  { %162 = dma.hbm_to_vmem [thread:$0]  %s155_s26, 8192, %s157_s8, [#allocation18], %s6375_s29, %s6375_s29, %s6372_s5  }
  0x21   :  { %s6376_s19 = smov [#allocation20]   ;;  %s7629_s23 = sld [smem:[#allocation35_spill]] }
  0x22   :  { %s186_s1 = sshll.u32 %s6376_s19, 4  ;;  %s6377_s10 = smov [#allocation2]   ;;  %s187_s1 = int_to_ptr.vmem [resolvable:$true] %s186_s1 }
  0x23   :  { %192 = dma.hbm_to_vmem [thread:$0]  %s185_s0, 32, %s187_s1, [#allocation21], %s6372_s5, %s6372_s5, %s6373_s25  }
  0x24   :  { %s37_s24 = sshll.u32 %s6377_s10, 4  ;;  %s6378_s26 = smov 64   ;;  %s38_s24 = int_to_ptr.vmem [resolvable:$true] %s37_s24 }
  0x25   :  { %s6379_s3 = smov 4   ;;  %s7630_s29 = sld [smem:[#allocation37_spill]] }
  0x26   :  { %s6380_s28 = smov [#allocation7]   ;;  %s87_s1 = sshll.u32 %s7596_s4, 4  ;;  %s88_s1 = int_to_ptr.hbm [resolvable:$true] %s87_s1 }
  0x27   :  { %s35_s21 = sshll.u32 %s7629_s23, 4  ;;  %s63_s19 = sshll.u32 %s6380_s28, 4  ;;  %s36_s21 = int_to_ptr.hbm [resolvable:$true] %s35_s21  ;;  %s64_s19 = int_to_ptr.vmem [resolvable:$true] %s63_s19 }
  0x28   :  { %43 = dma.hbm_to_vmem [thread:$0]  %s36_s21, 256, %s38_s24, [#allocation3], %s6378_s26, %s6378_s26, %s6379_s3  }
  0x29   :  { %s6381_s20 = smov [#allocation10]   ;;  %s6382_s21 = smov 192  }
  0x2a   :  { %s89_s23 = sshll.u32 %s6381_s20, 4  ;;  %s6383_s10 = smov 12   ;;  %s90_s23 = int_to_ptr.vmem [resolvable:$true] %s89_s23 }
  0x2b   :  { %s61_s27 = sshll.u32 %s7630_s29, 4  ;;  %s113_s8 = sshll.u32 %s7598_s6, 4  ;;  %s62_s27 = int_to_ptr.hbm [resolvable:$true] %s61_s27  ;;  %s114_s8 = int_to_ptr.hbm [resolvable:$true] %s113_s8 }
  0x2c   :  { %69 = dma.hbm_to_vmem [thread:$0]  %s62_s27, 1024, %s64_s19, [#allocation6], %s6378_s26, %s6378_s26, %s6379_s3  }
  0x2d   :  { %95 = dma.hbm_to_vmem [thread:$0]  %s88_s1, 6144, %s90_s23, [#allocation9], %s6382_s21, %s6382_s21, %s6383_s10  }
  0x2e   :  { %s6384_s29 = smov [#allocation13]   ;;  %s141_s0 = sshll.u32 %s7601_s9, 4  ;;  %s142_s0 = int_to_ptr.hbm [resolvable:$true] %s141_s0 }
  0x2f   :  { %s115_s28 = sshll.u32 %s6384_s29, 4  ;;  %s6385_s27 = smov [#allocation16]   ;;  %s116_s28 = int_to_ptr.vmem [resolvable:$true] %s115_s28 }
  0x30   :  { %121 = dma.hbm_to_vmem [thread:$0]  %s114_s8, 2048, %s116_s28, [#allocation12], %s6378_s26, %s6378_s26, %s6379_s3  }
  0x31   :  { %s143_s19 = sshll.u32 %s6385_s27, 4  ;;  %s169_s23 = sshll.u32 %s7604_s12, 4  ;;  %s144_s19 = int_to_ptr.vmem [resolvable:$true] %s143_s19  ;;  %s170_s23 = int_to_ptr.hbm [resolvable:$true] %s169_s23 }
  0x32   :  { %149 = dma.hbm_to_vmem [thread:$0]  %s142_s0, 32, %s144_s19, [#allocation15], %s6372_s5, %s6372_s5, %s6373_s25  }
  0x33   :  { %s199_s9 = sshll.u32 %s7608_s16, 4  ;;  %s6386_s10 = smov [#allocation19]   ;;  %s200_s9 = int_to_ptr.hbm [resolvable:$true] %s199_s9 }
  0x34   :  { %s171_s24 = sshll.u32 %s6386_s10, 4  ;;  %s6387_s14 = smov [#allocation22]   ;;  %s172_s24 = int_to_ptr.vmem [resolvable:$true] %s171_s24 }
  0x35   :  { %177 = dma.hbm_to_vmem [thread:$0]  %s170_s23, 8192, %s172_s24, [#allocation18], %s6378_s26, %s6378_s26, %s6379_s3  }
  0x36   :  { %s201_s12 = sshll.u32 %s6387_s14, 4  ;;  %s202_s12 = int_to_ptr.vmem [resolvable:$true] %s201_s12 }
  0x37   :  { %207 = dma.hbm_to_vmem [thread:$0]  %s200_s9, 1024, %s202_s12, [#allocation21], %s6378_s26, %s6378_s26, %s6379_s3  }
  0x38   :  { %6348 = dma.done.wait [#allocation3], 256  }
  0x39   :  { %6349 = vsyncadd [#allocation3], 4294967040 }
  0x3a   :  { %6350 = dma.done.wait [#allocation6], 1536  }
  0x3b   :  { %6351 = vsyncadd [#allocation6], 4294965760 }
  0x3c   :  { %6352 = dma.done.wait [#allocation9], 6656  }
  0x3d   :  { %6353 = vsyncadd [#allocation9], 4294960640 }
  0x3e   :  { %6354 = dma.done.wait [#allocation12], 2144  }
  0x3f   :  { %6355 = vsyncadd [#allocation12], 4294965152 }
  0x40   :  { %6356 = dma.done.wait [#allocation15], 64  }
  0x41   :  { %6357 = vsyncadd [#allocation15], 4294967232 }
  0x42   :  { %6358 = dma.done.wait [#allocation18], 16384  }
  0x43   :  { %6359 = vsyncadd [#allocation18], 4294950912 }
  0x44   :  { %6360 = dma.done.wait [#allocation21], 1056  }
  0x45   :  { %6361 = vsyncadd [#allocation21], 4294966240  ;;  %v5623_v0 = vld [vmem:[#allocation7 + $0x38] sm:$0xff]  ;;  %v5622_v1 = vld [vmem:[#allocation7 + $0x30] sm:$0xff]  ;;  %vm621_vm0 = vcmask 523264   ;;  %vm653_vm1 = vcmask 261120  }
  0x46   :  { %347 = vmatpush.bf16.msra.mxu0 %v5623_v0  ;;  %v5621_v2 = vld [vmem:[#allocation7 + $0x28] sm:$0xff]  ;;  %v5620_v3 = vld [vmem:[#allocation7 + $0x20] sm:$0xff]  ;;  %v5619_v4 = vld [vmem:[#allocation7 + $0x18] sm:$0xff]  ;;  %s6397_s20 = smov [#allocation23]   ;;  %s4711_s9 = sshll.u32 %s7610_s18, 4  ;;  %s4712_s9 = int_to_ptr.hbm [resolvable:$true] %s4711_s9 }
  0x47   :  { %v5618_v5 = vld [vmem:[#allocation7 + $0x10] sm:$0xff]  ;;  %v4856_v6 = vld [vmem:[#allocation10 + $0xa8] sm:$0xf]  ;;  %v5645_v8 = vld [vmem:[#allocation10 + $0xac] sm:$0xf]  ;;  %s4709_s23 = sshll.u32 %s6397_s20, 4  ;;  %s4710_s23 = int_to_ptr.vmem [resolvable:$true] %s4709_s23 }
  0x48   :  { %v5646_v7 = vld [vmem:[#allocation10 + $0xb0] sm:$0xf0]  ;;  %v4858_v10 = vld [vmem:[#allocation10 + $0xb4] sm:$0xf0]  ;;  %v4864_v11 = vld [vmem:[#allocation10 + $0xb0] sm:$0xf] }
  0x49   :  { %v4857_v9 = vor.u32 %v5646_v7, %v4856_v6  ;;  %v5647_v12 = vld [vmem:[#allocation10 + $0xb8] sm:$0xf0]  ;;  %v4861_v13 = vor.u32 %v5645_v8, %v4858_v10  ;;  %v4844_v15 = vld [vmem:[#allocation10 + $0x90] sm:$0xf]  ;;  %v5642_v17 = vld [vmem:[#allocation10 + $0x94] sm:$0xf] }
  0x4a   :  { %348 = vmatpush.bf16.msra.mxu0 %v5622_v1  ;;  %v4865_v14 = vor.u32 %v5647_v12, %v4864_v11  ;;  %v5643_v16 = vld [vmem:[#allocation10 + $0x98] sm:$0xf0]  ;;  %v5617_v18 = vld [vmem:[#allocation7 + $0x8] sm:$0xff]  ;;  %v4846_v20 = vld [vmem:[#allocation10 + $0x9c] sm:$0xf0] }
  0x4b   :  { %540 = vmatpush.bf16.msra.mxu1 %v4857_v9  ;;  %v4845_v19 = vor.u32 %v5643_v16, %v4844_v15  ;;  %v4852_v21 = vld [vmem:[#allocation10 + $0x98] sm:$0xf]  ;;  %v5644_v22 = vld [vmem:[#allocation10 + $0xa0] sm:$0xf0]  ;;  %559 = vmatpush.bf16.msra.mxu2 %v4861_v13  ;;  %v4849_v23 = vor.u32 %v5642_v17, %v4846_v20  ;;  %v5639_v27 = vld [vmem:[#allocation10 + $0x7c] sm:$0xf] }
  0x4c   :  { %578 = vmatpush.bf16.msra.mxu3 %v4865_v14  ;;  %v4853_v24 = vor.u32 %v5644_v22, %v4852_v21  ;;  %v4832_v25 = vld [vmem:[#allocation10 + $0x78] sm:$0xf]  ;;  %v5640_v26 = vld [vmem:[#allocation10 + $0x80] sm:$0xf0]  ;;  %v4834_v28 = vld [vmem:[#allocation10 + $0x84] sm:$0xf0] }
  0x4d   :  { %v4840_v29 = vld [vmem:[#allocation10 + $0x80] sm:$0xf]  ;;  %v5641_v30 = vld [vmem:[#allocation10 + $0x88] sm:$0xf0]  ;;  %v4833_v31 = vor.u32 %v5640_v26, %v4832_v25  ;;  %v4837_v32 = vor.u32 %v5639_v27, %v4834_v28  ;;  %v5636_v37 = vld [vmem:[#allocation10 + $0x64] sm:$0xf] }
  0x4e   :  { %349 = vmatpush.bf16.msra.mxu0 %v5621_v2  ;;  %v4841_v33 = vor.u32 %v5641_v30, %v4840_v29  ;;  %v4820_v34 = vld [vmem:[#allocation10 + $0x60] sm:$0xf]  ;;  %v5637_v35 = vld [vmem:[#allocation10 + $0x68] sm:$0xf0]  ;;  %v4822_v38 = vld [vmem:[#allocation10 + $0x6c] sm:$0xf0] }
  0x4f   :  { %541 = vmatpush.bf16.msra.mxu1 %v4845_v19  ;;  %560 = vmatpush.bf16.msra.mxu2 %v4849_v23  ;;  %v5616_v36 = vld [vmem:[#allocation7] sm:$0xff]  ;;  %v4828_v39 = vld [vmem:[#allocation10 + $0x68] sm:$0xf]  ;;  %v5638_v40 = vld [vmem:[#allocation10 + $0x70] sm:$0xf0]  ;;  %v4821_v41 = vor.u32 %v5637_v35, %v4820_v34  ;;  %v4825_v43 = vor.u32 %v5636_v37, %v4822_v38 }
  0x50   :  { %579 = vmatpush.bf16.msra.mxu3 %v4853_v24  ;;  %v5614_v42 = vld [vmem:[#allocation2] sm:$0xff]  ;;  %v4808_v44 = vld [vmem:[#allocation10 + $0x48] sm:$0xf]  ;;  %v4829_v46 = vor.u32 %v5638_v40, %v4828_v39  ;;  %v5633_v47 = vld [vmem:[#allocation10 + $0x4c] sm:$0xf] }
  0x51   :  { %v5634_v45 = vld [vmem:[#allocation10 + $0x50] sm:$0xf0]  ;;  %v4810_v48 = vld [vmem:[#allocation10 + $0x54] sm:$0xf0]  ;;  %v4816_v49 = vld [vmem:[#allocation10 + $0x50] sm:$0xf] }
  0x52   :  { %350 = vmatpush.bf16.msra.mxu0 %v5620_v3  ;;  %v5635_v50 = vld [vmem:[#allocation10 + $0x58] sm:$0xf0]  ;;  %v4809_v51 = vor.u32 %v5634_v45, %v4808_v44  ;;  %v4813_v52 = vor.u32 %v5633_v47, %v4810_v48  ;;  %v4796_v55 = vld [vmem:[#allocation10 + $0x30] sm:$0xf]  ;;  %v5630_v57 = vld [vmem:[#allocation10 + $0x34] sm:$0xf] }
  0x53   :  { %542 = vmatpush.bf16.msra.mxu1 %v4833_v31  ;;  %561 = vmatpush.bf16.msra.mxu2 %v4837_v32  ;;  %v4817_v53 = vor.u32 %v5635_v50, %v4816_v49  ;;  %v5615_v54 = vld [vmem:[#allocation2 + $0x8] sm:$0xff]  ;;  %v4798_v59 = vld [vmem:[#allocation10 + $0x3c] sm:$0xf0]  ;;  %v5632_v61 = vld [vmem:[#allocation10 + $0x40] sm:$0xf0] }
  0x54   :  { %580 = vmatpush.bf16.msra.mxu3 %v4841_v33  ;;  %v5631_v56 = vld [vmem:[#allocation10 + $0x38] sm:$0xf0]  ;;  %v4804_v60 = vld [vmem:[#allocation10 + $0x38] sm:$0xf]  ;;  %v4801_v62 = vor.u32 %v5630_v57, %v4798_v59  ;;  %v5628_v1 = vld [vmem:[#allocation10 + $0x20] sm:$0xf0] }
  0x55   :  { %v4797_v58 = vor.u32 %v5631_v56, %v4796_v55  ;;  %v4805_v63 = vor.u32 %v5632_v61, %v4804_v60  ;;  %v4784_v0 = vld [vmem:[#allocation10 + $0x18] sm:$0xf]  ;;  %v5627_v2 = vld [vmem:[#allocation10 + $0x1c] sm:$0xf]  ;;  %v5629_v6 = vld [vmem:[#allocation10 + $0x28] sm:$0xf0] }
  0x56   :  { %351 = vmatpush.bf16.msra.mxu0 %v5619_v4  ;;  %v4785_v3 = vor.u32 %v5628_v1, %v4784_v0  ;;  %v4786_v4 = vld [vmem:[#allocation10 + $0x24] sm:$0xf0]  ;;  %v4772_v9 = vld [vmem:[#allocation10] sm:$0xf]  ;;  %v5625_v10 = vld [vmem:[#allocation10 + $0x8] sm:$0xf0] }
  0x57   :  { %543 = vmatpush.bf16.msra.mxu1 %v4821_v41  ;;  %562 = vmatpush.bf16.msra.mxu2 %v4825_v43  ;;  %v4789_v7 = vor.u32 %v5627_v2, %v4786_v4  ;;  %v5624_v11 = vld [vmem:[#allocation10 + $0x4] sm:$0xf]  ;;  %v4773_v12 = vor.u32 %v5625_v10, %v4772_v9  ;;  %v4774_v13 = vld [vmem:[#allocation10 + $0xc] sm:$0xf0]  ;;  %v4780_v14 = vld [vmem:[#allocation10 + $0x8] sm:$0xf] }
  0x58   :  { %581 = vmatpush.bf16.msra.mxu3 %v4829_v46  ;;  %v5626_v15 = vld [vmem:[#allocation10 + $0x10] sm:$0xf0]  ;;  %v4777_v16 = vor.u32 %v5624_v11, %v4774_v13  ;;  %v283_v19 = vld [vmem:[#allocation8] sm:$0xff]  ;;  %v284_v20 = vld [vmem:[#allocation8 + $0x8] sm:$0xff] }
  0x59   :  { %v4781_v17 = vor.u32 %v5626_v15, %v4780_v14  ;;  %v285_v26 = vld [vmem:[#allocation8 + $0x10] sm:$0xff]  ;;  %v286_v27 = vld [vmem:[#allocation8 + $0x18] sm:$0xff]  ;;  %v404_v33 = vld [vmem:[#allocation11] sm:$0x7] }
  0x5a   :  { %352 = vmatpush.bf16.msra.mxu0 %v5618_v5  ;;  %v4792_v5 = vld [vmem:[#allocation10 + $0x20] sm:$0xf]  ;;  %v407_v35 = vperm.slane %v404_v33, 1  ;;  %v406_v38 = vperm.slane %v404_v33, 0 }
  0x5b   :  { %544 = vmatpush.bf16.msra.mxu1 %v4809_v51  ;;  %563 = vmatpush.bf16.msra.mxu2 %v4813_v52  ;;  %v4793_v8 = vor.u32 %v5629_v6, %v4792_v5 }
  0x5c   :  { %582 = vmatpush.bf16.msra.mxu3 %v4817_v53  ;;  %v408_v53 = vperm.slane %v404_v33, 2 }
  0x5e   :  { %353 = vmatpush.bf16.msra.mxu0 %v5617_v18 }
  0x5f   :  { %545 = vmatpush.bf16.msra.mxu1 %v4797_v58  ;;  %564 = vmatpush.bf16.msra.mxu2 %v4801_v62 }
  0x60   :  { %583 = vmatpush.bf16.msra.mxu3 %v4805_v63 }
  0x62   :  { %354 = vmatpush.bf16.msra.mxu0 %v5616_v36 }
  0x63   :  { %546 = vmatpush.bf16.msra.mxu1 %v4785_v3  ;;  %565 = vmatpush.bf16.msra.mxu2 %v4789_v7 }
  0x64   :  { %584 = vmatpush.bf16.msra.mxu3 %v4793_v8 }
  0x65   :  { %355 = vmatmul.bf16.vlgmr.msra.gmra.mxu0 %v5614_v42 }
  0x67   :  { %547 = vmatpush.bf16.msra.mxu1 %v4773_v12  ;;  %566 = vmatpush.bf16.msra.mxu2 %v4777_v16 }
  0x68   :  { %585 = vmatpush.bf16.msra.mxu3 %v4781_v17 }
  0x75   :  { %360 = vmatmul.bf16.gmra.mxu0 %v5615_v54 }
  0xe2   :  { %v356_v18 = vpop.f32.mrf.mxu0 }
  0xe3   :  { %v6563_v22 = vadd.f32 %v356_v18, %v283_v19 }
  0xea   :  { %v358_v21 = vpop.f32.mrf.mxu0 }
  0xeb   :  { %v6565_v23 = vadd.f32 %v358_v21, %v284_v20 }
  0xed   :  { %v370_v24 = vpack.c.bf16 %v6565_v23, %v6563_v22 }
  0xef   :  { %548 = vmatmul.bf16.vlgmr.msra.gmra.mxu1 %v370_v24  ;;  %567 = vmatmul.bf16.vlgmr.msra.gmra.mxu2 %v370_v24 }
  0xf0   :  { %586 = vmatmul.bf16.vlgmr.msra.gmra.mxu3 %v370_v24 }
  0xf2   :  { %v361_v25 = vpop.f32.mrf.mxu0 }
  0xf3   :  { %v6569_v29 = vadd.f32 %v361_v25, %v285_v26 }
  0xfa   :  { %v363_v28 = vpop.f32.mrf.mxu0 }
  0xfb   :  { %v6571_v30 = vadd.f32 %v363_v28, %v286_v27 }
  0xfd   :  { %v371_v31 = vpack.c.bf16 %v6571_v30, %v6569_v29 }
  0xff   :  { %553 = vmatmul.bf16.gmra.mxu1 %v371_v31  ;;  %572 = vmatmul.bf16.gmra.mxu2 %v371_v31 }
 0x100   :  { %591 = vmatmul.bf16.gmra.mxu3 %v371_v31 }
 0x16c   :  { %v549_v32 = vpop.f32.mrf.mxu1 }
 0x16d   :  { %v550_v40 = vadd.f32 %v549_v32, %v406_v38 }
 0x172   :  { %v568_v34 = vpop.f32.mrf.mxu2 }
 0x173   :  { %v587_v36 = vpop.f32.mrf.mxu3  ;;  %v569_v39 = vadd.f32 %v568_v34, %v407_v35 }
 0x174   :  { %v551_v37 = vpop.f32.mrf.mxu1  ;;  %v588_v0 = vadd.f32 %v587_v36, %v408_v53 }
 0x175   :  { %v597_v42 = vpack.c.bf16 %v569_v39, %v550_v40  ;;  %v552_v43 = vadd.f32 %v551_v37, %v406_v38  ;;  %v367_v39 = vld [vmem:[#allocation5 + $0x8] sm:$0xff] }
 0x176   :  { %v598_v10 = vpack.c.bf16 %v588_v0, %v588_v0 }
 0x177   :  { %v609_v48 = vunpack.c.l.b16 %v597_v42  ;;  %v615_v20 = vunpack.c.h.b16 %v597_v42 }
 0x178   :  { %v704_v19 = vunpack.c.l.b16 %v598_v10 }
 0x17a   :  { %v570_v41 = vpop.f32.mrf.mxu2 }
 0x17b   :  { %v571_v44 = vadd.f32 %v570_v41, %v407_v35  ;;  %v589_v45 = vpop.f32.mrf.mxu3 }
 0x17c   :  { %v554_v47 = vpop.f32.mrf.mxu1  ;;  %v590_v58 = vadd.f32 %v589_v45, %v408_v53  ;;  %v368_v45 = vld [vmem:[#allocation5 + $0x10] sm:$0xff] }
 0x17d   :  { %v599_v46 = vpack.c.bf16 %v571_v44, %v552_v43  ;;  %v555_v57 = vadd.f32 %v554_v47, %v406_v38 }
 0x17e   :  { %v600_v4 = vpack.c.bf16 %v590_v58, %v590_v58 }
 0x17f   :  { %v610_v49 = vunpack.c.l.b16 %v599_v46  ;;  %v616_v18 = vunpack.c.h.b16 %v599_v46 }
 0x180   :  { %v705_v15 = vunpack.c.l.b16 %v600_v4 }
 0x181   :  { %v613_v50 = vpack.c.b16 %v610_v49, %v609_v48  ;;  %v619_v24 = vpack.c.b16 %v616_v18, %v615_v20 }
 0x182   :  { %v573_v51 = vpop.f32.mrf.mxu2  ;;  %v708_v21 = vpack.c.b16 %v705_v15, %v704_v19 }
 0x183   :  { %v592_v52 = vpop.f32.mrf.mxu3  ;;  %737 = vrot.lane.b32.xlu1 %v613_v50, %s6378_s26  ;;  %v574_v54 = vadd.f32 %v573_v51, %v407_v35  ;;  %v629_v25 = vsel %vm621_vm0, %v619_v24, 0 }
 0x184   :  { %v593_v55 = vadd.f32 %v592_v52, %v408_v53  ;;  %v556_v56 = vpop.f32.mrf.mxu1 }
 0x185   :  { %v601_v60 = vpack.c.bf16 %v574_v54, %v555_v57  ;;  %v557_v61 = vadd.f32 %v556_v56, %v406_v38 }
 0x186   :  { %v602_v1 = vpack.c.bf16 %v593_v55, %v593_v55 }
 0x187   :  { %v617_v6 = vunpack.c.h.b16 %v601_v60  ;;  %v611_v8 = vunpack.c.l.b16 %v601_v60 }
 0x188   :  { %v706_v11 = vunpack.c.l.b16 %v602_v1 }
 0x18a   :  { %v575_v59 = vpop.f32.mrf.mxu2 }
 0x18b   :  { %v576_v62 = vadd.f32 %v575_v59, %v407_v35  ;;  %v594_v63 = vpop.f32.mrf.mxu3  ;;  %v366_v35 = vld [vmem:[#allocation5] sm:$0xff] }
 0x18c   :  { %v595_v2 = vadd.f32 %v594_v63, %v408_v53  ;;  %v369_v53 = vld [vmem:[#allocation5 + $0x18] sm:$0xff] }
 0x18d   :  { %v603_v3 = vpack.c.bf16 %v576_v62, %v557_v61 }
 0x18e   :  { %v604_v5 = vpack.c.bf16 %v595_v2, %v595_v2 }
 0x18f   :  { %v618_v7 = vunpack.c.h.b16 %v603_v3  ;;  %v612_v9 = vunpack.c.l.b16 %v603_v3 }
 0x190   :  { %v707_v12 = vunpack.c.l.b16 %v604_v5 }
 0x191   :  { %v620_v13 = vpack.c.b16 %v618_v7, %v617_v6  ;;  %v614_v14 = vpack.c.b16 %v612_v9, %v611_v8 }
 0x192   :  { %v6576_v16 = vpack.c.b16 %v707_v12, %v706_v11 }
 0x193   :  { %743 = vrot.lane.b32.xlu0 %v620_v13, %s6378_s26  ;;  %739 = vrot.lane.b32.xlu1 %v614_v14, %s6378_s26  ;;  %v632_v17 = vsel %vm621_vm0, %v620_v13, 0 }
 0x194   :  { %724 = vmatpush.bf16.msrb.mxu1 %v6576_v16  ;;  %640 = vmatpush.bf16.xpose.msrb.mxu0 %v632_v17 }
 0x198   :  { %725 = vmatpush.bf16.msrb.mxu1 %v708_v21 }
 0x19b   :  { %741 = vrot.lane.b32.xlu0 %v619_v24, %s6378_s26 }
 0x19c   :  { %641 = vmatpush.bf16.xpose.msrb.mxu0 %v629_v25 }
 0x1a3   :  { %4866 = vmatmul.msk.bf16.vlgmr.msrb.gmra.mxu0 %vm621_vm0, %v613_v50 }
 0x1b3   :  { %4867 = vmatmul.msk.bf16.gmra.mxu0 %vm621_vm0, %v614_v14 }
 0x1f5   :  { %v738_v32 = vpop.permute.xlu1 %737 }
 0x205   :  { %v744_v26 = vpop.permute.xlu0 %743  ;;  %v740_v33 = vpop.permute.xlu1 %739 }
 0x206   :  { %v755_v27 = vsel %vm621_vm0, %v744_v26, 0 }
 0x207   :  { %763 = vmatpush.bf16.xpose.msrb.mxu2 %v755_v27 }
 0x20d   :  { %v742_v28 = vpop.permute.xlu0 %741 }
 0x20e   :  { %v752_v31 = vsel %vm621_vm0, %v742_v28, 0 }
 0x20f   :  { %764 = vmatpush.bf16.xpose.msrb.mxu2 %v752_v31 }
 0x216   :  { %4870 = vmatmul.msk.bf16.vlgmr.msrb.gmra.mxu2 %vm621_vm0, %v738_v32 }
 0x220   :  { %v643_v34 = vpop.f32.mrf.mxu0 }
 0x221   :  { %v644_v44 = vadd.f32 %v643_v34, %v366_v35 }
 0x223   :  { %v654_v50 = vsel %vm653_vm1, %v644_v44, -inf }
 0x226   :  { %4871 = vmatmul.msk.bf16.gmra.mxu2 %vm621_vm0, %v740_v33 }
 0x228   :  { %v645_v40 = vpop.f32.mrf.mxu0 }
 0x229   :  { %v646_v52 = vadd.f32 %v645_v40, %v367_v39 }
 0x22b   :  { %v657_v59 = vsel %vm653_vm1, %v646_v52, -inf }
 0x230   :  { %v648_v48 = vpop.f32.mrf.mxu0 }
 0x231   :  { %v649_v51 = vadd.f32 %v648_v48, %v368_v45 }
 0x233   :  { %v660_v57 = vsel %vm653_vm1, %v649_v51, -inf }
 0x238   :  { %v650_v58 = vpop.f32.mrf.mxu0 }
 0x239   :  { %v651_v60 = vadd.f32 %v650_v58, %v369_v53 }
 0x23b   :  { %v663_v61 = vsel %vm653_vm1, %v651_v60, -inf }
 0x299   :  { %v766_v36 = vpop.f32.mrf.mxu2 }
 0x29a   :  { %v767_v37 = vadd.f32 %v766_v36, %v366_v35 }
 0x29c   :  { %v776_v38 = vsel %vm653_vm1, %v767_v37, -inf }
 0x29d   :  { %777 = vmax.xlane.f32.xlu2 %v776_v38 }
 0x2a1   :  { %v768_v41 = vpop.f32.mrf.mxu2 }
 0x2a2   :  { %v769_v42 = vadd.f32 %v768_v41, %v367_v39 }
 0x2a4   :  { %v779_v43 = vsel %vm653_vm1, %v769_v42, -inf }
 0x2a5   :  { %780 = vmax.xlane.f32.xlu2 %v779_v43 }
 0x2a9   :  { %v771_v46 = vpop.f32.mrf.mxu2 }
 0x2aa   :  { %v772_v47 = vadd.f32 %v771_v46, %v368_v45 }
 0x2ac   :  { %v782_v49 = vsel %vm653_vm1, %v772_v47, -inf }
 0x2ad   :  { %783 = vmax.xlane.f32.xlu0 %v782_v49  ;;  %655 = vmax.xlane.f32.xlu2 %v654_v50 }
 0x2b1   :  { %v773_v54 = vpop.f32.mrf.mxu2 }
 0x2b2   :  { %v6594_v55 = vadd.f32 %v773_v54, %v369_v53 }
 0x2b4   :  { %v785_v56 = vsel %vm653_vm1, %v6594_v55, -inf }
 0x2b5   :  { %786 = vmax.xlane.f32.xlu1 %v785_v56  ;;  %661 = vmax.xlane.f32.xlu0 %v660_v57 }
 0x2b6   :  { %658 = vmax.xlane.f32.xlu2 %v657_v59 }
 0x2bd   :  { %664 = vmax.xlane.f32.xlu1 %v663_v61 }
 0x2c9   :  { %822 = vrot.lane.b32.xlu0 %v708_v21, %s6378_s26 }
 0x310   :  { %v778_v62 = vpop.xlane.xlu2 %777 }
 0x311   :  { %v788_v63 = vsub.f32 %v767_v37, %v778_v62 }
 0x313   :  { %v792_v0 = vmul.f32 1.442695, %v788_v63 }
 0x315   :  { %5910 = vpow2.f32 %v792_v0 }
 0x318   :  { %v781_v1 = vpop.xlane.xlu2 %780 }
 0x319   :  { %v789_v2 = vsub.f32 %v769_v42, %v781_v1 }
 0x31b   :  { %v5911_v3 = vpop.eup %5910  ;;  %v794_v4 = vmul.f32 1.442695, %v789_v2 }
 0x31c   :  { %v800_v5 = vsel %vm653_vm1, %v5911_v3, 0.0 }
 0x31d   :  { %5912 = vpow2.f32 %v794_v4  ;;  %801 = vadd.xlane.f32.xlu2 %v800_v5 }
 0x320   :  { %v784_v6 = vpop.xlane.xlu0 %783  ;;  %v656_v7 = vpop.xlane.xlu2 %655 }
 0x321   :  { %v790_v8 = vsub.f32 %v772_v47, %v784_v6  ;;  %v666_v11 = vsub.f32 %v644_v44, %v656_v7 }
 0x323   :  { %v5913_v9 = vpop.eup %5912  ;;  %v796_v10 = vmul.f32 1.442695, %v790_v8  ;;  %v670_v13 = vmul.f32 1.442695, %v666_v11  ;;  %v5655_v11 = vld [vmem:[#allocation13 + $0x38] sm:$0xff] }
 0x324   :  { %v803_v12 = vsel %vm653_vm1, %v5913_v9, 0.0  ;;  %943 = vmatpush.bf16.msra.mxu0 %v5655_v11  ;;  %v5686_v11 = vld [vmem:[#allocation17 + $0xec] sm:$0xf0] }
 0x325   :  { %5914 = vpow2.f32 %v796_v10  ;;  %804 = vadd.xlane.f32.xlu2 %v803_v12  ;;  %v5654_v12 = vld [vmem:[#allocation13 + $0x30] sm:$0xff] }
 0x326   :  { %5916 = vpow2.f32 %v670_v13  ;;  %v5653_v13 = vld [vmem:[#allocation13 + $0x28] sm:$0xff] }
 0x328   :  { %v787_v14 = vpop.xlane.xlu1 %786  ;;  %v662_v15 = vpop.xlane.xlu0 %661  ;;  %944 = vmatpush.bf16.msra.mxu0 %v5654_v12  ;;  %v5684_v12 = vld [vmem:[#allocation17 + $0xe4] sm:$0xf] }
 0x329   :  { %v668_v17 = vsub.f32 %v649_v51, %v662_v15  ;;  %v659_v18 = vpop.xlane.xlu2 %658  ;;  %v791_v39 = vsub.f32 %v6594_v55, %v787_v14  ;;  %v5652_v14 = vld [vmem:[#allocation13 + $0x20] sm:$0xff]  ;;  %v5651_v15 = vld [vmem:[#allocation13 + $0x18] sm:$0xff] }
 0x32a   :  { %v667_v21 = vsub.f32 %v646_v52, %v659_v18 }
 0x32b   :  { %v6604_v19 = vpop.eup %5914  ;;  %v674_v20 = vmul.f32 1.442695, %v668_v17  ;;  %v798_v40 = vmul.f32 1.442695, %v791_v39  ;;  %v5650_v17 = vld [vmem:[#allocation13 + $0x10] sm:$0xff] }
 0x32c   :  { %v806_v24 = vsel %vm653_vm1, %v6604_v19, 0.0  ;;  %v672_v25 = vmul.f32 1.442695, %v667_v21  ;;  %v5917_v27 = vpop.eup %5916  ;;  %945 = vmatpush.bf16.msra.mxu0 %v5653_v13 }
 0x32d   :  { %807 = vadd.xlane.f32.xlu1 %v806_v24  ;;  %5918 = vpow2.f32 %v674_v20  ;;  %v678_v32 = vsel %vm653_vm1, %v5917_v27, 0.0  ;;  %v5648_v24 = vld [vmem:[#allocation13] sm:$0xff] }
 0x32e   :  { %5920 = vpow2.f32 %v672_v25 }
 0x330   :  { %v665_v26 = vpop.xlane.xlu1 %664  ;;  %946 = vmatpush.bf16.msra.mxu0 %v5652_v14  ;;  %v5022_v14 = vld [vmem:[#allocation17 + $0xf0] sm:$0xf0] }
 0x331   :  { %v669_v28 = vsub.f32 %v651_v60, %v665_v26 }
 0x333   :  { %v5919_v31 = vpop.eup %5918  ;;  %v676_v34 = vmul.f32 1.442695, %v669_v28 }
 0x334   :  { %v684_v33 = vsel %vm653_vm1, %v5919_v31, 0.0  ;;  %v5921_v35 = vpop.eup %5920  ;;  %947 = vmatpush.bf16.msra.mxu0 %v5651_v15  ;;  %v5028_v15 = vld [vmem:[#allocation17 + $0xe8] sm:$0xf] }
 0x335   :  { %679 = vadd.xlane.f32.xlu1 %v678_v32  ;;  %685 = vadd.xlane.f32.xlu0 %v684_v33  ;;  %5922 = vpow2.f32 %v676_v34  ;;  %v681_v36 = vsel %vm653_vm1, %v5921_v35, 0.0 }
 0x336   :  { %5924 = vpow2.f32 %v798_v40 }
 0x338   :  { %948 = vmatpush.bf16.msra.mxu0 %v5650_v17  ;;  %v5687_v17 = vld [vmem:[#allocation17 + $0xf4] sm:$0xf0] }
 0x33b   :  { %v5923_v37 = vpop.eup %5922  ;;  %v823_v49 = vpop.permute.xlu0 %822 }
 0x33c   :  { %v687_v38 = vsel %vm653_vm1, %v5923_v37, 0.0  ;;  %v5925_v41 = vpop.eup %5924 }
 0x33d   :  { %824 = vrot.lane.b32.xlu2 %v6576_v16, %s6378_s26  ;;  %682 = vadd.xlane.f32.xlu1 %v681_v36  ;;  %v809_v42 = vsel %vm653_vm1, %v5925_v41, 0.0 }
 0x345   :  { %688 = vadd.xlane.f32.xlu1 %v687_v38 }
 0x366   :  { %810 = vadd.xlane.f32.xlu2 %v809_v42 }
 0x390   :  { %v802_v43 = vpop.xlane.xlu2 %801 }
 0x398   :  { %v805_v44 = vpop.xlane.xlu2 %804 }
 0x399   :  { %5926 = vrcp.f32 %v805_v44 }
 0x39a   :  { %5928 = vrcp.f32 %v802_v43  ;;  %v5897_v43 = vld [vmem:[%s7599_s7] ss:$0 sm:$0xff] }
 0x39f   :  { %v5927_v45 = vpop.eup %5926 }
 0x3a0   :  { %v808_v46 = vpop.xlane.xlu1 %807  ;;  %v825_v16 = vpop.permute.xlu2 %824  ;;  %v817_v48 = vmul.f32 %v5927_v45, %v5913_v9 }
 0x3a1   :  { %v5929_v47 = vpop.eup %5928  ;;  %840 = vmatpush.bf16.msrb.mxu3 %v825_v16 }
 0x3a2   :  { %v816_v50 = vmul.f32 %v5929_v47, %v5911_v3 }
 0x3a4   :  { %v820_v51 = vpack.c.bf16 %v817_v48, %v816_v50 }
 0x3a5   :  { %841 = vmatpush.bf16.msrb.mxu3 %v823_v49 }
 0x3a8   :  { %v680_v52 = vpop.xlane.xlu1 %679  ;;  %4872 = vmatmul.msk.bf16.vlgmr.msrb.gmra.mxu3 %vm653_vm1, %v820_v51  ;;  %v686_v60 = vpop.xlane.xlu0 %685 }
 0x3a9   :  { %5930 = vrcp.f32 %v680_v52 }
 0x3af   :  { %v5931_v54 = vpop.eup %5930 }
 0x3b0   :  { %v683_v53 = vpop.xlane.xlu1 %682  ;;  %v694_v56 = vmul.f32 %v5931_v54, %v5917_v27 }
 0x3b1   :  { %5932 = vrcp.f32 %v683_v53 }
 0x3b7   :  { %v5933_v55 = vpop.eup %5932 }
 0x3b8   :  { %v695_v57 = vmul.f32 %v5933_v55, %v5921_v35  ;;  %v689_v58 = vpop.xlane.xlu1 %688  ;;  %v6388_v55 = vmov 128.0  }
 0x3b9   :  { %5934 = vrcp.f32 %v689_v58 }
 0x3ba   :  { %v698_v59 = vpack.c.bf16 %v695_v57, %v694_v56  ;;  %5936 = vrcp.f32 %v686_v60 }
 0x3bb   :  { %5938 = vrcp.f32 %v808_v46 }
 0x3bc   :  { %4868 = vmatmul.msk.bf16.vlgmr.msrb.gmra.mxu1 %vm653_vm1, %v698_v59 }
 0x3bf   :  { %v5935_v61 = vpop.eup %5934 }
 0x3c0   :  { %v5937_v62 = vpop.eup %5936  ;;  %v697_v63 = vmul.f32 %v5935_v61, %v5923_v37 }
 0x3c1   :  { %v696_v0 = vmul.f32 %v5937_v62, %v5919_v31  ;;  %v5939_v3 = vpop.eup %5938 }
 0x3c2   :  { %v818_v5 = vmul.f32 %v5939_v3, %v6604_v19  ;;  %v5649_v19 = vld [vmem:[#allocation13 + $0x8] sm:$0xff] }
 0x3c3   :  { %v699_v1 = vpack.c.bf16 %v697_v63, %v696_v0  ;;  %949 = vmatpush.bf16.msra.mxu0 %v5649_v19  ;;  %v5029_v19 = vor.u32 %v5687_v17, %v5028_v15  ;;  %v4942_v15 = vld [vmem:[#allocation17 + $0x50] sm:$0xf0]  ;;  %v4948_v17 = vld [vmem:[#allocation17 + $0x48] sm:$0xf] }
 0x3c5   :  { %1311 = vmatpush.bf16.msra.mxu3 %v5029_v19 }
 0x3c7   :  { %950 = vmatpush.bf16.msra.mxu0 %v5648_v24 }
 0x3cc   :  { %4869 = vmatmul.msk.bf16.gmra.mxu1 %vm653_vm1, %v699_v1 }
 0x3d9   :  { %v811_v2 = vpop.xlane.xlu2 %810 }
 0x3da   :  { %5940 = vrcp.f32 %v811_v2 }
 0x3db   :  { %5942 = vrcp.f32 %v6388_v55  ;;  %v4980_v55 = vld [vmem:[#allocation17 + $0x88] sm:$0xf] }
 0x3e0   :  { %v5941_v4 = vpop.eup %5940 }
 0x3e1   :  { %v819_v6 = vmul.f32 %v5941_v4, %v5925_v41  ;;  %v5943_v56 = vpop.eup %5942 }
 0x3e2   :  { %vm981_vm2 = vweird.f32 %v5943_v56 }
 0x3e3   :  { %v821_v7 = vpack.c.bf16 %v819_v6, %v818_v5 }
 0x3e5   :  { %4873 = vmatmul.msk.bf16.gmra.mxu3 %vm653_vm1, %v821_v7 }
 0x42b   :  { %v843_v8 = vpop.f32.mrf.mxu3 }
 0x433   :  { %v845_v9 = vpop.f32.mrf.mxu3 }
 0x434   :  { %v5874_v10 = vpack.i.bf16 %v845_v9, %v843_v8 }
 0x436   :  { %5875 = vrot.lane.b32.xlu1 %v5874_v10, %s6378_s26  ;;  %v5020_v10 = vld [vmem:[#allocation17 + $0xe0] sm:$0xf] }
 0x437   :  { %v5021_v13 = vor.u32 %v5686_v11, %v5020_v10  ;;  %v4940_v11 = vld [vmem:[#allocation17 + $0x40] sm:$0xf] }
 0x439   :  { %v727_v25 = vpop.f32.mrf.mxu1  ;;  %1273 = vmatpush.bf16.msra.mxu1 %v5021_v13  ;;  %v5664_v13 = vld [vmem:[#allocation17 + $0x44] sm:$0xf] }
 0x43a   :  { %v4945_v19 = vor.u32 %v5664_v13, %v4942_v15 }
 0x441   :  { %v729_v31 = vpop.f32.mrf.mxu1 }
 0x449   :  { %v732_v35 = vpop.f32.mrf.mxu1 }
 0x451   :  { %v734_v39 = vpop.f32.mrf.mxu1 }
 0x468   :  { %v848_v18 = vpop.f32.mrf.mxu3 }
 0x470   :  { %v850_v20 = vpop.f32.mrf.mxu3 }
 0x471   :  { %v5879_v21 = vpack.i.bf16 %v850_v20, %v848_v18  ;;  %v5025_v18 = vor.u32 %v5684_v12, %v5022_v14  ;;  %v5685_v20 = vld [vmem:[#allocation17 + $0xec] sm:$0xf]  ;;  %v5666_v12 = vld [vmem:[#allocation17 + $0x4c] sm:$0xf0] }
 0x472   :  { %v4941_v14 = vor.u32 %v5666_v12, %v4940_v11  ;;  %v6663_v12 = vld [vmem:[#allocation16] ss:$0 sm:$0xff] }
 0x473   :  { %5880 = vrot.lane.b32.xlu2 %v5879_v21, %s6378_s26  ;;  %v5030_v21 = vld [vmem:[#allocation17 + $0xf8] sm:$0xf0]  ;;  %1292 = vmatpush.bf16.msra.mxu2 %v5025_v18  ;;  %v5667_v18 = vld [vmem:[#allocation17 + $0x54] sm:$0xf0] }
 0x474   :  { %v5033_v24 = vor.u32 %v5685_v20, %v5030_v21  ;;  %v4949_v20 = vor.u32 %v5667_v18, %v4948_v17  ;;  %v5665_v21 = vld [vmem:[#allocation17 + $0x4c] sm:$0xf] }
 0x476   :  { %1330 = vmatpush.bf16.msrb.mxu0 %v5033_v24  ;;  %v4950_v24 = vld [vmem:[#allocation17 + $0x58] sm:$0xf0] }
 0x4a8   :  { %v5876_v26 = vpop.permute.xlu1 %5875 }
 0x4a9   :  { %v5878_v27 = vunpack.i.h.bf16 %v5876_v26  ;;  %v5877_v28 = vunpack.i.l.bf16 %v5876_v26  ;;  %v5682_v26 = vld [vmem:[#allocation17 + $0xcc] sm:$0xf0] }
 0x4ab   :  { %v870_v32 = vsel %vm621_vm0, %v729_v31, %v5878_v27  ;;  %v869_v33 = vsel %vm621_vm0, %v727_v25, %v5877_v28  ;;  %v5004_v25 = vld [vmem:[#allocation17 + $0xc0] sm:$0xf]  ;;  %v5680_v27 = vld [vmem:[#allocation17 + $0xc4] sm:$0xf]  ;;  %v5006_v31 = vld [vmem:[#allocation17 + $0xd0] sm:$0xf0] }
 0x4ac   :  { %v873_v34 = vpack.c.bf16 %v870_v32, %v869_v33  ;;  %v5005_v28 = vor.u32 %v5682_v26, %v5004_v25  ;;  %v5012_v32 = vld [vmem:[#allocation17 + $0xc8] sm:$0xf]  ;;  %v5683_v33 = vld [vmem:[#allocation17 + $0xd4] sm:$0xf0]  ;;  %v4953_v25 = vor.u32 %v5665_v21, %v4950_v24  ;;  %v4924_v26 = vld [vmem:[#allocation17 + $0x20] sm:$0xf] }
 0x4ad   :  { %v5719_v21 = vld [vmem:[#allocation19 + $0xf8] sm:$0xff] }
 0x4ae   :  { %951 = vmatmul.bf16.vlgmr.msra.gmra.mxu0 %v873_v34  ;;  %v5009_v34 = vor.u32 %v5680_v27, %v5006_v31  ;;  %1274 = vmatpush.bf16.msra.mxu1 %v5005_v28  ;;  %v5662_v27 = vld [vmem:[#allocation17 + $0x2c] sm:$0xf0]  ;;  %v5660_v28 = vld [vmem:[#allocation17 + $0x24] sm:$0xf] }
 0x4b0   :  { %1293 = vmatpush.bf16.msra.mxu2 %v5009_v34  ;;  %v4932_v34 = vld [vmem:[#allocation17 + $0x28] sm:$0xf] }
 0x4cd   :  { %v5881_v36 = vpop.permute.xlu2 %5880 }
 0x4ce   :  { %v5883_v37 = vunpack.i.h.bf16 %v5881_v36  ;;  %v5882_v38 = vunpack.i.l.bf16 %v5881_v36  ;;  %v5681_v36 = vld [vmem:[#allocation17 + $0xcc] sm:$0xf] }
 0x4d0   :  { %v871_v40 = vsel %vm621_vm0, %v732_v35, %v5882_v38  ;;  %v872_v41 = vsel %vm621_vm0, %v734_v39, %v5883_v37  ;;  %v5013_v35 = vor.u32 %v5683_v33, %v5012_v32  ;;  %v5014_v37 = vld [vmem:[#allocation17 + $0xd8] sm:$0xf0]  ;;  %v4988_v39 = vld [vmem:[#allocation17 + $0xa0] sm:$0xf]  ;;  %v4925_v32 = vor.u32 %v5662_v27, %v4924_v26  ;;  %v4926_v33 = vld [vmem:[#allocation17 + $0x30] sm:$0xf0] }
 0x4d1   :  { %v874_v42 = vpack.c.bf16 %v872_v41, %v871_v40  ;;  %v5017_v38 = vor.u32 %v5681_v36, %v5014_v37  ;;  %v5678_v40 = vld [vmem:[#allocation17 + $0xac] sm:$0xf0]  ;;  %v5676_v41 = vld [vmem:[#allocation17 + $0xa4] sm:$0xf]  ;;  %v4929_v37 = vor.u32 %v5660_v28, %v4926_v33  ;;  %v5711_v26 = vld [vmem:[#allocation19 + $0xb8] sm:$0xff] }
 0x4d2   :  { %1312 = vmatpush.bf16.msra.mxu3 %v5013_v35  ;;  %v5663_v35 = vld [vmem:[#allocation17 + $0x34] sm:$0xf0]  ;;  %v5694_v27 = vld [vmem:[#allocation19 + $0x30] sm:$0xff] }
 0x4d3   :  { %956 = vmatmul.bf16.gmra.mxu0 %v874_v42  ;;  %v4989_v42 = vor.u32 %v5678_v40, %v4988_v39  ;;  %v5661_v39 = vld [vmem:[#allocation17 + $0x2c] sm:$0xf]  ;;  %v4934_v40 = vld [vmem:[#allocation17 + $0x38] sm:$0xf0]  ;;  %v5718_v28 = vld [vmem:[#allocation19 + $0xf0] sm:$0xff] }
 0x4d4   :  { %1331 = vmatpush.bf16.msrb.mxu0 %v5017_v38  ;;  %v4933_v38 = vor.u32 %v5663_v35, %v4932_v34  ;;  %v5702_v33 = vld [vmem:[#allocation19 + $0x70] sm:$0xff] }
 0x4d5   :  { %1275 = vmatpush.bf16.msra.mxu1 %v4989_v42  ;;  %v4937_v42 = vor.u32 %v5661_v39, %v4934_v40  ;;  %v5710_v34 = vld [vmem:[#allocation19 + $0xb0] sm:$0xff]  ;;  %v5701_v39 = vld [vmem:[#allocation19 + $0x68] sm:$0xff] }
 0x4d6   :  { %v5709_v40 = vld [vmem:[#allocation19 + $0xa8] sm:$0xff] }
 0x52b   :  { %v952_v44 = vpop.f32.mrf.mxu0 }
 0x52c   :  { %v953_v45 = vadd.f32 %v5897_v43, %v952_v44  ;;  %v4996_v44 = vld [vmem:[#allocation17 + $0xa8] sm:$0xf] }
 0x52e   :  { %v962_v46 = vadd.f32 %v953_v45, %v6563_v22  ;;  %v977_v22 = vmul.f32 128.0, %v5943_v56  ;;  %v5679_v45 = vld [vmem:[#allocation17 + $0xb4] sm:$0xf0] }
 0x530   :  { %968 = vadd.xlane.f32.xlu1 %v962_v46  ;;  %v978_v57 = vsub.f32 1.0, %v977_v22 }
 0x532   :  { %v979_v58 = vmul.f32 %v5943_v56, %v978_v57 }
 0x533   :  { %v954_v16 = vpop.f32.mrf.mxu0 }
 0x534   :  { %v955_v47 = vadd.f32 %v5897_v43, %v954_v16  ;;  %v980_v59 = vadd.f32 %v5943_v56, %v979_v58  ;;  %v4997_v16 = vor.u32 %v5679_v45, %v4996_v44  ;;  %v5673_v58 = vld [vmem:[#allocation17 + $0x8c] sm:$0xf]  ;;  %v5656_v44 = vld [vmem:[#allocation17 + $0x4] sm:$0xf]  ;;  %v4910_v45 = vld [vmem:[#allocation17 + $0x10] sm:$0xf0] }
 0x536   :  { %v963_v48 = vadd.f32 %v955_v47, %v6565_v23  ;;  %v6634_v23 = vsel %vm981_vm2, %v5943_v56, %v980_v59  ;;  %v5677_v47 = vld [vmem:[#allocation17 + $0xac] sm:$0xf]  ;;  %1313 = vmatpush.bf16.msra.mxu3 %v4997_v16  ;;  %v5675_v56 = vld [vmem:[#allocation17 + $0x94] sm:$0xf0]  ;;  %v4982_v59 = vld [vmem:[#allocation17 + $0x98] sm:$0xf0] }
 0x537   :  { %v4981_v57 = vor.u32 %v5675_v56, %v4980_v55 }
 0x538   :  { %970 = vadd.xlane.f32.xlu0 %v963_v48 }
 0x53a   :  { %1314 = vmatpush.bf16.msra.mxu3 %v4981_v57 }
 0x550   :  { %v957_v49 = vpop.f32.mrf.mxu0 }
 0x551   :  { %v958_v50 = vadd.f32 %v5897_v43, %v957_v49 }
 0x553   :  { %v964_v51 = vadd.f32 %v958_v50, %v6569_v29  ;;  %v4972_v50 = vld [vmem:[#allocation17 + $0x80] sm:$0xf] }
 0x555   :  { %972 = vadd.xlane.f32.xlu0 %v964_v51 }
 0x558   :  { %v959_v52 = vpop.f32.mrf.mxu0 }
 0x559   :  { %v960_v53 = vadd.f32 %v5897_v43, %v959_v52  ;;  %v4990_v43 = vld [vmem:[#allocation17 + $0xb0] sm:$0xf0]  ;;  %v5672_v52 = vld [vmem:[#allocation17 + $0x84] sm:$0xf] }
 0x55b   :  { %v965_v54 = vadd.f32 %v960_v53, %v6571_v30 }
 0x55d   :  { %974 = vadd.xlane.f32.xlu2 %v965_v54 }
 0x5a3   :  { %v969_v60 = vpop.xlane.xlu1 %968 }
 0x5a4   :  { %v983_v61 = vmul.f32 %v6634_v23, %v969_v60  ;;  %v4985_v60 = vor.u32 %v5673_v58, %v4982_v59 }
 0x5a6   :  { %v6637_v29 = vsub.f32 %v962_v46, %v983_v61  ;;  %v4993_v46 = vor.u32 %v5676_v41, %v4990_v43  ;;  %v4956_v61 = vld [vmem:[#allocation17 + $0x60] sm:$0xf]  ;;  %v5658_v43 = vld [vmem:[#allocation17 + $0xc] sm:$0xf0] }
 0x5a7   :  { %v4908_v41 = vld [vmem:[#allocation17] sm:$0xf] }
 0x5a8   :  { %v991_v62 = vmul.f32 %v6637_v29, %v6637_v29  ;;  %1294 = vmatpush.bf16.msra.mxu2 %v4993_v46  ;;  %v4909_v16 = vor.u32 %v5658_v43, %v4908_v41  ;;  %v5692_v43 = vld [vmem:[#allocation19 + $0x20] sm:$0xff] }
 0x5aa   :  { %995 = vadd.xlane.f32.xlu0 %v991_v62  ;;  %v5670_v62 = vld [vmem:[#allocation17 + $0x6c] sm:$0xf0] }
 0x5ab   :  { %v971_v30 = vpop.xlane.xlu0 %970 }
 0x5ac   :  { %v984_v63 = vmul.f32 %v6634_v23, %v971_v30  ;;  %v5668_v30 = vld [vmem:[#allocation17 + $0x64] sm:$0xf] }
 0x5ae   :  { %v6642_v0 = vsub.f32 %v963_v48, %v984_v63  ;;  %v4998_v48 = vld [vmem:[#allocation17 + $0xb8] sm:$0xf0]  ;;  %v4957_v63 = vor.u32 %v5670_v62, %v4956_v61 }
 0x5af   :  { %v5001_v49 = vor.u32 %v5677_v47, %v4998_v48  ;;  %v4913_v47 = vor.u32 %v5656_v44, %v4910_v45  ;;  %v4916_v48 = vld [vmem:[#allocation17 + $0x8] sm:$0xf]  ;;  %v5716_v44 = vld [vmem:[#allocation19 + $0xe0] sm:$0xff] }
 0x5b0   :  { %v992_v1 = vmul.f32 %v6642_v0, %v6642_v0 }
 0x5b1   :  { %1332 = vmatpush.bf16.msrb.mxu0 %v5001_v49  ;;  %v5659_v49 = vld [vmem:[#allocation17 + $0x14] sm:$0xf0] }
 0x5b2   :  { %997 = vadd.xlane.f32.xlu0 %v992_v1  ;;  %v4958_v1 = vld [vmem:[#allocation17 + $0x70] sm:$0xf0] }
 0x5b5   :  { %1333 = vmatpush.bf16.msrb.mxu0 %v4985_v60 }
 0x5c8   :  { %v973_v2 = vpop.xlane.xlu0 %972 }
 0x5c9   :  { %v985_v3 = vmul.f32 %v6634_v23, %v973_v2  ;;  %v4964_v2 = vld [vmem:[#allocation17 + $0x68] sm:$0xf] }
 0x5cb   :  { %v6647_v4 = vsub.f32 %v964_v51, %v985_v3  ;;  %v5674_v51 = vld [vmem:[#allocation17 + $0x8c] sm:$0xf0]  ;;  %v5671_v3 = vld [vmem:[#allocation17 + $0x74] sm:$0xf0] }
 0x5cc   :  { %v4973_v53 = vor.u32 %v5674_v51, %v4972_v50  ;;  %v4917_v50 = vor.u32 %v5659_v49, %v4916_v48  ;;  %v5657_v51 = vld [vmem:[#allocation17 + $0xc] sm:$0xf] }
 0x5cd   :  { %v993_v5 = vmul.f32 %v6647_v4, %v6647_v4 }
 0x5ce   :  { %1276 = vmatpush.bf16.msra.mxu1 %v4973_v53 }
 0x5cf   :  { %999 = vadd.xlane.f32.xlu0 %v993_v5  ;;  %v4961_v5 = vor.u32 %v5668_v30, %v4958_v1 }
 0x5d0   :  { %v975_v6 = vpop.xlane.xlu2 %974 }
 0x5d1   :  { %v986_v7 = vmul.f32 %v6634_v23, %v975_v6  ;;  %v4965_v6 = vor.u32 %v5671_v3, %v4964_v2 }
 0x5d2   :  { %1277 = vmatpush.bf16.msra.mxu1 %v4957_v63 }
 0x5d3   :  { %v6652_v8 = vsub.f32 %v965_v54, %v986_v7  ;;  %v4974_v54 = vld [vmem:[#allocation17 + $0x90] sm:$0xf0]  ;;  %v5669_v7 = vld [vmem:[#allocation17 + $0x6c] sm:$0xf]  ;;  %1315 = vmatpush.bf16.msra.mxu3 %v4965_v6  ;;  %v6659_v6 = vld [vmem:[#allocation14] ss:$0 sm:$0xff] }
 0x5d4   :  { %v4977_v22 = vor.u32 %v5672_v52, %v4974_v54  ;;  %v4918_v52 = vld [vmem:[#allocation17 + $0x18] sm:$0xf0] }
 0x5d5   :  { %v994_v9 = vmul.f32 %v6652_v8, %v6652_v8  ;;  %v4921_v53 = vor.u32 %v5657_v51, %v4918_v52 }
 0x5d6   :  { %1295 = vmatpush.bf16.msra.mxu2 %v4977_v22  ;;  %1278 = vmatpush.bf16.msra.mxu1 %v4941_v14 }
 0x5d7   :  { %1001 = vadd.xlane.f32.xlu1 %v994_v9  ;;  %v4966_v9 = vld [vmem:[#allocation17 + $0x78] sm:$0xf0]  ;;  %1316 = vmatpush.bf16.msra.mxu3 %v4949_v20 }
 0x5d8   :  { %v4969_v10 = vor.u32 %v5669_v7, %v4966_v9  ;;  %v5695_v20 = vld [vmem:[#allocation19 + $0x38] sm:$0xff] }
 0x5da   :  { %1296 = vmatpush.bf16.msra.mxu2 %v4961_v5  ;;  %1334 = vmatpush.bf16.msrb.mxu0 %v4969_v10 }
 0x5db   :  { %1279 = vmatpush.bf16.msra.mxu1 %v4925_v32  ;;  %1317 = vmatpush.bf16.msra.mxu3 %v4933_v38  ;;  %v5717_v38 = vld [vmem:[#allocation19 + $0xe8] sm:$0xff] }
 0x5de   :  { %1297 = vmatpush.bf16.msra.mxu2 %v4945_v19  ;;  %1335 = vmatpush.bf16.msrb.mxu0 %v4953_v25  ;;  %v5703_v25 = vld [vmem:[#allocation19 + $0x78] sm:$0xff] }
 0x5df   :  { %1280 = vmatpush.bf16.msra.mxu1 %v4909_v16  ;;  %1318 = vmatpush.bf16.msra.mxu3 %v4917_v50 }
 0x5e2   :  { %1298 = vmatpush.bf16.msra.mxu2 %v4929_v37  ;;  %1336 = vmatpush.bf16.msrb.mxu0 %v4937_v42  ;;  %v5693_v37 = vld [vmem:[#allocation19 + $0x28] sm:$0xff] }
 0x5e3   :  { %1633 = vmatpush.bf16.msrb.mxu1 %v5695_v20  ;;  %1671 = vmatpush.bf16.msrb.mxu3 %v5711_v26 }
 0x5e6   :  { %1299 = vmatpush.bf16.msra.mxu2 %v4913_v47  ;;  %1337 = vmatpush.bf16.msrb.mxu0 %v4921_v53 }
 0x5e7   :  { %1634 = vmatpush.bf16.msrb.mxu1 %v5694_v27  ;;  %1672 = vmatpush.bf16.msrb.mxu3 %v5710_v34 }
 0x5ea   :  { %1690 = vmatpush.bf16.msra.mxu0 %v5719_v21  ;;  %1652 = vmatpush.bf16.msrb.mxu2 %v5703_v25 }
 0x5eb   :  { %1635 = vmatpush.bf16.msrb.mxu1 %v5693_v37  ;;  %1673 = vmatpush.bf16.msrb.mxu3 %v5709_v40 }
 0x5ee   :  { %1691 = vmatpush.bf16.msra.mxu0 %v5718_v28  ;;  %1653 = vmatpush.bf16.msrb.mxu2 %v5702_v33 }
 0x5ef   :  { %1636 = vmatpush.bf16.msrb.mxu1 %v5692_v43 }
 0x5f2   :  { %1692 = vmatpush.bf16.msra.mxu0 %v5717_v38  ;;  %1654 = vmatpush.bf16.msrb.mxu2 %v5701_v39 }
 0x5f6   :  { %1693 = vmatpush.bf16.msra.mxu0 %v5716_v44 }
 0x61d   :  { %v996_v31 = vpop.xlane.xlu0 %995 }
 0x61e   :  { %v1003_v36 = vmul.f32 %v996_v31, %v6634_v23 }
 0x620   :  { %v1007_v46 = vadd.f32 1e-05, %v1003_v36 }
 0x622   :  { %5944 = vrsqrt.f32 %v1007_v46  ;;  %vm1017_vm4 = vweird.f32 %v1007_v46 }
 0x625   :  { %v998_v54 = vpop.xlane.xlu0 %997 }
 0x626   :  { %v1004_v55 = vmul.f32 %v998_v54, %v6634_v23 }
 0x628   :  { %v5945_v56 = vpop.eup %5944  ;;  %v1008_v22 = vadd.f32 1e-05, %v1004_v55 }
 0x629   :  { %v1012_v57 = vmul.f32 %v5945_v56, %v1007_v46  ;;  %vm1018_vm3 = vweird.f32 %v5945_v56 }
 0x62a   :  { %5946 = vrsqrt.f32 %v1008_v22  ;;  %vm1019_vm5 = vmor %vm1017_vm4, %vm1018_vm3  ;;  %vm1027_vm7 = vweird.f32 %v1008_v22 }
 0x62b   :  { %v1013_v58 = vmul.f32 %v5945_v56, %v1012_v57 }
 0x62d   :  { %v1014_v59 = vmul.f32 0.5, %v1013_v58 }
 0x62f   :  { %v1015_v60 = vsub.f32 1.5, %v1014_v59  ;;  %v5715_v59 = vld [vmem:[#allocation19 + $0xd8] sm:$0xff] }
 0x630   :  { %v5947_v61 = vpop.eup %5946  ;;  %1694 = vmatpush.bf16.msra.mxu0 %v5715_v59 }
 0x631   :  { %v1016_v62 = vmul.f32 %v5945_v56, %v1015_v60  ;;  %v1022_v30 = vmul.f32 %v5947_v61, %v1008_v22  ;;  %vm1028_vm6 = vweird.f32 %v5947_v61  ;;  %v5708_v60 = vld [vmem:[#allocation19 + $0xa0] sm:$0xff] }
 0x632   :  { %vm1029_vm8 = vmor %vm1027_vm7, %vm1028_vm6  ;;  %1674 = vmatpush.bf16.msrb.mxu3 %v5708_v60 }
 0x633   :  { %v1023_v63 = vmul.f32 %v5947_v61, %v1022_v30  ;;  %v1020_v1 = vsel %vm1019_vm5, %v5945_v56, %v1016_v62  ;;  %v5714_v62 = vld [vmem:[#allocation19 + $0xd0] sm:$0xff]  ;;  %v5699_v30 = vld [vmem:[#allocation19 + $0x58] sm:$0xff] }
 0x634   :  { %v1051_v5 = vmul.f32 %v1020_v1, %v6637_v29  ;;  %1695 = vmatpush.bf16.msra.mxu0 %v5714_v62  ;;  %v5689_v1 = vld [vmem:[#allocation19 + $0x8] sm:$0xff] }
 0x635   :  { %v1024_v2 = vmul.f32 0.5, %v1023_v63  ;;  %v5707_v63 = vld [vmem:[#allocation19 + $0x98] sm:$0xff] }
 0x636   :  { %v1058_v11 = vmul.f32 %v6659_v6, %v1051_v5  ;;  %1675 = vmatpush.bf16.msrb.mxu3 %v5707_v63  ;;  %v5706_v5 = vld [vmem:[#allocation19 + $0x90] sm:$0xff] }
 0x637   :  { %v1025_v3 = vsub.f32 1.5, %v1024_v2  ;;  %v5713_v2 = vld [vmem:[#allocation19 + $0xc8] sm:$0xff] }
 0x638   :  { %v6667_v14 = vadd.f32 %v6663_v12, %v1058_v11  ;;  %1696 = vmatpush.bf16.msra.mxu0 %v5713_v2  ;;  %v5696_v11 = vld [vmem:[#allocation19 + $0x40] sm:$0xff] }
 0x639   :  { %v1026_v7 = vmul.f32 %v5947_v61, %v1025_v3  ;;  %v5698_v3 = vld [vmem:[#allocation19 + $0x50] sm:$0xff] }
 0x63a   :  { %1676 = vmatpush.bf16.msrb.mxu3 %v5706_v5 }
 0x63b   :  { %v1030_v9 = vsel %vm1029_vm8, %v5947_v61, %v1026_v7  ;;  %v5690_v61 = vld [vmem:[#allocation19 + $0x10] sm:$0xff]  ;;  %v5712_v7 = vld [vmem:[#allocation19 + $0xc0] sm:$0xff] }
 0x63c   :  { %v1052_v10 = vmul.f32 %v1030_v9, %v6642_v0  ;;  %1697 = vmatpush.bf16.msra.mxu0 %v5712_v7  ;;  %v5697_v9 = vld [vmem:[#allocation19 + $0x48] sm:$0xff] }
 0x63e   :  { %v1059_v13 = vmul.f32 %v6659_v6, %v1052_v10  ;;  %v5705_v10 = vld [vmem:[#allocation19 + $0x88] sm:$0xff] }
 0x63f   :  { %1677 = vmatpush.bf16.msrb.mxu3 %v5705_v10 }
 0x640   :  { %v6670_v15 = vadd.f32 %v6663_v12, %v1059_v13  ;;  %v1103_v13 = vld [vmem:[%s7603_s11] sm:$0xf] }
 0x641   :  { %v1106_v26 = vperm.slane %v1103_v13, 1 }
 0x642   :  { %v1000_v29 = vpop.xlane.xlu0 %999  ;;  %v1069_v17 = vpack.c.bf16 %v6670_v15, %v6667_v14 }
 0x643   :  { %v1005_v18 = vmul.f32 %v1000_v29, %v6634_v23 }
 0x644   :  { %1281 = vmatmul.bf16.vlgmr.msra.gmra.mxu1 %v1069_v17  ;;  %1300 = vmatmul.bf16.vlgmr.msra.gmra.mxu2 %v1069_v17 }
 0x645   :  { %v1009_v0 = vadd.f32 1e-05, %v1005_v18  ;;  %1319 = vmatmul.bf16.vlgmr.msra.gmra.mxu3 %v1069_v17  ;;  %1338 = vmatmul.bf16.vlgmr.msrb.gmra.mxu0 %v1069_v17  ;;  %v1105_v18 = vperm.slane %v1103_v13, 0 }
 0x647   :  { %5948 = vrsqrt.f32 %v1009_v0  ;;  %vm1037_vm10 = vweird.f32 %v1009_v0 }
 0x64a   :  { %v1002_v19 = vpop.xlane.xlu1 %1001 }
 0x64b   :  { %v1006_v24 = vmul.f32 %v1002_v19, %v6634_v23 }
 0x64d   :  { %v5949_v31 = vpop.eup %5948  ;;  %v1010_v32 = vadd.f32 1e-05, %v1006_v24 }
 0x64e   :  { %v1032_v35 = vmul.f32 %v5949_v31, %v1009_v0  ;;  %vm1038_vm9 = vweird.f32 %v5949_v31  ;;  %v1108_v0 = vperm.slane %v1103_v13, 3 }
 0x64f   :  { %5950 = vrsqrt.f32 %v1010_v32  ;;  %vm1039_vm11 = vmor %vm1037_vm10, %vm1038_vm9  ;;  %vm1047_vm13 = vweird.f32 %v1010_v32 }
 0x650   :  { %v1033_v36 = vmul.f32 %v5949_v31, %v1032_v35 }
 0x652   :  { %v1034_v41 = vmul.f32 0.5, %v1033_v36 }
 0x654   :  { %v1035_v42 = vsub.f32 1.5, %v1034_v41 }
 0x655   :  { %v5951_v45 = vpop.eup %5950 }
 0x656   :  { %v1036_v46 = vmul.f32 %v5949_v31, %v1035_v42  ;;  %v1042_v16 = vmul.f32 %v5951_v45, %v1010_v32  ;;  %vm1048_vm12 = vweird.f32 %v5951_v45 }
 0x657   :  { %vm1049_vm14 = vmor %vm1047_vm13, %vm1048_vm12 }
 0x658   :  { %v1043_v47 = vmul.f32 %v5951_v45, %v1042_v16  ;;  %v1040_v48 = vsel %vm1039_vm11, %v5949_v31, %v1036_v46  ;;  %v1107_v31 = vperm.slane %v1103_v13, 2 }
 0x659   :  { %v1053_v51 = vmul.f32 %v1040_v48, %v6647_v4  ;;  %v5691_v4 = vld [vmem:[#allocation19 + $0x18] sm:$0xff] }
 0x65a   :  { %v1044_v49 = vmul.f32 0.5, %v1043_v47  ;;  %1637 = vmatpush.bf16.msrb.mxu1 %v5691_v4 }
 0x65b   :  { %v1060_v55 = vmul.f32 %v6659_v6, %v1053_v51 }
 0x65c   :  { %v1045_v50 = vsub.f32 1.5, %v1044_v49 }
 0x65d   :  { %v6681_v22 = vadd.f32 %v6663_v12, %v1060_v55 }
 0x65e   :  { %v1046_v52 = vmul.f32 %v5951_v45, %v1045_v50  ;;  %1638 = vmatpush.bf16.msrb.mxu1 %v5690_v61 }
 0x660   :  { %v1050_v53 = vsel %vm1049_vm14, %v5951_v45, %v1046_v52 }
 0x661   :  { %v1054_v54 = vmul.f32 %v1050_v53, %v6652_v8  ;;  %v5700_v8 = vld [vmem:[#allocation19 + $0x60] sm:$0xff] }
 0x662   :  { %1655 = vmatpush.bf16.msrb.mxu2 %v5700_v8  ;;  %1639 = vmatpush.bf16.msrb.mxu1 %v5689_v1 }
 0x663   :  { %v1061_v56 = vmul.f32 %v6659_v6, %v1054_v54  ;;  %v5688_v6 = vld [vmem:[#allocation19] sm:$0xff] }
 0x665   :  { %v6684_v57 = vadd.f32 %v6663_v12, %v1061_v56  ;;  %v5704_v12 = vld [vmem:[#allocation19 + $0x80] sm:$0xff] }
 0x666   :  { %1656 = vmatpush.bf16.msrb.mxu2 %v5699_v30  ;;  %1640 = vmatpush.bf16.msrb.mxu1 %v5688_v6 }
 0x667   :  { %v1070_v58 = vpack.c.bf16 %v6684_v57, %v6681_v22  ;;  %1678 = vmatpush.bf16.msrb.mxu3 %v5704_v12 }
 0x669   :  { %1286 = vmatmul.bf16.gmra.mxu1 %v1070_v58  ;;  %1305 = vmatmul.bf16.gmra.mxu2 %v1070_v58 }
 0x66a   :  { %1324 = vmatmul.bf16.gmra.mxu3 %v1070_v58  ;;  %1343 = vmatmul.bf16.gmra.mxu0 %v1070_v58 }
 0x66b   :  { %1657 = vmatpush.bf16.msrb.mxu2 %v5698_v3 }
 0x66f   :  { %1658 = vmatpush.bf16.msrb.mxu2 %v5697_v9 }
 0x673   :  { %1659 = vmatpush.bf16.msrb.mxu2 %v5696_v11 }
 0x6c1   :  { %v1282_v29 = vpop.f32.mrf.mxu1 }
 0x6c2   :  { %v1339_v17 = vpop.f32.mrf.mxu0  ;;  %v1283_v20 = vadd.f32 %v1282_v29, %v1105_v18 }
 0x6c3   :  { %v1340_v24 = vadd.f32 %v1339_v17, %v1108_v0 }
 0x6c4   :  { %v1349_v33 = vmax.f32 %v1283_v20, 0.0 }
 0x6c5   :  { %v1352_v35 = vmax.f32 %v1340_v24, 0.0 }
 0x6c7   :  { %v1301_v19 = vpop.f32.mrf.mxu2 }
 0x6c8   :  { %v1320_v21 = vpop.f32.mrf.mxu3  ;;  %v1302_v37 = vadd.f32 %v1301_v19, %v1106_v26 }
 0x6c9   :  { %v1284_v25 = vpop.f32.mrf.mxu1  ;;  %v1321_v39 = vadd.f32 %v1320_v21, %v1107_v31 }
 0x6ca   :  { %v1285_v27 = vadd.f32 %v1284_v25, %v1105_v18  ;;  %v1341_v28 = vpop.f32.mrf.mxu0  ;;  %v1350_v45 = vmax.f32 %v1302_v37, 0.0 }
 0x6cb   :  { %v1342_v32 = vadd.f32 %v1341_v28, %v1108_v0  ;;  %v1351_v16 = vmax.f32 %v1321_v39, 0.0 }
 0x6cc   :  { %v1353_v34 = vmax.f32 %v1285_v27, 0.0 }
 0x6cd   :  { %v1356_v36 = vmax.f32 %v1342_v32, 0.0 }
 0x6ce   :  { %v1365_v38 = vpack.c.bf16 %v1353_v34, %v1349_v33 }
 0x6cf   :  { %v1368_v40 = vpack.c.bf16 %v1356_v36, %v1352_v35  ;;  %v1303_v41 = vpop.f32.mrf.mxu2 }
 0x6d0   :  { %v1304_v42 = vadd.f32 %v1303_v41, %v1106_v26  ;;  %v1322_v43 = vpop.f32.mrf.mxu3  ;;  %1641 = vmatmul.bf16.vlgmr.msrb.gmra.mxu1 %v1365_v38 }
 0x6d1   :  { %v1323_v44 = vadd.f32 %v1322_v43, %v1107_v31  ;;  %1698 = vmatmul.bf16.vlgmr.msra.gmra.mxu0 %v1368_v40 }
 0x6d2   :  { %v1354_v46 = vmax.f32 %v1304_v42, 0.0 }
 0x6d3   :  { %v1355_v47 = vmax.f32 %v1323_v44, 0.0 }
 0x6d4   :  { %v1366_v48 = vpack.c.bf16 %v1354_v46, %v1350_v45 }
 0x6d5   :  { %v1367_v49 = vpack.c.bf16 %v1355_v47, %v1351_v16 }
 0x6d6   :  { %1660 = vmatmul.bf16.vlgmr.msrb.gmra.mxu2 %v1366_v48 }
 0x6d7   :  { %1679 = vmatmul.bf16.vlgmr.msrb.gmra.mxu3 %v1367_v49 }
 0x6e6   :  { %v1287_v50 = vpop.f32.mrf.mxu1 }
 0x6e7   :  { %v1344_v51 = vpop.f32.mrf.mxu0  ;;  %v1288_v53 = vadd.f32 %v1287_v50, %v1105_v18 }
 0x6e8   :  { %v1345_v55 = vadd.f32 %v1344_v51, %v1108_v0 }
 0x6e9   :  { %v1357_v8 = vmax.f32 %v1288_v53, 0.0 }
 0x6ea   :  { %v1360_v61 = vmax.f32 %v1345_v55, 0.0 }
 0x6ec   :  { %v1306_v52 = vpop.f32.mrf.mxu2 }
 0x6ed   :  { %v1325_v54 = vpop.f32.mrf.mxu3  ;;  %v1307_v30 = vadd.f32 %v1306_v52, %v1106_v26 }
 0x6ee   :  { %v1289_v56 = vpop.f32.mrf.mxu1  ;;  %v1326_v1 = vadd.f32 %v1325_v54, %v1107_v31 }
 0x6ef   :  { %v1290_v58 = vadd.f32 %v1289_v56, %v1105_v18  ;;  %v1346_v4 = vpop.f32.mrf.mxu0  ;;  %v1358_v9 = vmax.f32 %v1307_v30, 0.0  ;;  %v5900_v18 = vld [vmem:[%s7605_s13] ss:$0 sm:$0xff] }
 0x6f0   :  { %v1347_v59 = vadd.f32 %v1346_v4, %v1108_v0  ;;  %v1359_v11 = vmax.f32 %v1326_v1, 0.0 }
 0x6f1   :  { %v1361_v60 = vmax.f32 %v1290_v58, 0.0 }
 0x6f2   :  { %v1364_v62 = vmax.f32 %v1347_v59, 0.0 }
 0x6f3   :  { %v1369_v63 = vpack.c.bf16 %v1361_v60, %v1357_v8 }
 0x6f4   :  { %v1308_v2 = vpop.f32.mrf.mxu2  ;;  %v1372_v3 = vpack.c.bf16 %v1364_v62, %v1360_v61 }
 0x6f5   :  { %v1309_v5 = vadd.f32 %v1308_v2, %v1106_v26  ;;  %v1327_v6 = vpop.f32.mrf.mxu3  ;;  %1646 = vmatmul.bf16.gmra.mxu1 %v1369_v63 }
 0x6f6   :  { %v1328_v7 = vadd.f32 %v1327_v6, %v1107_v31  ;;  %1703 = vmatmul.bf16.gmra.mxu0 %v1372_v3  ;;  %v5248_v3 = vld [vmem:[#allocation10 + $0x168] sm:$0xf]  ;;  %v5741_v6 = vld [vmem:[#allocation10 + $0x16c] sm:$0xf] }
 0x6f7   :  { %v1362_v10 = vmax.f32 %v1309_v5, 0.0  ;;  %v5742_v5 = vld [vmem:[#allocation10 + $0x170] sm:$0xf0] }
 0x6f8   :  { %v1363_v12 = vmax.f32 %v1328_v7, 0.0  ;;  %v5249_v7 = vor.u32 %v5742_v5, %v5248_v3  ;;  %v5178_v3 = vld [vmem:[#allocation10 + $0xe4] sm:$0xf0]  ;;  %v5184_v5 = vld [vmem:[#allocation10 + $0xe0] sm:$0xf] }
 0x6f9   :  { %v1370_v13 = vpack.c.bf16 %v1362_v10, %v1358_v9  ;;  %v5250_v9 = vld [vmem:[#allocation10 + $0x174] sm:$0xf0]  ;;  %v5256_v10 = vld [vmem:[#allocation10 + $0x170] sm:$0xf] }
 0x6fa   :  { %v1371_v29 = vpack.c.bf16 %v1363_v12, %v1359_v11  ;;  %v5743_v11 = vld [vmem:[#allocation10 + $0x178] sm:$0xf0]  ;;  %v5253_v12 = vor.u32 %v5741_v6, %v5250_v9  ;;  %1981 = vmatpush.bf16.msra.mxu1 %v5249_v7  ;;  %v5725_v6 = vld [vmem:[#allocation10 + $0xe8] sm:$0xf0] }
 0x6fb   :  { %1665 = vmatmul.bf16.gmra.mxu2 %v1370_v13  ;;  %v5257_v13 = vor.u32 %v5743_v11, %v5256_v10  ;;  %v5185_v10 = vor.u32 %v5725_v6, %v5184_v5  ;;  %v5164_v11 = vld [vmem:[#allocation10 + $0xc0] sm:$0xf] }
 0x6fc   :  { %1684 = vmatmul.bf16.gmra.mxu3 %v1371_v29  ;;  %2000 = vmatpush.bf16.msra.mxu2 %v5253_v12  ;;  %v5236_v29 = vld [vmem:[#allocation10 + $0x150] sm:$0xf]  ;;  %v5721_v12 = vld [vmem:[#allocation10 + $0xc8] sm:$0xf0] }
 0x6fd   :  { %2019 = vmatpush.bf16.msra.mxu3 %v5257_v13  ;;  %v5720_v13 = vld [vmem:[#allocation10 + $0xc4] sm:$0xf] }
 0x74d   :  { %v1642_v17 = vpop.f32.mrf.mxu1 }
 0x74e   :  { %v1643_v0 = vadd.f32 %v5900_v18, %v1642_v17  ;;  %v1699_v24 = vpop.f32.mrf.mxu0  ;;  %v5739_v17 = vld [vmem:[#allocation10 + $0x158] sm:$0xf0] }
 0x755   :  { %v1644_v26 = vpop.f32.mrf.mxu1 }
 0x756   :  { %v1645_v28 = vadd.f32 %v5900_v18, %v1644_v26  ;;  %v1701_v36 = vpop.f32.mrf.mxu0  ;;  %v5224_v26 = vld [vmem:[#allocation10 + $0x138] sm:$0xf] }
 0x759   :  { %v1661_v19 = vpop.f32.mrf.mxu2 }
 0x75a   :  { %v1662_v20 = vadd.f32 %v1661_v19, %v1643_v0  ;;  %v1680_v21 = vpop.f32.mrf.mxu3  ;;  %v5237_v0 = vor.u32 %v5739_v17, %v5236_v29  ;;  %v5238_v19 = vld [vmem:[#allocation10 + $0x15c] sm:$0xf0]  ;;  %v5165_v29 = vor.u32 %v5721_v12, %v5164_v11  ;;  %v5166_v17 = vld [vmem:[#allocation10 + $0xcc] sm:$0xf0] }
 0x75c   :  { %v1681_v25 = vadd.f32 %v1680_v21, %v1662_v20  ;;  %v5244_v20 = vld [vmem:[#allocation10 + $0x158] sm:$0xf]  ;;  %v5740_v21 = vld [vmem:[#allocation10 + $0x160] sm:$0xf0]  ;;  %1982 = vmatpush.bf16.msra.mxu1 %v5237_v0  ;;  %v5722_v0 = vld [vmem:[#allocation10 + $0xd0] sm:$0xf0] }
 0x75e   :  { %v1700_v27 = vadd.f32 %v1699_v24, %v1681_v25  ;;  %v5245_v25 = vor.u32 %v5740_v21, %v5244_v20  ;;  %v5169_v20 = vor.u32 %v5720_v13, %v5166_v17 }
 0x760   :  { %v1709_v31 = vadd.f32 %v1700_v27, %v6667_v14  ;;  %2020 = vmatpush.bf16.msra.mxu3 %v5245_v25  ;;  %v5736_v27 = vld [vmem:[#allocation10 + $0x140] sm:$0xf0] }
 0x761   :  { %v1663_v32 = vpop.f32.mrf.mxu2 }
 0x762   :  { %v1664_v33 = vadd.f32 %v1663_v32, %v1645_v28  ;;  %1715 = vadd.xlane.f32.xlu0 %v1709_v31  ;;  %v1682_v34 = vpop.f32.mrf.mxu3  ;;  %v5735_v28 = vld [vmem:[#allocation10 + $0x13c] sm:$0xf]  ;;  %v5226_v32 = vld [vmem:[#allocation10 + $0x144] sm:$0xf0] }
 0x764   :  { %v1683_v35 = vadd.f32 %v1682_v34, %v1664_v33  ;;  %v5232_v33 = vld [vmem:[#allocation10 + $0x140] sm:$0xf]  ;;  %v5737_v34 = vld [vmem:[#allocation10 + $0x148] sm:$0xf0] }
 0x766   :  { %v1702_v37 = vadd.f32 %v1701_v36, %v1683_v35  ;;  %v5229_v35 = vor.u32 %v5735_v28, %v5226_v32  ;;  %v5233_v36 = vor.u32 %v5737_v34, %v5232_v33 }
 0x768   :  { %v1710_v38 = vadd.f32 %v1702_v37, %v6670_v15  ;;  %2021 = vmatpush.bf16.msra.mxu3 %v5233_v36  ;;  %v5212_v37 = vld [vmem:[#allocation10 + $0x120] sm:$0xf] }
 0x76a   :  { %1717 = vadd.xlane.f32.xlu1 %v1710_v38 }
 0x772   :  { %v1647_v39 = vpop.f32.mrf.mxu1 }
 0x773   :  { %v1648_v40 = vadd.f32 %v5900_v18, %v1647_v39  ;;  %v1704_v44 = vpop.f32.mrf.mxu0  ;;  %v5732_v39 = vld [vmem:[#allocation10 + $0x124] sm:$0xf] }
 0x77a   :  { %v1649_v46 = vpop.f32.mrf.mxu1 }
 0x77b   :  { %v1650_v14 = vadd.f32 %v5900_v18, %v1649_v46  ;;  %v1706_v52 = vpop.f32.mrf.mxu0  ;;  %v5738_v18 = vld [vmem:[#allocation10 + $0x154] sm:$0xf]  ;;  %v5200_v46 = vld [vmem:[#allocation10 + $0x108] sm:$0xf] }
 0x77c   :  { %v5241_v24 = vor.u32 %v5738_v18, %v5238_v19  ;;  %v5172_v18 = vld [vmem:[#allocation10 + $0xc8] sm:$0xf] }
 0x77d   :  { %v5173_v21 = vor.u32 %v5722_v0, %v5172_v18 }
 0x77e   :  { %v1666_v41 = vpop.f32.mrf.mxu2  ;;  %2001 = vmatpush.bf16.msra.mxu2 %v5241_v24 }
 0x77f   :  { %v1667_v42 = vadd.f32 %v1666_v41, %v1648_v40  ;;  %v1685_v43 = vpop.f32.mrf.mxu3  ;;  %v5214_v41 = vld [vmem:[#allocation10 + $0x12c] sm:$0xf0] }
 0x781   :  { %v1686_v45 = vadd.f32 %v1685_v43, %v1667_v42  ;;  %v5220_v42 = vld [vmem:[#allocation10 + $0x128] sm:$0xf]  ;;  %v5734_v43 = vld [vmem:[#allocation10 + $0x130] sm:$0xf0] }
 0x782   :  { %2002 = vmatpush.bf16.msra.mxu2 %v5229_v35 }
 0x783   :  { %v1705_v16 = vadd.f32 %v1704_v44, %v1686_v45  ;;  %v5217_v44 = vor.u32 %v5732_v39, %v5214_v41  ;;  %v5221_v45 = vor.u32 %v5734_v43, %v5220_v42  ;;  %v5901_v42 = vld [vmem:[#allocation20] ss:$0 sm:$0xff] }
 0x785   :  { %v1711_v47 = vadd.f32 %v1705_v16, %v6681_v22  ;;  %2022 = vmatpush.bf16.msra.mxu3 %v5221_v45  ;;  %v5730_v16 = vld [vmem:[#allocation10 + $0x110] sm:$0xf0] }
 0x786   :  { %v1668_v48 = vpop.f32.mrf.mxu2  ;;  %2003 = vmatpush.bf16.msra.mxu2 %v5217_v44 }
 0x787   :  { %v1669_v49 = vadd.f32 %v1668_v48, %v1650_v14  ;;  %1719 = vadd.xlane.f32.xlu0 %v1711_v47  ;;  %v1687_v50 = vpop.f32.mrf.mxu3  ;;  %v5729_v14 = vld [vmem:[#allocation10 + $0x10c] sm:$0xf]  ;;  %v5202_v48 = vld [vmem:[#allocation10 + $0x114] sm:$0xf0] }
 0x789   :  { %v1688_v51 = vadd.f32 %v1687_v50, %v1669_v49  ;;  %v5208_v49 = vld [vmem:[#allocation10 + $0x110] sm:$0xf]  ;;  %v5731_v50 = vld [vmem:[#allocation10 + $0x118] sm:$0xf0] }
 0x78b   :  { %v1707_v15 = vadd.f32 %v1706_v52, %v1688_v51  ;;  %v5205_v51 = vor.u32 %v5729_v14, %v5202_v48  ;;  %v5209_v52 = vor.u32 %v5731_v50, %v5208_v49 }
 0x78d   :  { %v1712_v53 = vadd.f32 %v1707_v15, %v6684_v57  ;;  %2004 = vmatpush.bf16.msra.mxu2 %v5205_v51  ;;  %2023 = vmatpush.bf16.msra.mxu3 %v5209_v52  ;;  %v5188_v15 = vld [vmem:[#allocation10 + $0xf0] sm:$0xf] }
 0x78f   :  { %1721 = vadd.xlane.f32.xlu2 %v1712_v53 }
 0x7d5   :  { %v1716_v54 = vpop.xlane.xlu0 %1715 }
 0x7d6   :  { %v1723_v55 = vmul.f32 %v1716_v54, %v6634_v23  ;;  %v5726_v54 = vld [vmem:[#allocation10 + $0xf4] sm:$0xf] }
 0x7d8   :  { %v6699_v56 = vsub.f32 %v1709_v31, %v1723_v55  ;;  %v5225_v31 = vor.u32 %v5736_v27, %v5224_v26 }
 0x7da   :  { %v1731_v58 = vmul.f32 %v6699_v56, %v6699_v56  ;;  %1983 = vmatpush.bf16.msra.mxu1 %v5225_v31 }
 0x7dc   :  { %1735 = vadd.xlane.f32.xlu1 %v1731_v58  ;;  %v5190_v58 = vld [vmem:[#allocation10 + $0xfc] sm:$0xf0] }
 0x7dd   :  { %v1718_v22 = vpop.xlane.xlu1 %1717 }
 0x7de   :  { %v1724_v4 = vmul.f32 %v1718_v22, %v6634_v23  ;;  %v5196_v22 = vld [vmem:[#allocation10 + $0xf8] sm:$0xf] }
 0x7e0   :  { %v6704_v59 = vsub.f32 %v1710_v38, %v1724_v4  ;;  %v5733_v38 = vld [vmem:[#allocation10 + $0x128] sm:$0xf0]  ;;  %v5728_v4 = vld [vmem:[#allocation10 + $0x100] sm:$0xf0] }
 0x7e1   :  { %v5213_v40 = vor.u32 %v5733_v38, %v5212_v37 }
 0x7e2   :  { %v1732_v8 = vmul.f32 %v6704_v59, %v6704_v59 }
 0x7e3   :  { %1984 = vmatpush.bf16.msra.mxu1 %v5213_v40 }
 0x7e4   :  { %1737 = vadd.xlane.f32.xlu0 %v1732_v8  ;;  %v5193_v8 = vor.u32 %v5726_v54, %v5190_v58 }
 0x7e6   :  { %2005 = vmatpush.bf16.msra.mxu2 %v5193_v8 }
 0x7fa   :  { %v1720_v57 = vpop.xlane.xlu0 %1719 }
 0x7fb   :  { %v1725_v60 = vmul.f32 %v1720_v57, %v6634_v23  ;;  %v5197_v57 = vor.u32 %v5728_v4, %v5196_v22 }
 0x7fd   :  { %v6709_v61 = vsub.f32 %v1711_v47, %v1725_v60  ;;  %v5201_v47 = vor.u32 %v5730_v16, %v5200_v46  ;;  %2024 = vmatpush.bf16.msra.mxu3 %v5197_v57  ;;  %v5176_v60 = vld [vmem:[#allocation10 + $0xd8] sm:$0xf]  ;;  %v5902_v16 = vld [vmem:[%s7607_s15] ss:$0 sm:$0xff] }
 0x7ff   :  { %v1733_v62 = vmul.f32 %v6709_v61, %v6709_v61  ;;  %1985 = vmatpush.bf16.msra.mxu1 %v5201_v47 }
 0x801   :  { %1739 = vadd.xlane.f32.xlu2 %v1733_v62  ;;  %v5724_v62 = vld [vmem:[#allocation10 + $0xe0] sm:$0xf0]  ;;  %2025 = vmatpush.bf16.msra.mxu3 %v5185_v10 }
 0x802   :  { %v1722_v30 = vpop.xlane.xlu2 %1721 }
 0x803   :  { %v1726_v63 = vmul.f32 %v1722_v30, %v6634_v23  ;;  %v5723_v30 = vld [vmem:[#allocation10 + $0xdc] sm:$0xf] }
 0x804   :  { %v5181_v9 = vor.u32 %v5723_v30, %v5178_v3 }
 0x805   :  { %v6714_v1 = vsub.f32 %v1712_v53, %v1726_v63  ;;  %v5727_v53 = vld [vmem:[#allocation10 + $0xf8] sm:$0xf0]  ;;  %2026 = vmatpush.bf16.msra.mxu3 %v5173_v21 }
 0x806   :  { %v5189_v55 = vor.u32 %v5727_v53, %v5188_v15  ;;  %2006 = vmatpush.bf16.msra.mxu2 %v5181_v9 }
 0x807   :  { %v1734_v2 = vmul.f32 %v6714_v1, %v6714_v1 }
 0x808   :  { %1986 = vmatpush.bf16.msra.mxu1 %v5189_v55 }
 0x809   :  { %1741 = vadd.xlane.f32.xlu1 %v1734_v2  ;;  %v5177_v2 = vor.u32 %v5724_v62, %v5176_v60 }
 0x80a   :  { %2007 = vmatpush.bf16.msra.mxu2 %v5169_v20 }
 0x80c   :  { %1987 = vmatpush.bf16.msra.mxu1 %v5177_v2 }
 0x810   :  { %1988 = vmatpush.bf16.msra.mxu1 %v5165_v29 }
 0x84f   :  { %v1736_v63 = vpop.xlane.xlu1 %1735 }
 0x850   :  { %v1743_v7 = vmul.f32 %v1736_v63, %v6634_v23 }
 0x852   :  { %v1747_v19 = vadd.f32 1e-05, %v1743_v7 }
 0x854   :  { %5952 = vrsqrt.f32 %v1747_v19  ;;  %vm1757_vm2 = vweird.f32 %v1747_v19 }
 0x857   :  { %v1738_v24 = vpop.xlane.xlu0 %1737 }
 0x858   :  { %v1744_v25 = vmul.f32 %v1738_v24, %v6634_v23 }
 0x85a   :  { %v5953_v26 = vpop.eup %5952  ;;  %v1748_v27 = vadd.f32 1e-05, %v1744_v25 }
 0x85b   :  { %v1752_v28 = vmul.f32 %v5953_v26, %v1747_v19  ;;  %vm1758_vm15 = vweird.f32 %v5953_v26 }
 0x85c   :  { %5954 = vrsqrt.f32 %v1748_v27  ;;  %vm1759_vm3 = vmor %vm1757_vm2, %vm1758_vm15  ;;  %vm1767_vm5 = vweird.f32 %v1748_v27 }
 0x85d   :  { %v1753_v31 = vmul.f32 %v5953_v26, %v1752_v28 }
 0x85f   :  { %v1754_v32 = vmul.f32 0.5, %v1753_v31 }
 0x861   :  { %v1755_v33 = vsub.f32 1.5, %v1754_v32 }
 0x862   :  { %v5955_v34 = vpop.eup %5954 }
 0x863   :  { %v1756_v35 = vmul.f32 %v5953_v26, %v1755_v33  ;;  %v1762_v36 = vmul.f32 %v5955_v34, %v1748_v27  ;;  %vm1768_vm4 = vweird.f32 %v5955_v34 }
 0x864   :  { %vm1769_vm6 = vmor %vm1767_vm5, %vm1768_vm4 }
 0x865   :  { %v1763_v37 = vmul.f32 %v5955_v34, %v1762_v36  ;;  %v1760_v38 = vsel %vm1759_vm3, %v5953_v26, %v1756_v35 }
 0x866   :  { %v1791_v41 = vmul.f32 %v1760_v38, %v6699_v56 }
 0x867   :  { %v1764_v39 = vmul.f32 0.5, %v1763_v37 }
 0x868   :  { %v1798_v46 = vmul.f32 %v5901_v42, %v1791_v41 }
 0x869   :  { %v1765_v40 = vsub.f32 1.5, %v1764_v39 }
 0x86a   :  { %v6725_v47 = vadd.f32 %v5902_v16, %v1798_v46 }
 0x86b   :  { %v1766_v43 = vmul.f32 %v5955_v34, %v1765_v40 }
 0x86d   :  { %v1770_v44 = vsel %vm1769_vm6, %v5955_v34, %v1766_v43 }
 0x86e   :  { %v1792_v45 = vmul.f32 %v1770_v44, %v6704_v59 }
 0x870   :  { %v1799_v14 = vmul.f32 %v5901_v42, %v1792_v45 }
 0x872   :  { %v6727_v48 = vadd.f32 %v5902_v16, %v1799_v14 }
 0x874   :  { %v1740_v49 = vpop.xlane.xlu2 %1739  ;;  %v1809_v56 = vpack.c.bf16 %v6727_v48, %v6725_v47 }
 0x875   :  { %v1745_v50 = vmul.f32 %v1740_v49, %v6634_v23 }
 0x876   :  { %1989 = vmatmul.bf16.vlgmr.msra.gmra.mxu1 %v1809_v56  ;;  %2008 = vmatmul.bf16.vlgmr.msra.gmra.mxu2 %v1809_v56 }
 0x877   :  { %v1749_v51 = vadd.f32 1e-05, %v1745_v50  ;;  %2027 = vmatmul.bf16.vlgmr.msra.gmra.mxu3 %v1809_v56 }
 0x879   :  { %5956 = vrsqrt.f32 %v1749_v51  ;;  %vm1777_vm8 = vweird.f32 %v1749_v51 }
 0x87c   :  { %v1742_v59 = vpop.xlane.xlu1 %1741 }
 0x87d   :  { %v1746_v52 = vmul.f32 %v1742_v59, %v6634_v23 }
 0x87f   :  { %v5957_v15 = vpop.eup %5956  ;;  %v1750_v53 = vadd.f32 1e-05, %v1746_v52 }
 0x880   :  { %v1772_v54 = vmul.f32 %v5957_v15, %v1749_v51  ;;  %vm1778_vm7 = vweird.f32 %v5957_v15 }
 0x881   :  { %5958 = vrsqrt.f32 %v1750_v53  ;;  %vm1779_vm9 = vmor %vm1777_vm8, %vm1778_vm7  ;;  %vm1787_vm11 = vweird.f32 %v1750_v53 }
 0x882   :  { %v1773_v55 = vmul.f32 %v5957_v15, %v1772_v54 }
 0x884   :  { %v1774_v58 = vmul.f32 0.5, %v1773_v55 }
 0x886   :  { %v1775_v22 = vsub.f32 1.5, %v1774_v58 }
 0x887   :  { %v5959_v4 = vpop.eup %5958 }
 0x888   :  { %v1776_v8 = vmul.f32 %v5957_v15, %v1775_v22  ;;  %v1782_v57 = vmul.f32 %v5959_v4, %v1750_v53  ;;  %vm1788_vm10 = vweird.f32 %v5959_v4 }
 0x889   :  { %vm1789_vm12 = vmor %vm1787_vm11, %vm1788_vm10 }
 0x88a   :  { %v1783_v60 = vmul.f32 %v5959_v4, %v1782_v57  ;;  %v1780_v62 = vsel %vm1779_vm9, %v5957_v15, %v1776_v8 }
 0x88b   :  { %v1793_v2 = vmul.f32 %v1780_v62, %v6709_v61  ;;  %v1845_v61 = vld [vmem:[#allocation11 + $0x3] sm:$0x7] }
 0x88c   :  { %v1784_v30 = vmul.f32 0.5, %v1783_v60  ;;  %v1848_v17 = vperm.slane %v1845_v61, 1  ;;  %v1847_v18 = vperm.slane %v1845_v61, 0  ;;  %v1849_v40 = vperm.slane %v1845_v61, 2 }
 0x88d   :  { %v1800_v7 = vmul.f32 %v5901_v42, %v1793_v2 }
 0x88e   :  { %v1785_v63 = vsub.f32 1.5, %v1784_v30 }
 0x88f   :  { %v6735_v10 = vadd.f32 %v5902_v16, %v1800_v7 }
 0x890   :  { %v1786_v3 = vmul.f32 %v5959_v4, %v1785_v63 }
 0x892   :  { %v1790_v5 = vsel %vm1789_vm12, %v5959_v4, %v1786_v3 }
 0x893   :  { %v1794_v6 = vmul.f32 %v1790_v5, %v6714_v1 }
 0x895   :  { %v1801_v9 = vmul.f32 %v5901_v42, %v1794_v6 }
 0x897   :  { %v6737_v11 = vadd.f32 %v5902_v16, %v1801_v9 }
 0x899   :  { %v1810_v12 = vpack.c.bf16 %v6737_v11, %v6735_v10 }
 0x89b   :  { %1994 = vmatmul.bf16.gmra.mxu1 %v1810_v12  ;;  %2013 = vmatmul.bf16.gmra.mxu2 %v1810_v12 }
 0x89c   :  { %2032 = vmatmul.bf16.gmra.mxu3 %v1810_v12 }
 0x8f3   :  { %v1990_v13 = vpop.f32.mrf.mxu1 }
 0x8f4   :  { %v1991_v1 = vadd.f32 %v1990_v13, %v1847_v18 }
 0x8f9   :  { %v2009_v29 = vpop.f32.mrf.mxu2 }
 0x8fa   :  { %v2010_v0 = vadd.f32 %v2009_v29, %v1848_v17  ;;  %v2028_v35 = vpop.f32.mrf.mxu3 }
 0x8fb   :  { %v1992_v19 = vpop.f32.mrf.mxu1  ;;  %v2029_v50 = vadd.f32 %v2028_v35, %v1849_v40 }
 0x8fc   :  { %v2038_v21 = vpack.c.bf16 %v2010_v0, %v1991_v1  ;;  %v1993_v24 = vadd.f32 %v1992_v19, %v1847_v18  ;;  %v6008_v0 = vld [vmem:[#allocation5 + $0x8] sm:$0xff] }
 0x8fd   :  { %v2039_v58 = vpack.c.bf16 %v2029_v50, %v2029_v50 }
 0x8fe   :  { %v2056_v27 = vunpack.c.h.b16 %v2038_v21  ;;  %v2050_v31 = vunpack.c.l.b16 %v2038_v21  ;;  %v6009_v21 = vld [vmem:[#allocation5] sm:$0xff] }
 0x8ff   :  { %v2143_v30 = vunpack.c.l.b16 %v2039_v58 }
 0x901   :  { %v2011_v20 = vpop.f32.mrf.mxu2 }
 0x902   :  { %v2012_v25 = vadd.f32 %v2011_v20, %v1848_v17  ;;  %v2030_v36 = vpop.f32.mrf.mxu3 }
 0x903   :  { %v2031_v45 = vadd.f32 %v2030_v36, %v1849_v40 }
 0x904   :  { %v2040_v26 = vpack.c.bf16 %v2012_v25, %v1993_v24 }
 0x905   :  { %v2041_v15 = vpack.c.bf16 %v2031_v45, %v2031_v45 }
 0x906   :  { %v2057_v28 = vunpack.c.h.b16 %v2040_v26  ;;  %v2051_v32 = vunpack.c.l.b16 %v2040_v26 }
 0x907   :  { %v2144_v57 = vunpack.c.l.b16 %v2041_v15 }
 0x908   :  { %v2060_v33 = vpack.c.b16 %v2057_v28, %v2056_v27  ;;  %v2054_v34 = vpack.c.b16 %v2051_v32, %v2050_v31  ;;  %v6010_v27 = vld [vmem:[#allocation5 + $0x10] sm:$0xff] }
 0x909   :  { %v6745_v2 = vpack.c.b16 %v2144_v57, %v2143_v30 }
 0x90a   :  { %2180 = vrot.lane.b32.xlu2 %v2060_v33, %s6378_s26  ;;  %2176 = vrot.lane.b32.xlu1 %v2054_v34, %s6378_s26  ;;  %v2069_v6 = vsel %vm621_vm0, %v2060_v33, 0 }
 0x918   :  { %v1995_v37 = vpop.f32.mrf.mxu1 }
 0x919   :  { %v1996_v44 = vadd.f32 %v1995_v37, %v1847_v18 }
 0x91e   :  { %v2014_v38 = vpop.f32.mrf.mxu2 }
 0x91f   :  { %v2033_v39 = vpop.f32.mrf.mxu3  ;;  %v2015_v41 = vadd.f32 %v2014_v38, %v1848_v17 }
 0x920   :  { %v2034_v42 = vadd.f32 %v2033_v39, %v1849_v40  ;;  %v1997_v43 = vpop.f32.mrf.mxu1 }
 0x921   :  { %v2042_v16 = vpack.c.bf16 %v2015_v41, %v1996_v44  ;;  %v1998_v14 = vadd.f32 %v1997_v43, %v1847_v18  ;;  %v6011_v41 = vld [vmem:[#allocation5 + $0x18] sm:$0xff] }
 0x922   :  { %v2043_v51 = vpack.c.bf16 %v2034_v42, %v2034_v42 }
 0x923   :  { %v2058_v54 = vunpack.c.h.b16 %v2042_v16  ;;  %v2052_v3 = vunpack.c.l.b16 %v2042_v16 }
 0x924   :  { %v2145_v22 = vunpack.c.l.b16 %v2043_v51 }
 0x926   :  { %v2016_v46 = vpop.f32.mrf.mxu2 }
 0x927   :  { %v2017_v49 = vadd.f32 %v2016_v46, %v1848_v17  ;;  %v2035_v56 = vpop.f32.mrf.mxu3 }
 0x928   :  { %v2036_v59 = vadd.f32 %v2035_v56, %v1849_v40 }
 0x929   :  { %v2044_v52 = vpack.c.bf16 %v2017_v49, %v1998_v14 }
 0x92a   :  { %v2045_v53 = vpack.c.bf16 %v2036_v59, %v2036_v59 }
 0x92b   :  { %v2059_v55 = vunpack.c.h.b16 %v2044_v52  ;;  %v2053_v63 = vunpack.c.l.b16 %v2044_v52 }
 0x92c   :  { %v2146_v4 = vunpack.c.l.b16 %v2045_v53 }
 0x92d   :  { %v2061_v8 = vpack.c.b16 %v2059_v55, %v2058_v54  ;;  %v2055_v5 = vpack.c.b16 %v2053_v63, %v2052_v3 }
 0x92e   :  { %v2148_v60 = vpack.c.b16 %v2146_v4, %v2145_v22 }
 0x92f   :  { %2182 = vrot.lane.b32.xlu0 %v2061_v8, %s6378_s26  ;;  %v2072_v62 = vsel %vm621_vm0, %v2061_v8, 0 }
 0x930   :  { %2163 = vmatpush.bf16.msrb.mxu1 %v2148_v60  ;;  %2080 = vmatpush.bf16.xpose.msrb.mxu0 %v2072_v62 }
 0x934   :  { %2164 = vmatpush.bf16.msrb.mxu1 %v6745_v2 }
 0x937   :  { %2178 = vrot.lane.b32.xlu0 %v2055_v5, %s6378_s26 }
 0x938   :  { %2081 = vmatpush.bf16.xpose.msrb.mxu0 %v2069_v6 }
 0x93f   :  { %5258 = vmatmul.msk.bf16.vlgmr.msrb.gmra.mxu0 %vm621_vm0, %v2054_v34 }
 0x94f   :  { %5259 = vmatmul.msk.bf16.gmra.mxu0 %vm621_vm0, %v2055_v5 }
 0x964   :  { %v2181_v12 = vpop.permute.xlu2 %2180 }
 0x965   :  { %v2191_v13 = vsel %vm621_vm0, %v2181_v12, 0 }
 0x97c   :  { %v2177_v61 = vpop.permute.xlu1 %2176 }
 0x9a1   :  { %v2183_v7 = vpop.permute.xlu0 %2182 }
 0x9a2   :  { %v2194_v9 = vsel %vm621_vm0, %v2183_v7, 0 }
 0x9a3   :  { %2202 = vmatpush.bf16.xpose.msrb.mxu2 %v2194_v9 }
 0x9a9   :  { %v2179_v17 = vpop.permute.xlu0 %2178 }
 0x9ab   :  { %2203 = vmatpush.bf16.xpose.msrb.mxu2 %v2191_v13 }
 0x9b2   :  { %5262 = vmatmul.msk.bf16.vlgmr.msrb.gmra.mxu2 %vm621_vm0, %v2177_v61 }
 0x9bc   :  { %v2083_v29 = vpop.f32.mrf.mxu0 }
 0x9bd   :  { %v2084_v35 = vadd.f32 %v6009_v21, %v2083_v29 }
 0x9bf   :  { %v2093_v39 = vsel %vm653_vm1, %v2084_v35, -inf }
 0x9c2   :  { %5263 = vmatmul.msk.bf16.gmra.mxu2 %vm621_vm0, %v2179_v17 }
 0x9c4   :  { %v2085_v18 = vpop.f32.mrf.mxu0 }
 0x9c5   :  { %v6756_v19 = vadd.f32 %v6008_v0, %v2085_v18 }
 0x9c7   :  { %v2096_v1 = vsel %vm653_vm1, %v6756_v19, -inf }
 0x9c8   :  { %2097 = vmax.xlane.f32.xlu1 %v2096_v1 }
 0x9cc   :  { %v2088_v26 = vpop.f32.mrf.mxu0 }
 0x9cd   :  { %v6761_v28 = vadd.f32 %v6010_v27, %v2088_v26 }
 0x9cf   :  { %v2099_v34 = vsel %vm653_vm1, %v6761_v28, -inf }
 0x9d4   :  { %v2090_v40 = vpop.f32.mrf.mxu0 }
 0x9d5   :  { %v2091_v42 = vadd.f32 %v6011_v41, %v2090_v40 }
 0x9d7   :  { %v2102_v46 = vsel %vm653_vm1, %v2091_v42, -inf }
 0xa35   :  { %v2205_v20 = vpop.f32.mrf.mxu2 }
 0xa36   :  { %v2206_v24 = vadd.f32 %v6009_v21, %v2205_v20 }
 0xa38   :  { %v2215_v25 = vsel %vm653_vm1, %v2206_v24, -inf }
 0xa39   :  { %2216 = vmax.xlane.f32.xlu2 %v2215_v25 }
 0xa3b   :  { %v2098_v56 = vpop.xlane.xlu1 %2097 }
 0xa3c   :  { %v2106_v3 = vsub.f32 %v6756_v19, %v2098_v56 }
 0xa3d   :  { %v2207_v31 = vpop.f32.mrf.mxu2 }
 0xa3e   :  { %v2208_v32 = vadd.f32 %v6008_v0, %v2207_v31  ;;  %v2111_v12 = vmul.f32 1.442695, %v2106_v3  ;;  %v5747_v3 = vld [vmem:[#allocation13 + $0x58] sm:$0xff] }
 0xa40   :  { %v2218_v33 = vsel %vm653_vm1, %v2208_v32, -inf }
 0xa41   :  { %2219 = vmax.xlane.f32.xlu0 %v2218_v33  ;;  %2100 = vmax.xlane.f32.xlu2 %v2099_v34 }
 0xa45   :  { %v2210_v36 = vpop.f32.mrf.mxu2 }
 0xa46   :  { %v2211_v37 = vadd.f32 %v6010_v27, %v2210_v36 }
 0xa48   :  { %v2221_v38 = vsel %vm653_vm1, %v2211_v37, -inf }
 0xa49   :  { %2222 = vmax.xlane.f32.xlu1 %v2221_v38  ;;  %2094 = vmax.xlane.f32.xlu0 %v2093_v39 }
 0xa4d   :  { %v2212_v43 = vpop.f32.mrf.mxu2 }
 0xa4e   :  { %v2213_v44 = vadd.f32 %v6011_v41, %v2212_v43 }
 0xa50   :  { %v2224_v45 = vsel %vm653_vm1, %v2213_v44, -inf }
 0xa51   :  { %2225 = vmax.xlane.f32.xlu2 %v2224_v45  ;;  %2103 = vmax.xlane.f32.xlu0 %v2102_v46 }
 0xa62   :  { %2263 = vrot.lane.b32.xlu1 %v2148_v60, %s6378_s26 }
 0xaac   :  { %v2217_v16 = vpop.xlane.xlu2 %2216 }
 0xaad   :  { %v2227_v14 = vsub.f32 %v2206_v24, %v2217_v16 }
 0xaaf   :  { %v2231_v49 = vmul.f32 1.442695, %v2227_v14 }
 0xab1   :  { %5960 = vpow2.f32 %v2231_v49 }
 0xab4   :  { %v2220_v50 = vpop.xlane.xlu0 %2219  ;;  %v2101_v53 = vpop.xlane.xlu2 %2100 }
 0xab5   :  { %v2228_v51 = vsub.f32 %v2208_v32, %v2220_v50  ;;  %v2107_v24 = vsub.f32 %v6761_v28, %v2101_v53 }
 0xab7   :  { %v5961_v59 = vpop.eup %5960  ;;  %v2233_v52 = vmul.f32 1.442695, %v2228_v51  ;;  %v2113_v25 = vmul.f32 1.442695, %v2107_v24 }
 0xab8   :  { %v2239_v15 = vsel %vm653_vm1, %v5961_v59, 0.0 }
 0xab9   :  { %5962 = vpow2.f32 %v2233_v52  ;;  %2240 = vadd.xlane.f32.xlu2 %v2239_v15 }
 0xabc   :  { %v2223_v54 = vpop.xlane.xlu1 %2222  ;;  %v2095_v55 = vpop.xlane.xlu0 %2094 }
 0xabd   :  { %v2229_v58 = vsub.f32 %v2211_v37, %v2223_v54  ;;  %v2105_v22 = vsub.f32 %v2084_v35, %v2095_v55 }
 0xabf   :  { %v5963_v4 = vpop.eup %5962  ;;  %v2235_v8 = vmul.f32 1.442695, %v2229_v58  ;;  %v2109_v57 = vmul.f32 1.442695, %v2105_v22 }
 0xac0   :  { %v2242_v60 = vsel %vm653_vm1, %v5963_v4, 0.0 }
 0xac1   :  { %5964 = vpow2.f32 %v2235_v8  ;;  %2243 = vadd.xlane.f32.xlu0 %v2242_v60  ;;  %v5751_v60 = vld [vmem:[#allocation13 + $0x78] sm:$0xff] }
 0xac2   :  { %5966 = vpow2.f32 %v2109_v57  ;;  %2384 = vmatpush.bf16.msra.mxu0 %v5751_v60  ;;  %v5424_v60 = vld [vmem:[#allocation17 + $0x1f8] sm:$0xf0] }
 0xac4   :  { %v2226_v62 = vpop.xlane.xlu2 %2225  ;;  %v2104_v13 = vpop.xlane.xlu0 %2103 }
 0xac5   :  { %v2230_v30 = vsub.f32 %v2213_v44, %v2226_v62  ;;  %v2108_v29 = vsub.f32 %v2091_v42, %v2104_v13  ;;  %v5750_v62 = vld [vmem:[#allocation13 + $0x70] sm:$0xff] }
 0xac6   :  { %2385 = vmatpush.bf16.msra.mxu0 %v5750_v62 }
 0xac7   :  { %v5965_v63 = vpop.eup %5964  ;;  %v2237_v5 = vmul.f32 1.442695, %v2230_v30  ;;  %v2115_v18 = vmul.f32 1.442695, %v2108_v29  ;;  %v5749_v30 = vld [vmem:[#allocation13 + $0x68] sm:$0xff] }
 0xac8   :  { %v5967_v6 = vpop.eup %5966  ;;  %v2245_v7 = vsel %vm653_vm1, %v5965_v63, 0.0 }
 0xac9   :  { %5968 = vpow2.f32 %v2237_v5  ;;  %2246 = vadd.xlane.f32.xlu0 %v2245_v7  ;;  %v2117_v9 = vsel %vm653_vm1, %v5967_v6, 0.0  ;;  %v5746_v5 = vld [vmem:[#allocation13 + $0x50] sm:$0xff]  ;;  %v5744_v7 = vld [vmem:[#allocation13 + $0x40] sm:$0xff] }
 0xaca   :  { %2118 = vadd.xlane.f32.xlu1 %v2117_v9  ;;  %5970 = vpow2.f32 %v2111_v12  ;;  %2386 = vmatpush.bf16.msra.mxu0 %v5749_v30  ;;  %v5398_v30 = vld [vmem:[#allocation17 + $0x1c0] sm:$0xf] }
 0xacb   :  { %5972 = vpow2.f32 %v2115_v18 }
 0xacc   :  { %5974 = vpow2.f32 %v2113_v25 }
 0xacf   :  { %v5969_v61 = vpop.eup %5968 }
 0xad0   :  { %v2248_v17 = vsel %vm653_vm1, %v5969_v61, 0.0  ;;  %v5971_v19 = vpop.eup %5970 }
 0xad1   :  { %2261 = vrot.lane.b32.xlu2 %v6745_v2, %s6378_s26  ;;  %2249 = vadd.xlane.f32.xlu0 %v2248_v17  ;;  %v2120_v1 = vsel %vm653_vm1, %v5971_v19, 0.0  ;;  %v5973_v20 = vpop.eup %5972 }
 0xad2   :  { %v2126_v21 = vsel %vm653_vm1, %v5973_v20, 0.0  ;;  %v5975_v26 = vpop.eup %5974 }
 0xad3   :  { %v2123_v2 = vsel %vm653_vm1, %v5975_v26, 0.0 }
 0xad4   :  { %v2264_v0 = vpop.permute.xlu1 %2263 }
 0xad5   :  { %2279 = vmatpush.bf16.msrb.mxu3 %v2264_v0 }
 0xad9   :  { %2121 = vadd.xlane.f32.xlu0 %v2120_v1 }
 0xae1   :  { %2127 = vadd.xlane.f32.xlu0 %v2126_v21 }
 0xafa   :  { %2124 = vadd.xlane.f32.xlu2 %v2123_v2 }
 0xb2c   :  { %v2241_v27 = vpop.xlane.xlu2 %2240 }
 0xb2d   :  { %5976 = vrcp.f32 %v2241_v27  ;;  %v5903_v27 = vld [vmem:[%s7599_s7 + $0x1] ss:$0 sm:$0xff] }
 0xb33   :  { %v5977_v33 = vpop.eup %5976 }
 0xb34   :  { %v2262_v31 = vpop.permute.xlu2 %2261  ;;  %v2244_v32 = vpop.xlane.xlu0 %2243  ;;  %v2255_v35 = vmul.f32 %v5977_v33, %v5961_v59 }
 0xb35   :  { %5978 = vrcp.f32 %v2244_v32  ;;  %2280 = vmatpush.bf16.msrb.mxu3 %v2262_v31 }
 0xb3b   :  { %v5979_v34 = vpop.eup %5978 }
 0xb3c   :  { %v2256_v36 = vmul.f32 %v5979_v34, %v5963_v4  ;;  %v2247_v37 = vpop.xlane.xlu0 %2246 }
 0xb3d   :  { %5980 = vrcp.f32 %v2247_v37  ;;  %v2119_v39 = vpop.xlane.xlu1 %2118 }
 0xb3e   :  { %v2259_v38 = vpack.c.bf16 %v2256_v36, %v2255_v35 }
 0xb40   :  { %5264 = vmatmul.msk.bf16.vlgmr.msrb.gmra.mxu3 %vm653_vm1, %v2259_v38 }
 0xb43   :  { %v5981_v40 = vpop.eup %5980 }
 0xb44   :  { %v2250_v28 = vpop.xlane.xlu0 %2249  ;;  %v2257_v43 = vmul.f32 %v5981_v40, %v5965_v63  ;;  %v5748_v63 = vld [vmem:[#allocation13 + $0x60] sm:$0xff] }
 0xb45   :  { %5982 = vrcp.f32 %v2250_v28  ;;  %2387 = vmatpush.bf16.msra.mxu0 %v5748_v63  ;;  %v5778_v63 = vld [vmem:[#allocation17 + $0x1cc] sm:$0xf0] }
 0xb46   :  { %5984 = vrcp.f32 %v2119_v39 }
 0xb49   :  { %2388 = vmatpush.bf16.msra.mxu0 %v5747_v3  ;;  %v5776_v3 = vld [vmem:[#allocation17 + $0x1c4] sm:$0xf] }
 0xb4b   :  { %v5983_v41 = vpop.eup %5982 }
 0xb4c   :  { %v2122_v42 = vpop.xlane.xlu0 %2121  ;;  %v2258_v44 = vmul.f32 %v5983_v41, %v5969_v61  ;;  %v5985_v46 = vpop.eup %5984 }
 0xb4d   :  { %5986 = vrcp.f32 %v2122_v42  ;;  %v2133_v14 = vmul.f32 %v5985_v46, %v5967_v6  ;;  %2389 = vmatpush.bf16.msra.mxu0 %v5746_v5  ;;  %v5745_v6 = vld [vmem:[#allocation13 + $0x48] sm:$0xff]  ;;  %v5399_v5 = vor.u32 %v5778_v63, %v5398_v30  ;;  %v5318_v63 = vld [vmem:[#allocation17 + $0x120] sm:$0xf] }
 0xb4e   :  { %v2260_v45 = vpack.c.bf16 %v2258_v44, %v2257_v43 }
 0xb50   :  { %5265 = vmatmul.msk.bf16.gmra.mxu3 %vm653_vm1, %v2260_v45 }
 0xb51   :  { %2390 = vmatpush.bf16.msra.mxu0 %v5745_v6  ;;  %v5400_v6 = vld [vmem:[#allocation17 + $0x1d0] sm:$0xf0] }
 0xb53   :  { %v5987_v16 = vpop.eup %5986 }
 0xb54   :  { %v2134_v49 = vmul.f32 %v5987_v16, %v5971_v19  ;;  %v2128_v50 = vpop.xlane.xlu0 %2127 }
 0xb55   :  { %5988 = vrcp.f32 %v2128_v50  ;;  %2391 = vmatpush.bf16.msra.mxu0 %v5744_v7  ;;  %v5406_v7 = vld [vmem:[#allocation17 + $0x1c8] sm:$0xf] }
 0xb56   :  { %v2137_v56 = vpack.c.bf16 %v2134_v49, %v2133_v14 }
 0xb58   :  { %5260 = vmatmul.msk.bf16.vlgmr.msrb.gmra.mxu1 %vm653_vm1, %v2137_v56 }
 0xb5b   :  { %v5989_v59 = vpop.eup %5988 }
 0xb5c   :  { %v2136_v53 = vmul.f32 %v5989_v59, %v5973_v20 }
 0xb6d   :  { %v2125_v51 = vpop.xlane.xlu2 %2124 }
 0xb6e   :  { %5990 = vrcp.f32 %v2125_v51 }
 0xb74   :  { %v5991_v52 = vpop.eup %5990 }
 0xb75   :  { %v2135_v15 = vmul.f32 %v5991_v52, %v5975_v26  ;;  %v5414_v52 = vld [vmem:[#allocation17 + $0x1e0] sm:$0xf] }
 0xb77   :  { %v2138_v54 = vpack.c.bf16 %v2136_v53, %v2135_v15  ;;  %v5782_v15 = vld [vmem:[#allocation17 + $0x1ec] sm:$0xf0]  ;;  %v5780_v53 = vld [vmem:[#allocation17 + $0x1e4] sm:$0xf] }
 0xb79   :  { %5261 = vmatmul.msk.bf16.gmra.mxu1 %vm653_vm1, %v2138_v54  ;;  %v5415_v54 = vor.u32 %v5782_v15, %v5414_v52  ;;  %v5334_v15 = vld [vmem:[#allocation17 + $0x140] sm:$0xf] }
 0xb7b   :  { %2711 = vmatpush.bf16.msra.mxu1 %v5415_v54  ;;  %v5760_v54 = vld [vmem:[#allocation17 + $0x144] sm:$0xf] }
 0xb7f   :  { %2712 = vmatpush.bf16.msra.mxu1 %v5399_v5  ;;  %v5756_v5 = vld [vmem:[#allocation17 + $0x124] sm:$0xf] }
 0xbc3   :  { %v2282_v55 = vpop.f32.mrf.mxu3 }
 0xbcb   :  { %v2284_v58 = vpop.f32.mrf.mxu3 }
 0xbcc   :  { %v5884_v22 = vpack.i.bf16 %v2284_v58, %v2282_v55  ;;  %v5416_v55 = vld [vmem:[#allocation17 + $0x1f0] sm:$0xf0]  ;;  %v5422_v58 = vld [vmem:[#allocation17 + $0x1e8] sm:$0xf] }
 0xbce   :  { %5885 = vrot.lane.b32.xlu0 %v5884_v22, %s6378_s26  ;;  %v5783_v22 = vld [vmem:[#allocation17 + $0x1f4] sm:$0xf0] }
 0xbd3   :  { %v2287_v4 = vpop.f32.mrf.mxu3 }
 0xbd5   :  { %v2166_v9 = vpop.f32.mrf.mxu1 }
 0xbdb   :  { %v2289_v8 = vpop.f32.mrf.mxu3 }
 0xbdc   :  { %v5889_v57 = vpack.i.bf16 %v2289_v8, %v2287_v4  ;;  %v5419_v4 = vor.u32 %v5780_v53, %v5416_v55  ;;  %v5423_v8 = vor.u32 %v5783_v22, %v5422_v58  ;;  %v5762_v53 = vld [vmem:[#allocation17 + $0x14c] sm:$0xf0]  ;;  %v5336_v58 = vld [vmem:[#allocation17 + $0x150] sm:$0xf0]  ;;  %v5342_v22 = vld [vmem:[#allocation17 + $0x148] sm:$0xf] }
 0xbdd   :  { %v2168_v12 = vpop.f32.mrf.mxu1  ;;  %v5335_v55 = vor.u32 %v5762_v53, %v5334_v15  ;;  %v6832_v15 = vld [vmem:[#allocation19 + $0x1f8] sm:$0xff] }
 0xbde   :  { %5890 = vrot.lane.b32.xlu0 %v5889_v57, %s6378_s26  ;;  %v5781_v57 = vld [vmem:[#allocation17 + $0x1ec] sm:$0xf]  ;;  %2730 = vmatpush.bf16.msra.mxu2 %v5419_v4  ;;  %v5763_v4 = vld [vmem:[#allocation17 + $0x154] sm:$0xf0] }
 0xbdf   :  { %v5427_v62 = vor.u32 %v5781_v57, %v5424_v60  ;;  %2749 = vmatpush.bf16.msra.mxu3 %v5423_v8  ;;  %v5339_v8 = vor.u32 %v5760_v54, %v5336_v58  ;;  %v5343_v57 = vor.u32 %v5763_v4, %v5342_v22  ;;  %v5761_v60 = vld [vmem:[#allocation17 + $0x14c] sm:$0xf]  ;;  %v5799_v54 = vld [vmem:[#allocation19 + $0x178] sm:$0xff]  ;;  %v5790_v22 = vld [vmem:[#allocation19 + $0x130] sm:$0xff] }
 0xbe0   :  { %v6836_v4 = vld [vmem:[#allocation19 + $0x1f0] sm:$0xff] }
 0xbe1   :  { %2768 = vmatpush.bf16.msrb.mxu0 %v5427_v62  ;;  %v5344_v62 = vld [vmem:[#allocation17 + $0x158] sm:$0xf0] }
 0xbe2   :  { %v5347_v30 = vor.u32 %v5761_v60, %v5344_v62 }
 0xbf6   :  { %v2171_v19 = vpop.f32.mrf.mxu1 }
 0xbfe   :  { %v2173_v24 = vpop.f32.mrf.mxu1 }
 0xc40   :  { %v5886_v13 = vpop.permute.xlu0 %5885 }
 0xc41   :  { %v5888_v61 = vunpack.i.h.bf16 %v5886_v13  ;;  %v5887_v29 = vunpack.i.l.bf16 %v5886_v13 }
 0xc43   :  { %v2309_v17 = vsel %vm621_vm0, %v2168_v12, %v5888_v61  ;;  %v2308_v18 = vsel %vm621_vm0, %v2166_v9, %v5887_v29  ;;  %v5779_v9 = vld [vmem:[#allocation17 + $0x1d4] sm:$0xf0]  ;;  %v5403_v12 = vor.u32 %v5776_v3, %v5400_v6  ;;  %v5777_v61 = vld [vmem:[#allocation17 + $0x1cc] sm:$0xf]  ;;  %v5408_v29 = vld [vmem:[#allocation17 + $0x1d8] sm:$0xf0] }
 0xc44   :  { %v2312_v0 = vpack.c.bf16 %v2309_v17, %v2308_v18  ;;  %v5407_v13 = vor.u32 %v5779_v9, %v5406_v7  ;;  %v5411_v17 = vor.u32 %v5777_v61, %v5408_v29  ;;  %v5382_v18 = vld [vmem:[#allocation17 + $0x1a0] sm:$0xf]  ;;  %v5758_v3 = vld [vmem:[#allocation17 + $0x12c] sm:$0xf0]  ;;  %v5320_v9 = vld [vmem:[#allocation17 + $0x130] sm:$0xf0] }
 0xc45   :  { %2731 = vmatpush.bf16.msra.mxu2 %v5403_v12  ;;  %v5319_v7 = vor.u32 %v5758_v3, %v5318_v63  ;;  %v5326_v12 = vld [vmem:[#allocation17 + $0x128] sm:$0xf]  ;;  %v5323_v29 = vor.u32 %v5756_v5, %v5320_v9  ;;  %v5806_v63 = vld [vmem:[#allocation19 + $0x1b0] sm:$0xff] }
 0xc46   :  { %2392 = vmatmul.bf16.vlgmr.msra.gmra.mxu0 %v2312_v0  ;;  %2750 = vmatpush.bf16.msra.mxu3 %v5407_v13  ;;  %v5774_v0 = vld [vmem:[#allocation17 + $0x1ac] sm:$0xf0]  ;;  %v5759_v13 = vld [vmem:[#allocation17 + $0x134] sm:$0xf0]  ;;  %v5789_v9 = vld [vmem:[#allocation19 + $0x128] sm:$0xff] }
 0xc47   :  { %2769 = vmatpush.bf16.msrb.mxu0 %v5411_v17  ;;  %v5327_v17 = vor.u32 %v5759_v13, %v5326_v12  ;;  %v6842_v12 = vld [vmem:[#allocation19 + $0x1e8] sm:$0xff] }
 0xc50   :  { %v5891_v1 = vpop.permute.xlu0 %5890 }
 0xc51   :  { %v5893_v20 = vunpack.i.h.bf16 %v5891_v1  ;;  %v5892_v21 = vunpack.i.l.bf16 %v5891_v1  ;;  %v5383_v1 = vor.u32 %v5774_v0, %v5382_v18  ;;  %v5757_v18 = vld [vmem:[#allocation17 + $0x12c] sm:$0xf]  ;;  %v5328_v0 = vld [vmem:[#allocation17 + $0x138] sm:$0xf0] }
 0xc53   :  { %v2310_v25 = vsel %vm621_vm0, %v2171_v19, %v5892_v21  ;;  %v2311_v26 = vsel %vm621_vm0, %v2173_v24, %v5893_v20  ;;  %v5772_v19 = vld [vmem:[#allocation17 + $0x1a4] sm:$0xf]  ;;  %v5384_v20 = vld [vmem:[#allocation17 + $0x1b0] sm:$0xf0]  ;;  %v5390_v21 = vld [vmem:[#allocation17 + $0x1a8] sm:$0xf]  ;;  %2713 = vmatpush.bf16.msra.mxu1 %v5383_v1 }
 0xc54   :  { %v2313_v2 = vpack.c.bf16 %v2311_v26, %v2310_v25  ;;  %v5775_v24 = vld [vmem:[#allocation17 + $0x1b4] sm:$0xf0]  ;;  %v5387_v25 = vor.u32 %v5772_v19, %v5384_v20  ;;  %v5331_v19 = vor.u32 %v5757_v18, %v5328_v0  ;;  %v5302_v20 = vld [vmem:[#allocation17 + $0x100] sm:$0xf] }
 0xc55   :  { %v5391_v26 = vor.u32 %v5775_v24, %v5390_v21  ;;  %v5754_v21 = vld [vmem:[#allocation17 + $0x10c] sm:$0xf0] }
 0xc56   :  { %2397 = vmatmul.bf16.gmra.mxu0 %v2313_v2  ;;  %v5773_v2 = vld [vmem:[#allocation17 + $0x1ac] sm:$0xf]  ;;  %2732 = vmatpush.bf16.msra.mxu2 %v5387_v25  ;;  %v5303_v24 = vor.u32 %v5754_v21, %v5302_v20  ;;  %v5752_v25 = vld [vmem:[#allocation17 + $0x104] sm:$0xf] }
 0xc57   :  { %2751 = vmatpush.bf16.msra.mxu3 %v5391_v26  ;;  %v5304_v26 = vld [vmem:[#allocation17 + $0x110] sm:$0xf0]  ;;  %v6846_v20 = vld [vmem:[#allocation19 + $0x1e0] sm:$0xff] }
 0xcc3   :  { %v2393_v31 = vpop.f32.mrf.mxu0 }
 0xcc4   :  { %v2394_v32 = vadd.f32 %v5903_v27, %v2393_v31 }
 0xcc6   :  { %v2403_v33 = vadd.f32 %v2394_v32, %v6725_v47  ;;  %v5366_v32 = vld [vmem:[#allocation17 + $0x180] sm:$0xf] }
 0xcc8   :  { %2411 = vadd.xlane.f32.xlu1 %v2403_v33 }
 0xccb   :  { %v2395_v34 = vpop.f32.mrf.mxu0 }
 0xccc   :  { %v2396_v35 = vadd.f32 %v5903_v27, %v2395_v34  ;;  %v5768_v34 = vld [vmem:[#allocation17 + $0x184] sm:$0xf] }
 0xcce   :  { %v2404_v36 = vadd.f32 %v2396_v35, %v6727_v48 }
 0xcd0   :  { %2413 = vadd.xlane.f32.xlu0 %v2404_v36 }
 0xcd3   :  { %v2398_v37 = vpop.f32.mrf.mxu0 }
 0xcd4   :  { %v2399_v38 = vadd.f32 %v5903_v27, %v2398_v37  ;;  %v5374_v37 = vld [vmem:[#allocation17 + $0x188] sm:$0xf] }
 0xcd6   :  { %v2405_v28 = vadd.f32 %v2399_v38, %v6735_v10  ;;  %v5771_v38 = vld [vmem:[#allocation17 + $0x194] sm:$0xf0] }
 0xcd8   :  { %2415 = vadd.xlane.f32.xlu1 %v2405_v28 }
 0xcdb   :  { %v2400_v39 = vpop.f32.mrf.mxu0 }
 0xcdc   :  { %v2401_v40 = vadd.f32 %v5903_v27, %v2400_v39  ;;  %v5392_v27 = vld [vmem:[#allocation17 + $0x1b8] sm:$0xf0]  ;;  %v5375_v39 = vor.u32 %v5771_v38, %v5374_v37 }
 0xcdd   :  { %v5395_v31 = vor.u32 %v5773_v2, %v5392_v27  ;;  %v5310_v2 = vld [vmem:[#allocation17 + $0x108] sm:$0xf]  ;;  %v5307_v27 = vor.u32 %v5752_v25, %v5304_v26 }
 0xcde   :  { %v2406_v41 = vadd.f32 %v2401_v40, %v6737_v11  ;;  %v5769_v40 = vld [vmem:[#allocation17 + $0x18c] sm:$0xf]  ;;  %2752 = vmatpush.bf16.msra.mxu3 %v5375_v39 }
 0xcdf   :  { %2770 = vmatpush.bf16.msrb.mxu0 %v5395_v31  ;;  %v5755_v31 = vld [vmem:[#allocation17 + $0x114] sm:$0xf0] }
 0xce0   :  { %2417 = vadd.xlane.f32.xlu2 %v2406_v41 }
 0xd3b   :  { %v2412_v42 = vpop.xlane.xlu1 %2411 }
 0xd3c   :  { %v2419_v43 = vmul.f32 %v2412_v42, %v6634_v23 }
 0xd3e   :  { %v6801_v47 = vsub.f32 %v2403_v33, %v2419_v43  ;;  %v5770_v33 = vld [vmem:[#allocation17 + $0x18c] sm:$0xf0]  ;;  %v5350_v43 = vld [vmem:[#allocation17 + $0x160] sm:$0xf] }
 0xd3f   :  { %v5367_v35 = vor.u32 %v5770_v33, %v5366_v32  ;;  %v5753_v32 = vld [vmem:[#allocation17 + $0x10c] sm:$0xf]  ;;  %v5312_v33 = vld [vmem:[#allocation17 + $0x118] sm:$0xf0] }
 0xd40   :  { %v2427_v44 = vmul.f32 %v6801_v47, %v6801_v47 }
 0xd41   :  { %2714 = vmatpush.bf16.msra.mxu1 %v5367_v35  ;;  %v5315_v35 = vor.u32 %v5753_v32, %v5312_v33 }
 0xd42   :  { %2431 = vadd.xlane.f32.xlu1 %v2427_v44  ;;  %v5766_v44 = vld [vmem:[#allocation17 + $0x16c] sm:$0xf0] }
 0xd43   :  { %v2414_v48 = vpop.xlane.xlu0 %2413 }
 0xd44   :  { %v2420_v45 = vmul.f32 %v2414_v48, %v6634_v23  ;;  %v5764_v48 = vld [vmem:[#allocation17 + $0x164] sm:$0xf] }
 0xd46   :  { %v6806_v46 = vsub.f32 %v2404_v36, %v2420_v45  ;;  %v5368_v36 = vld [vmem:[#allocation17 + $0x190] sm:$0xf0]  ;;  %v5351_v45 = vor.u32 %v5766_v44, %v5350_v43 }
 0xd48   :  { %v2428_v10 = vmul.f32 %v6806_v46, %v6806_v46  ;;  %2715 = vmatpush.bf16.msra.mxu1 %v5351_v45 }
 0xd4a   :  { %2433 = vadd.xlane.f32.xlu2 %v2428_v10  ;;  %v5352_v10 = vld [vmem:[#allocation17 + $0x170] sm:$0xf0] }
 0xd4b   :  { %v2416_v11 = vpop.xlane.xlu1 %2415 }
 0xd4c   :  { %v2421_v16 = vmul.f32 %v2416_v11, %v6634_v23  ;;  %v5358_v11 = vld [vmem:[#allocation17 + $0x168] sm:$0xf]  ;;  %2716 = vmatpush.bf16.msra.mxu1 %v5335_v55  ;;  %v5807_v55 = vld [vmem:[#allocation19 + $0x1b8] sm:$0xff] }
 0xd4e   :  { %v6811_v14 = vsub.f32 %v2405_v28, %v2421_v16  ;;  %v5371_v28 = vor.u32 %v5768_v34, %v5368_v36  ;;  %v5767_v16 = vld [vmem:[#allocation17 + $0x174] sm:$0xf0]  ;;  %v5311_v34 = vor.u32 %v5755_v31, %v5310_v2 }
 0xd50   :  { %v2429_v49 = vmul.f32 %v6811_v14, %v6811_v14  ;;  %2733 = vmatpush.bf16.msra.mxu2 %v5371_v28  ;;  %2717 = vmatpush.bf16.msra.mxu1 %v5319_v7 }
 0xd52   :  { %2435 = vadd.xlane.f32.xlu1 %v2429_v49  ;;  %v5355_v49 = vor.u32 %v5764_v48, %v5352_v10 }
 0xd53   :  { %v2418_v56 = vpop.xlane.xlu2 %2417 }
 0xd54   :  { %v2422_v50 = vmul.f32 %v2418_v56, %v6634_v23  ;;  %v5359_v56 = vor.u32 %v5767_v16, %v5358_v11  ;;  %2734 = vmatpush.bf16.msra.mxu2 %v5355_v49  ;;  %2718 = vmatpush.bf16.msra.mxu1 %v5303_v24  ;;  %v5794_v49 = vld [vmem:[#allocation19 + $0x150] sm:$0xff] }
 0xd56   :  { %v6816_v51 = vsub.f32 %v2406_v41, %v2422_v50  ;;  %v5376_v41 = vld [vmem:[#allocation17 + $0x198] sm:$0xf0]  ;;  %v5765_v50 = vld [vmem:[#allocation17 + $0x16c] sm:$0xf]  ;;  %2753 = vmatpush.bf16.msra.mxu3 %v5359_v56 }
 0xd57   :  { %v5379_v42 = vor.u32 %v5769_v40, %v5376_v41 }
 0xd58   :  { %v2430_v59 = vmul.f32 %v6816_v51, %v6816_v51  ;;  %2735 = vmatpush.bf16.msra.mxu2 %v5339_v8 }
 0xd59   :  { %2771 = vmatpush.bf16.msrb.mxu0 %v5379_v42 }
 0xd5a   :  { %2437 = vadd.xlane.f32.xlu2 %v2430_v59  ;;  %v5360_v59 = vld [vmem:[#allocation17 + $0x178] sm:$0xf0]  ;;  %2754 = vmatpush.bf16.msra.mxu3 %v5343_v57 }
 0xd5b   :  { %v5363_v52 = vor.u32 %v5765_v50, %v5360_v59  ;;  %v5904_v57 = vld [vmem:[#allocation14 + $0x1] ss:$0 sm:$0xff] }
 0xd5c   :  { %2736 = vmatpush.bf16.msra.mxu2 %v5323_v29  ;;  %v5797_v29 = vld [vmem:[#allocation19 + $0x168] sm:$0xff] }
 0xd5d   :  { %2772 = vmatpush.bf16.msrb.mxu0 %v5363_v52  ;;  %v5791_v52 = vld [vmem:[#allocation19 + $0x138] sm:$0xff] }
 0xd5e   :  { %2755 = vmatpush.bf16.msra.mxu3 %v5327_v17  ;;  %3073 = vmatpush.bf16.msrb.mxu1 %v5791_v52  ;;  %v5805_v17 = vld [vmem:[#allocation19 + $0x1a8] sm:$0xff] }
 0xd5f   :  { %v5793_v52 = vld [vmem:[#allocation19 + $0x148] sm:$0xff] }
 0xd60   :  { %2737 = vmatpush.bf16.msra.mxu2 %v5307_v27 }
 0xd61   :  { %2773 = vmatpush.bf16.msrb.mxu0 %v5347_v30  ;;  %v5798_v30 = vld [vmem:[#allocation19 + $0x170] sm:$0xff] }
 0xd62   :  { %2756 = vmatpush.bf16.msra.mxu3 %v5311_v34  ;;  %3074 = vmatpush.bf16.msrb.mxu1 %v5790_v22 }
 0xd64   :  { %3092 = vmatpush.bf16.msrb.mxu2 %v5799_v54  ;;  %v5792_v54 = vld [vmem:[#allocation19 + $0x140] sm:$0xff] }
 0xd65   :  { %2774 = vmatpush.bf16.msrb.mxu0 %v5331_v19 }
 0xd66   :  { %3111 = vmatpush.bf16.msrb.mxu3 %v5807_v55  ;;  %3075 = vmatpush.bf16.msrb.mxu1 %v5789_v9  ;;  %v5800_v55 = vld [vmem:[#allocation19 + $0x180] sm:$0xff] }
 0xd68   :  { %3093 = vmatpush.bf16.msrb.mxu2 %v5798_v30 }
 0xd69   :  { %2775 = vmatpush.bf16.msrb.mxu0 %v5315_v35 }
 0xd6a   :  { %3112 = vmatpush.bf16.msrb.mxu3 %v5806_v63 }
 0xd6c   :  { %3094 = vmatpush.bf16.msrb.mxu2 %v5797_v29 }
 0xd6d   :  { %3130 = vmatpush.bf16.msra.mxu0 %v6832_v15 }
 0xd6e   :  { %3113 = vmatpush.bf16.msrb.mxu3 %v5805_v17 }
 0xd71   :  { %3131 = vmatpush.bf16.msra.mxu0 %v6836_v4 }
 0xd75   :  { %3132 = vmatpush.bf16.msra.mxu0 %v6842_v12 }
 0xd79   :  { %3133 = vmatpush.bf16.msra.mxu0 %v6846_v20 }
 0xdb5   :  { %v2432_v6 = vpop.xlane.xlu1 %2431 }
 0xdb6   :  { %v2439_v61 = vmul.f32 %v2432_v6, %v6634_v23 }
 0xdb8   :  { %v2443_v1 = vadd.f32 1e-05, %v2439_v61 }
 0xdba   :  { %5992 = vrsqrt.f32 %v2443_v1  ;;  %vm2453_vm1 = vweird.f32 %v2443_v1 }
 0xdbd   :  { %v2434_v36 = vpop.xlane.xlu2 %2433 }
 0xdbe   :  { %v2440_v37 = vmul.f32 %v2434_v36, %v6634_v23 }
 0xdc0   :  { %v5993_v38 = vpop.eup %5992  ;;  %v2444_v28 = vadd.f32 1e-05, %v2440_v37 }
 0xdc1   :  { %v2448_v39 = vmul.f32 %v5993_v38, %v2443_v1  ;;  %vm2454_vm0 = vweird.f32 %v5993_v38  ;;  %v5788_v1 = vld [vmem:[#allocation19 + $0x120] sm:$0xff] }
 0xdc2   :  { %5994 = vrsqrt.f32 %v2444_v28  ;;  %vm6826_vm13 = vmor %vm2453_vm1, %vm2454_vm0  ;;  %vm2463_vm15 = vweird.f32 %v2444_v28  ;;  %3076 = vmatpush.bf16.msrb.mxu1 %v5788_v1 }
 0xdc3   :  { %v2449_v40 = vmul.f32 %v5993_v38, %v2448_v39 }
 0xdc5   :  { %v2450_v41 = vmul.f32 0.5, %v2449_v40  ;;  %v2436_v42 = vpop.xlane.xlu1 %2435 }
 0xdc6   :  { %v2441_v43 = vmul.f32 %v2436_v42, %v6634_v23  ;;  %v5811_v42 = vld [vmem:[#allocation19 + $0x1d8] sm:$0xff] }
 0xdc7   :  { %v2451_v44 = vsub.f32 1.5, %v2450_v41  ;;  %3134 = vmatpush.bf16.msra.mxu0 %v5811_v42 }
 0xdc8   :  { %v5995_v48 = vpop.eup %5994  ;;  %v6823_v45 = vadd.f32 1e-05, %v2441_v43  ;;  %v5796_v43 = vld [vmem:[#allocation19 + $0x160] sm:$0xff] }
 0xdc9   :  { %v2452_v10 = vmul.f32 %v5993_v38, %v2451_v44  ;;  %v2458_v11 = vmul.f32 %v5995_v48, %v2444_v28  ;;  %vm2464_vm14 = vweird.f32 %v5995_v48  ;;  %v5804_v44 = vld [vmem:[#allocation19 + $0x1a0] sm:$0xff]  ;;  %3095 = vmatpush.bf16.msrb.mxu2 %v5796_v43 }
 0xdca   :  { %5996 = vrsqrt.f32 %v6823_v45  ;;  %vm2465_vm2 = vmor %vm2463_vm15, %vm2464_vm14  ;;  %vm2473_vm4 = vweird.f32 %v6823_v45  ;;  %3114 = vmatpush.bf16.msrb.mxu3 %v5804_v44 }
 0xdcb   :  { %v2459_v16 = vmul.f32 %v5995_v48, %v2458_v11  ;;  %v2456_v56 = vsel %vm6826_vm13, %v5993_v38, %v2452_v10  ;;  %v5803_v10 = vld [vmem:[#allocation19 + $0x198] sm:$0xff]  ;;  %v5785_v11 = vld [vmem:[#allocation19 + $0x108] sm:$0xff] }
 0xdcc   :  { %v2487_v60 = vmul.f32 %v2456_v56, %v6801_v47  ;;  %v5905_v47 = vld [vmem:[#allocation16 + $0x1] ss:$0 sm:$0xff]  ;;  %v5802_v56 = vld [vmem:[#allocation19 + $0x190] sm:$0xff] }
 0xdcd   :  { %v2460_v50 = vmul.f32 0.5, %v2459_v16  ;;  %v2438_v59 = vpop.xlane.xlu2 %2437  ;;  %v5809_v16 = vld [vmem:[#allocation19 + $0x1c8] sm:$0xff] }
 0xdce   :  { %v2442_v53 = vmul.f32 %v2438_v59, %v6634_v23  ;;  %v2494_v13 = vmul.f32 %v5904_v57, %v2487_v60  ;;  %3115 = vmatpush.bf16.msrb.mxu3 %v5803_v10  ;;  %v5808_v59 = vld [vmem:[#allocation19 + $0x1c0] sm:$0xff] }
 0xdcf   :  { %v2461_v58 = vsub.f32 1.5, %v2460_v50  ;;  %v5784_v50 = vld [vmem:[#allocation19 + $0x100] sm:$0xff] }
 0xdd0   :  { %v5997_v8 = vpop.eup %5996  ;;  %v2446_v62 = vadd.f32 1e-05, %v2442_v53  ;;  %v6848_v24 = vadd.f32 %v5905_v47, %v2494_v13  ;;  %v5801_v53 = vld [vmem:[#allocation19 + $0x188] sm:$0xff] }
 0xdd1   :  { %v2462_v3 = vmul.f32 %v5995_v48, %v2461_v58  ;;  %v2468_v5 = vmul.f32 %v5997_v8, %v6823_v45  ;;  %vm2474_vm3 = vweird.f32 %v5997_v8  ;;  %v5795_v45 = vld [vmem:[#allocation19 + $0x158] sm:$0xff]  ;;  %v5299_v58 = vld [vmem:[%s7603_s11 + $0x4] sm:$0xf] }
 0xdd2   :  { %5998 = vrsqrt.f32 %v2446_v62  ;;  %vm2475_vm5 = vmor %vm2473_vm4, %vm2474_vm3  ;;  %vm2483_vm7 = vweird.f32 %v2446_v62  ;;  %3096 = vmatpush.bf16.msrb.mxu2 %v5795_v45  ;;  %3116 = vmatpush.bf16.msrb.mxu3 %v5802_v56  ;;  %v6871_v60 = vperm.slane %v5299_v58, 3 }
 0xdd3   :  { %v2466_v6 = vsel %vm2465_vm2, %v5995_v48, %v2462_v3  ;;  %v2469_v7 = vmul.f32 %v5997_v8, %v2468_v5  ;;  %v5810_v48 = vld [vmem:[#allocation19 + $0x1d0] sm:$0xff]  ;;  %v2544_v3 = vperm.slane %v5299_v58, 1 }
 0xdd4   :  { %v2488_v61 = vmul.f32 %v2466_v6, %v6806_v46  ;;  %3135 = vmatpush.bf16.msra.mxu0 %v5810_v48 }
 0xdd5   :  { %v2470_v18 = vmul.f32 0.5, %v2469_v7  ;;  %v2545_v7 = vperm.slane %v5299_v58, 2 }
 0xdd6   :  { %v2495_v0 = vmul.f32 %v5904_v57, %v2488_v61  ;;  %3097 = vmatpush.bf16.msrb.mxu2 %v5794_v49  ;;  %3117 = vmatpush.bf16.msrb.mxu3 %v5801_v53 }
 0xdd7   :  { %v2471_v19 = vsub.f32 1.5, %v2470_v18 }
 0xdd8   :  { %v5999_v21 = vpop.eup %5998  ;;  %v6850_v25 = vadd.f32 %v5905_v47, %v2495_v0  ;;  %3136 = vmatpush.bf16.msra.mxu0 %v5809_v16 }
 0xdd9   :  { %v2472_v46 = vmul.f32 %v5997_v8, %v2471_v19  ;;  %v2478_v26 = vmul.f32 %v5999_v21, %v2446_v62  ;;  %vm2484_vm6 = vweird.f32 %v5999_v21 }
 0xdda   :  { %v2505_v2 = vpack.c.bf16 %v6850_v25, %v6848_v24  ;;  %vm2485_vm8 = vmor %vm2483_vm7, %vm2484_vm6  ;;  %3098 = vmatpush.bf16.msrb.mxu2 %v5793_v52  ;;  %3118 = vmatpush.bf16.msrb.mxu3 %v5800_v55 }
 0xddb   :  { %v2479_v27 = vmul.f32 %v5999_v21, %v2478_v26  ;;  %v2476_v31 = vsel %vm2475_vm5, %v5997_v8, %v2472_v46 }
 0xddc   :  { %2719 = vmatmul.bf16.vlgmr.msra.gmra.mxu1 %v2505_v2  ;;  %2738 = vmatmul.bf16.vlgmr.msra.gmra.mxu2 %v2505_v2  ;;  %v2489_v34 = vmul.f32 %v2476_v31, %v6811_v14  ;;  %v5787_v14 = vld [vmem:[#allocation19 + $0x118] sm:$0xff] }
 0xddd   :  { %v2480_v32 = vmul.f32 0.5, %v2479_v27  ;;  %2757 = vmatmul.bf16.vlgmr.msra.gmra.mxu3 %v2505_v2  ;;  %2776 = vmatmul.bf16.vlgmr.msrb.gmra.mxu0 %v2505_v2 }
 0xdde   :  { %v2496_v38 = vmul.f32 %v5904_v57, %v2489_v34  ;;  %3077 = vmatpush.bf16.msrb.mxu1 %v5787_v14  ;;  %3137 = vmatpush.bf16.msra.mxu0 %v5808_v59 }
 0xddf   :  { %v2481_v33 = vsub.f32 1.5, %v2480_v32  ;;  %3099 = vmatpush.bf16.msrb.mxu2 %v5792_v54 }
 0xde0   :  { %v6858_v39 = vadd.f32 %v5905_v47, %v2496_v38 }
 0xde1   :  { %v2482_v35 = vmul.f32 %v5999_v21, %v2481_v33 }
 0xde3   :  { %v2486_v36 = vsel %vm2485_vm8, %v5999_v21, %v2482_v35  ;;  %5824 = vmatpush.bf16.msra.mxu2 %v6832_v15 }
 0xde4   :  { %v2490_v37 = vmul.f32 %v2486_v36, %v6816_v51  ;;  %v5786_v51 = vld [vmem:[#allocation19 + $0x110] sm:$0xff] }
 0xde5   :  { %3078 = vmatpush.bf16.msrb.mxu1 %v5786_v51 }
 0xde6   :  { %v2497_v28 = vmul.f32 %v5904_v57, %v2490_v37  ;;  %v2543_v57 = vperm.slane %v5299_v58, 0 }
 0xde7   :  { %5825 = vmatpush.bf16.msra.mxu2 %v6836_v4 }
 0xde8   :  { %v6860_v40 = vadd.f32 %v5905_v47, %v2497_v28 }
 0xde9   :  { %3079 = vmatpush.bf16.msrb.mxu1 %v5785_v11 }
 0xdea   :  { %v2506_v41 = vpack.c.bf16 %v6860_v40, %v6858_v39 }
 0xdeb   :  { %5826 = vmatpush.bf16.msra.mxu2 %v6842_v12 }
 0xdec   :  { %2724 = vmatmul.bf16.gmra.mxu1 %v2506_v41  ;;  %2743 = vmatmul.bf16.gmra.mxu2 %v2506_v41 }
 0xded   :  { %2762 = vmatmul.bf16.gmra.mxu3 %v2506_v41  ;;  %2781 = vmatmul.bf16.gmra.mxu0 %v2506_v41 }
 0xdee   :  { %3080 = vmatpush.bf16.msrb.mxu1 %v5784_v50 }
 0xdef   :  { %5827 = vmatpush.bf16.msra.mxu2 %v6846_v20 }
 0xdf3   :  { %5828 = vmatpush.bf16.msra.mxu2 %v5811_v42 }
 0xdf7   :  { %5829 = vmatpush.bf16.msra.mxu2 %v5810_v48 }
 0xdfb   :  { %5830 = vmatpush.bf16.msra.mxu2 %v5809_v16 }
 0xdff   :  { %5831 = vmatpush.bf16.msra.mxu2 %v5808_v59 }
 0xe59   :  { %v2720_v22 = vpop.f32.mrf.mxu1 }
 0xe5a   :  { %v2777_v8 = vpop.f32.mrf.mxu0  ;;  %v2721_v30 = vadd.f32 %v2720_v22, %v2543_v57 }
 0xe5b   :  { %v2778_v15 = vadd.f32 %v2777_v8, %v6871_v60 }
 0xe5c   :  { %v2787_v12 = vmax.f32 %v2721_v30, 0.0 }
 0xe5d   :  { %v2790_v13 = vmax.f32 %v2778_v15, 0.0 }
 0xe5f   :  { %v2739_v62 = vpop.f32.mrf.mxu2 }
 0xe60   :  { %v2758_v63 = vpop.f32.mrf.mxu3  ;;  %v2740_v29 = vadd.f32 %v2739_v62, %v2544_v3 }
 0xe61   :  { %v2722_v4 = vpop.f32.mrf.mxu1  ;;  %v2759_v18 = vadd.f32 %v2758_v63, %v2545_v7 }
 0xe62   :  { %v2723_v5 = vadd.f32 %v2722_v4, %v2543_v57  ;;  %v2779_v6 = vpop.f32.mrf.mxu0  ;;  %v2788_v26 = vmax.f32 %v2740_v29, 0.0 }
 0xe63   :  { %v2780_v9 = vadd.f32 %v2779_v6, %v6871_v60  ;;  %v2789_v27 = vmax.f32 %v2759_v18, 0.0 }
 0xe64   :  { %v2791_v47 = vmax.f32 %v2723_v5, 0.0  ;;  %v5906_v5 = vld [vmem:[%s7605_s13 + $0x1] ss:$0 sm:$0xff] }
 0xe65   :  { %v2794_v61 = vmax.f32 %v2780_v9, 0.0 }
 0xe66   :  { %v2803_v17 = vpack.c.bf16 %v2791_v47, %v2787_v12 }
 0xe67   :  { %v2806_v0 = vpack.c.bf16 %v2794_v61, %v2790_v13  ;;  %v2741_v19 = vpop.f32.mrf.mxu2 }
 0xe68   :  { %v2742_v1 = vadd.f32 %v2741_v19, %v2544_v3  ;;  %v2760_v20 = vpop.f32.mrf.mxu3  ;;  %3081 = vmatmul.bf16.vlgmr.msrb.gmra.mxu1 %v2803_v17 }
 0xe69   :  { %v2761_v21 = vadd.f32 %v2760_v20, %v2545_v7  ;;  %3138 = vmatmul.bf16.vlgmr.msra.gmra.mxu0 %v2806_v0  ;;  %v2725_v46 = vpop.f32.mrf.mxu1 }
 0xe6a   :  { %v2792_v2 = vmax.f32 %v2742_v1, 0.0  ;;  %v2726_v35 = vadd.f32 %v2725_v46, %v2543_v57  ;;  %v2782_v43 = vpop.f32.mrf.mxu0 }
 0xe6b   :  { %v2793_v31 = vmax.f32 %v2761_v21, 0.0  ;;  %v2783_v54 = vadd.f32 %v2782_v43, %v6871_v60 }
 0xe6c   :  { %v2804_v32 = vpack.c.bf16 %v2792_v2, %v2788_v26  ;;  %v2795_v28 = vmax.f32 %v2726_v35, 0.0 }
 0xe6d   :  { %v2805_v33 = vpack.c.bf16 %v2793_v31, %v2789_v27  ;;  %v2798_v58 = vmax.f32 %v2783_v54, 0.0 }
 0xe6e   :  { %3100 = vmatmul.bf16.vlgmr.msrb.gmra.mxu2 %v2804_v32 }
 0xe6f   :  { %3119 = vmatmul.bf16.vlgmr.msrb.gmra.mxu3 %v2805_v33  ;;  %v2744_v34 = vpop.f32.mrf.mxu2 }
 0xe70   :  { %v2763_v36 = vpop.f32.mrf.mxu3  ;;  %v2745_v14 = vadd.f32 %v2744_v34, %v2544_v3 }
 0xe71   :  { %v2727_v37 = vpop.f32.mrf.mxu1  ;;  %v2764_v44 = vadd.f32 %v2763_v36, %v2545_v7 }
 0xe72   :  { %v2728_v38 = vadd.f32 %v2727_v37, %v2543_v57  ;;  %v2796_v11 = vmax.f32 %v2745_v14, 0.0  ;;  %v2784_v52 = vpop.f32.mrf.mxu0 }
 0xe73   :  { %v2797_v49 = vmax.f32 %v2764_v44, 0.0  ;;  %v2785_v53 = vadd.f32 %v2784_v52, %v6871_v60  ;;  %v5819_v52 = vld [vmem:[#allocation22 + $0x18] sm:$0xff] }
 0xe74   :  { %v2799_v41 = vmax.f32 %v2728_v38, 0.0 }
 0xe75   :  { %v2802_v55 = vmax.f32 %v2785_v53, 0.0  ;;  %v5818_v53 = vld [vmem:[#allocation22 + $0x10] sm:$0xff] }
 0xe76   :  { %v2807_v42 = vpack.c.bf16 %v2799_v41, %v2795_v28 }
 0xe77   :  { %v2746_v51 = vpop.f32.mrf.mxu2  ;;  %v2810_v22 = vpack.c.bf16 %v2802_v55, %v2798_v58  ;;  %v5817_v55 = vld [vmem:[#allocation22 + $0x8] sm:$0xff] }
 0xe78   :  { %v2747_v48 = vadd.f32 %v2746_v51, %v2544_v3  ;;  %v2765_v45 = vpop.f32.mrf.mxu3  ;;  %3086 = vmatmul.bf16.gmra.mxu1 %v2807_v42 }
 0xe79   :  { %v2766_v10 = vadd.f32 %v2765_v45, %v2545_v7 }
 0xe7a   :  { %v2800_v16 = vmax.f32 %v2747_v48, 0.0 }
 0xe7b   :  { %v2801_v56 = vmax.f32 %v2766_v10, 0.0 }
 0xe7c   :  { %v2808_v50 = vpack.c.bf16 %v2800_v16, %v2796_v11 }
 0xe7d   :  { %v2809_v59 = vpack.c.bf16 %v2801_v56, %v2797_v49  ;;  %v5823_v49 = vld [vmem:[#allocation22 + $0x38] sm:$0xff]  ;;  %v5822_v56 = vld [vmem:[#allocation22 + $0x30] sm:$0xff] }
 0xe7e   :  { %3105 = vmatmul.bf16.gmra.mxu2 %v2808_v50  ;;  %5832 = vmatpush.bf16.msra.mxu3 %v5823_v49  ;;  %v5821_v50 = vld [vmem:[#allocation22 + $0x28] sm:$0xff] }
 0xe7f   :  { %3124 = vmatmul.bf16.gmra.mxu3 %v2809_v59  ;;  %3321 = vmatpush.bf16.msra.mxu1 %v5823_v49  ;;  %v5820_v59 = vld [vmem:[#allocation22 + $0x20] sm:$0xff] }
 0xe82   :  { %5833 = vmatpush.bf16.msra.mxu3 %v5822_v56 }
 0xe83   :  { %3322 = vmatpush.bf16.msra.mxu1 %v5822_v56 }
 0xe86   :  { %5834 = vmatpush.bf16.msra.mxu3 %v5821_v50 }
 0xe87   :  { %3323 = vmatpush.bf16.msra.mxu1 %v5821_v50  ;;  %v6918_v50 = vld [vmem:[%s7609_s17] ss:$0 sm:$0xff]  ;;  %s6396_s17 = smov 127  }
 0xe8a   :  { %5835 = vmatpush.bf16.msra.mxu3 %v5820_v59 }
 0xe8b   :  { %3324 = vmatpush.bf16.msra.mxu1 %v5820_v59 }
 0xe8e   :  { %3143 = vmatmul.bf16.vlgmr.msra.gmra.mxu2 %v2810_v22  ;;  %5836 = vmatpush.bf16.msra.mxu3 %v5819_v52 }
 0xe8f   :  { %3325 = vmatpush.bf16.msra.mxu1 %v5819_v52 }
 0xe92   :  { %5837 = vmatpush.bf16.msra.mxu3 %v5818_v53 }
 0xe93   :  { %3326 = vmatpush.bf16.msra.mxu1 %v5818_v53 }
 0xe96   :  { %5838 = vmatpush.bf16.msra.mxu3 %v5817_v55 }
 0xe97   :  { %3327 = vmatpush.bf16.msra.mxu1 %v5817_v55 }
 0xee5   :  { %v3082_v8 = vpop.f32.mrf.mxu1 }
 0xee6   :  { %v3083_v12 = vadd.f32 %v5906_v5, %v3082_v8  ;;  %v3139_v20 = vpop.f32.mrf.mxu0  ;;  %v5816_v8 = vld [vmem:[#allocation22] sm:$0xff] }
 0xee7   :  { %5839 = vmatpush.bf16.msra.mxu3 %v5816_v8  ;;  %3328 = vmatpush.bf16.msra.mxu1 %v5816_v8 }
 0xeed   :  { %v3084_v63 = vpop.f32.mrf.mxu1 }
 0xeee   :  { %v3085_v21 = vadd.f32 %v5906_v5, %v3084_v63  ;;  %v3141_v36 = vpop.f32.mrf.mxu0 }
 0xef1   :  { %v3101_v57 = vpop.f32.mrf.mxu2 }
 0xef2   :  { %v3120_v62 = vpop.f32.mrf.mxu3  ;;  %v3102_v13 = vadd.f32 %v3101_v57, %v3083_v12 }
 0xef4   :  { %v3121_v0 = vadd.f32 %v3120_v62, %v3102_v13 }
 0xef5   :  { %v3087_v3 = vpop.f32.mrf.mxu1 }
 0xef6   :  { %v3088_v7 = vadd.f32 %v5906_v5, %v3087_v3  ;;  %v3140_v26 = vadd.f32 %v3139_v20, %v3121_v0 }
 0xef8   :  { %v3149_v35 = vadd.f32 %v3140_v26, %v6848_v24 }
 0xef9   :  { %v3103_v30 = vpop.f32.mrf.mxu2 }
 0xefa   :  { %v3122_v4 = vpop.f32.mrf.mxu3  ;;  %v3104_v2 = vadd.f32 %v3103_v30, %v3085_v21 }
 0xefc   :  { %v3123_v33 = vadd.f32 %v3122_v4, %v3104_v2 }
 0xefd   :  { %v3089_v47 = vpop.f32.mrf.mxu1 }
 0xefe   :  { %v3090_v17 = vadd.f32 %v5906_v5, %v3089_v47  ;;  %v3142_v37 = vadd.f32 %v3141_v36, %v3123_v33  ;;  %v5908_v36 = vld [vmem:[%s7607_s15 + $0x1] ss:$0 sm:$0xff] }
 0xf01   :  { %v3106_v15 = vpop.f32.mrf.mxu2 }
 0xf02   :  { %v3107_v9 = vadd.f32 %v3106_v15, %v3088_v7  ;;  %v3125_v60 = vpop.f32.mrf.mxu3 }
 0xf04   :  { %v3126_v61 = vadd.f32 %v3125_v60, %v3107_v9 }
 0xf09   :  { %v3108_v6 = vpop.f32.mrf.mxu2 }
 0xf0a   :  { %v3109_v19 = vadd.f32 %v3108_v6, %v3090_v17  ;;  %v3127_v46 = vpop.f32.mrf.mxu3 }
 0xf0c   :  { %v3128_v27 = vadd.f32 %v3127_v46, %v3109_v19 }
 0xf11   :  { %v3144_v29 = vpop.f32.mrf.mxu2 }
 0xf12   :  { %v3145_v18 = vadd.f32 %v3144_v29, %v3126_v61 }
 0xf14   :  { %v3151_v1 = vadd.f32 %v3145_v18, %v6858_v39  ;;  %v3150_v39 = vadd.f32 %v3142_v37, %v6850_v25 }
 0xf16   :  { %3161 = vadd.xlane.f32.xlu1 %v3151_v1 }
 0xf19   :  { %v3146_v31 = vpop.f32.mrf.mxu2 }
 0xf1a   :  { %v3147_v32 = vadd.f32 %v3146_v31, %v3128_v27 }
 0xf1c   :  { %v3152_v34 = vadd.f32 %v3147_v32, %v6860_v40 }
 0xf1e   :  { %3163 = vadd.xlane.f32.xlu2 %v3152_v34  ;;  %3157 = vadd.xlane.f32.xlu1 %v3149_v35 }
 0xf26   :  { %3159 = vadd.xlane.f32.xlu2 %v3150_v39 }
 0xf89   :  { %v3162_v38 = vpop.xlane.xlu1 %3161 }
 0xf8a   :  { %v3167_v28 = vmul.f32 %v3162_v38, %v6634_v23 }
 0xf8c   :  { %v6885_v41 = vsub.f32 %v3151_v1, %v3167_v28 }
 0xf8e   :  { %v3175_v14 = vmul.f32 %v6885_v41, %v6885_v41 }
 0xf90   :  { %3181 = vadd.xlane.f32.xlu1 %v3175_v14 }
 0xf91   :  { %v3164_v42 = vpop.xlane.xlu2 %3163  ;;  %v3158_v40 = vpop.xlane.xlu1 %3157 }
 0xf92   :  { %v3168_v24 = vmul.f32 %v3164_v42, %v6634_v23  ;;  %v3165_v43 = vmul.f32 %v3158_v40, %v6634_v23 }
 0xf94   :  { %v6891_v44 = vsub.f32 %v3152_v34, %v3168_v24  ;;  %v6893_v51 = vsub.f32 %v3149_v35, %v3165_v43 }
 0xf96   :  { %v3176_v25 = vmul.f32 %v6891_v44, %v6891_v44  ;;  %v3173_v48 = vmul.f32 %v6893_v51, %v6893_v51 }
 0xf98   :  { %3183 = vadd.xlane.f32.xlu0 %v3176_v25  ;;  %3177 = vadd.xlane.f32.xlu2 %v3173_v48 }
 0xf99   :  { %v3160_v45 = vpop.xlane.xlu2 %3159 }
 0xf9a   :  { %v3166_v10 = vmul.f32 %v3160_v45, %v6634_v23 }
 0xf9c   :  { %v6900_v11 = vsub.f32 %v3150_v39, %v3166_v10 }
 0xf9e   :  { %v3174_v16 = vmul.f32 %v6900_v11, %v6900_v11 }
 0xfa0   :  { %3179 = vadd.xlane.f32.xlu1 %v3174_v16 }
0x1003   :  { %v3182_v54 = vpop.xlane.xlu1 %3181 }
0x1004   :  { %v3187_v58 = vmul.f32 %v3182_v54, %v6634_v23 }
0x1006   :  { %v3191_v22 = vadd.f32 1e-05, %v3187_v58 }
0x1008   :  { %6000 = vrsqrt.f32 %v3191_v22  ;;  %vm3219_vm10 = vweird.f32 %v3191_v22 }
0x100b   :  { %v3184_v57 = vpop.xlane.xlu0 %3183  ;;  %v3178_v62 = vpop.xlane.xlu2 %3177 }
0x100c   :  { %v3188_v30 = vmul.f32 %v3184_v57, %v6634_v23  ;;  %v3185_v63 = vmul.f32 %v3178_v62, %v6634_v23 }
0x100e   :  { %v6001_v15 = vpop.eup %6000  ;;  %v3192_v4 = vadd.f32 1e-05, %v3188_v30  ;;  %v3189_v3 = vadd.f32 1e-05, %v3185_v63 }
0x100f   :  { %v3214_v5 = vmul.f32 %v6001_v15, %v3191_v22  ;;  %vm3220_vm9 = vweird.f32 %v6001_v15 }
0x1010   :  { %6002 = vrsqrt.f32 %v3192_v4  ;;  %vm3221_vm11 = vmor %vm3219_vm10, %vm3220_vm9  ;;  %vm3229_vm0 = vweird.f32 %v3192_v4  ;;  %vm3199_vm14 = vweird.f32 %v3189_v3 }
0x1011   :  { %v3215_v6 = vmul.f32 %v6001_v15, %v3214_v5  ;;  %6004 = vrsqrt.f32 %v3189_v3 }
0x1013   :  { %v3216_v7 = vmul.f32 0.5, %v3215_v6  ;;  %v3180_v9 = vpop.xlane.xlu1 %3179 }
0x1014   :  { %v3186_v60 = vmul.f32 %v3180_v9, %v6634_v23  ;;  %v5907_v23 = vld [vmem:[#allocation20 + $0x1] ss:$0 sm:$0xff] }
0x1015   :  { %v3217_v12 = vsub.f32 1.5, %v3216_v7  ;;  %v6389_v7 = vmov 1326507024  }
0x1016   :  { %v6003_v47 = vpop.eup %6002  ;;  %v3190_v13 = vadd.f32 1e-05, %v3186_v60 }
0x1017   :  { %v6005_v61 = vpop.eup %6004  ;;  %v3218_v29 = vmul.f32 %v6001_v15, %v3217_v12  ;;  %v3224_v17 = vmul.f32 %v6003_v47, %v3192_v4  ;;  %vm3230_vm12 = vweird.f32 %v6003_v47  ;;  %v6390_v12 = vmov 2102212464  }
0x1018   :  { %v3194_v18 = vmul.f32 %v6005_v61, %v3189_v3  ;;  %6006 = vrsqrt.f32 %v3190_v13  ;;  %vm3200_vm1 = vweird.f32 %v6005_v61  ;;  %vm3231_vm13 = vmor %vm3229_vm0, %vm3230_vm12  ;;  %vm3209_vm3 = vweird.f32 %v3190_v13 }
0x1019   :  { %v3225_v0 = vmul.f32 %v6003_v47, %v3224_v17  ;;  %v3222_v1 = vsel %vm3221_vm11, %v6001_v15, %v3218_v29  ;;  %vm3201_vm15 = vmor %vm3199_vm14, %vm3200_vm1 }
0x101a   :  { %v3195_v19 = vmul.f32 %v6005_v61, %v3194_v18  ;;  %v3235_v2 = vmul.f32 %v3222_v1, %v6885_v41  ;;  %v6392_v18 = vmov 2131351028  }
0x101b   :  { %v3226_v20 = vmul.f32 0.5, %v3225_v0 }
0x101c   :  { %v3196_v21 = vmul.f32 0.5, %v3195_v19  ;;  %v3242_v37 = vmul.f32 %v5907_v23, %v3235_v2 }
0x101d   :  { %v3227_v46 = vsub.f32 1.5, %v3226_v20 }
0x101e   :  { %v6007_v26 = vpop.eup %6006  ;;  %v3197_v27 = vsub.f32 1.5, %v3196_v21  ;;  %v3249_v42 = vadd.f32 %v5908_v36, %v3242_v37  ;;  %v6393_v21 = vmov 2475754826  }
0x101f   :  { %v3228_v31 = vmul.f32 %v6003_v47, %v3227_v46  ;;  %v3204_v32 = vmul.f32 %v6007_v26, %v3190_v13  ;;  %vm3210_vm2 = vweird.f32 %v6007_v26 }
0x1020   :  { %v3198_v33 = vmul.f32 %v6005_v61, %v3197_v27  ;;  %vm3211_vm4 = vmor %vm3209_vm3, %vm3210_vm2 }
0x1021   :  { %v3232_v34 = vsel %vm3231_vm13, %v6003_v47, %v3228_v31  ;;  %v3205_v35 = vmul.f32 %v6007_v26, %v3204_v32 }
0x1022   :  { %v3236_v39 = vmul.f32 %v3232_v34, %v6891_v44  ;;  %v3202_v38 = vsel %vm3201_vm15, %v6005_v61, %v3198_v33  ;;  %v6391_v61 = vmov 920167782   ;;  %v6394_v34 = vmov 683565275  }
0x1023   :  { %v3206_v28 = vmul.f32 0.5, %v3205_v35  ;;  %v3233_v24 = vmul.f32 %v3202_v38, %v6893_v51 }
0x1024   :  { %v3243_v41 = vmul.f32 %v5907_v23, %v3236_v39 }
0x1025   :  { %v3207_v14 = vsub.f32 1.5, %v3206_v28  ;;  %v3240_v45 = vmul.f32 %v5907_v23, %v3233_v24 }
0x1026   :  { %v3250_v40 = vadd.f32 %v5908_v36, %v3243_v41 }
0x1027   :  { %v3208_v43 = vmul.f32 %v6007_v26, %v3207_v14  ;;  %v3247_v16 = vadd.f32 %v5908_v36, %v3240_v45 }
0x1028   :  { %v3252_v25 = vpack.c.bf16 %v3250_v40, %v3249_v42 }
0x1029   :  { %v3212_v48 = vsel %vm3211_vm4, %v6007_v26, %v3208_v43 }
0x102a   :  { %v3234_v10 = vmul.f32 %v3212_v48, %v6900_v11  ;;  %3334 = vmatmul.bf16.vlgmr.msra.gmra.mxu3 %v3252_v25 }
0x102c   :  { %v3241_v44 = vmul.f32 %v5907_v23, %v3234_v10 }
0x102e   :  { %v3248_v49 = vadd.f32 %v5908_v36, %v3241_v44 }
0x1030   :  { %v3251_v56 = vpack.c.bf16 %v3248_v49, %v3247_v16 }
0x1032   :  { %3329 = vmatmul.bf16.vlgmr.msra.gmra.mxu1 %v3251_v56 }
0x10ad   :  { %v3335_v51 = vpop.f32.mrf.mxu3 }
0x10ae   :  { %v6921_v59 = vadd.f32 %v6918_v50, %v3335_v51 }
0x10af   :  { %v3330_v52 = vpop.f32.mrf.mxu1 }
0x10b0   :  { %v3651_v53 = vand.u32 2139095040, %v6921_v59  ;;  %v6925_v11 = vadd.f32 %v6918_v50, %v3330_v52  ;;  %v7614_v57 = vand.u32 2147483647, %v6921_v59 }
0x10b2   :  { %7633 = vst [vmem:[#allocation32_spill] sm:$0xff] %v6925_v11  ;;  %v3652_v54 = vshrl.u32 %v3651_v53, 23  ;;  %v3343_v55 = vand.u32 2139095040, %v6925_v11  ;;  %v3655_v15 = vand.u32 8388607, %v7614_v57 }
0x10b3   :  { %v7613_v3 = vand.u32 2147483647, %v6925_v11 }
0x10b4   :  { %v5596_v58 = vadd.s32 4294967169, %v3652_v54  ;;  %v3344_v22 = vshrl.u32 %v3343_v55, 23  ;;  %v3656_v6 = vor.u32 8388608, %v3655_v15 }
0x10b5   :  { %v3347_v60 = vand.u32 8388607, %v7613_v3  ;;  %v3337_v17 = vpop.f32.mrf.mxu3 }
0x10b6   :  { %v3658_v8 = vadd.s32 1, %v5596_v58  ;;  %v5590_v62 = vadd.s32 4294967169, %v3344_v22  ;;  %v6941_v23 = vshll.u32 %v3656_v6, 8  ;;  %v6946_v33 = vadd.f32 %v6918_v50, %v3337_v17 }
0x10b7   :  { %v3348_v2 = vor.u32 8388608, %v3347_v60  ;;  %v3332_v48 = vpop.f32.mrf.mxu1 }
0x10b8   :  { %vm3659_vm5 = vcmp.gt.s32.totalorder %v3658_v8, 0  ;;  %v3350_v5 = vadd.s32 1, %v5590_v62  ;;  %7634 = vst [vmem:[#allocation33_spill] sm:$0xff] %v6946_v33  ;;  %v6952_v42 = vand.u32 65535, %v6941_v23  ;;  %v7612_v40 = vand.u32 2147483647, %v6946_v33 }
0x10b9   :  { %v3660_v30 = vsel %vm3659_vm5, %v3658_v8, 0  ;;  %v6949_v41 = vshll.u32 %v3348_v2, 8  ;;  %v3805_v24 = vand.u32 2139095040, %v6946_v33  ;;  %v6958_v16 = vshrl.u32 %v6941_v23, 16 }
0x10ba   :  { %v3662_v63 = vand.u32 31, %v3660_v30  ;;  %vm3351_vm6 = vcmp.gt.s32.totalorder %v3350_v5, 0  ;;  %v3661_v13 = vshrl.u32 %v3660_v30, 5  ;;  %v6968_v54 = vand.u32 8388607, %v7612_v40 }
0x10bb   :  { %v3352_v20 = vsel %vm3351_vm6, %v3350_v5, 0  ;;  %v6961_v51 = vand.u32 65535, %v6949_v41  ;;  %v6964_v52 = vshrl.u32 %v6949_v41, 16  ;;  %v6971_v55 = vadd.f32 %v6918_v50, %v3332_v48 }
0x10bc   :  { %v3663_v4 = vsub.s32 32, %v3662_v63  ;;  %v3677_v29 = vshll.u32 %v6391_v61, %v3662_v63  ;;  %v3671_v19 = vshll.u32 %v6392_v18, %v3662_v63  ;;  %v3668_v27 = vshll.u32 %v6393_v21, %v3662_v63 }
0x10bd   :  { %v3674_v32 = vshll.u32 %v6390_v12, %v3662_v63  ;;  %v3665_v35 = vshll.u32 %v6394_v34, %v3662_v63  ;;  %v3354_v36 = vand.u32 31, %v3352_v20  ;;  %vm3683_vm7 = vcmp.lt.s32.totalorder %v3661_v13, 4  ;;  %7635 = vst [vmem:[#allocation34_spill] sm:$0xff] %v6971_v55 }
0x10be   :  { %v3678_v9 = vshrl.u32 %v6389_v7, %v3663_v4  ;;  %v3672_v47 = vshrl.u32 %v6390_v12, %v3663_v4  ;;  %v3669_v0 = vshrl.u32 %v6392_v18, %v3663_v4  ;;  %v3675_v1 = vshrl.u32 %v6391_v61, %v3663_v4 }
0x10bf   :  { %v3666_v46 = vshrl.u32 %v6393_v21, %v3663_v4  ;;  %v3664_v43 = vshrl.u32 %v6394_v34, %v3663_v4  ;;  %vm3680_vm8 = vcmp.lt.s32.totalorder %v3661_v13, 1  ;;  %vm3682_vm9 = vcmp.lt.s32.totalorder %v3661_v13, 3 }
0x10c0   :  { %v3679_v26 = vor.u32 %v3678_v9, %v3677_v29  ;;  %v3673_v31 = vor.u32 %v3672_v47, %v3671_v19  ;;  %v3670_v37 = vor.u32 %v3669_v0, %v3668_v27  ;;  %v3676_v39 = vor.u32 %v3675_v1, %v3674_v32 }
0x10c1   :  { %v3667_v38 = vor.u32 %v3666_v46, %v3665_v35  ;;  %v3355_v25 = vsub.s32 32, %v3354_v36  ;;  %vm3681_vm10 = vcmp.lt.s32.totalorder %v3661_v13, 2  ;;  %v3806_v62 = vshrl.u32 %v3805_v24, 23 }
0x10c2   :  { %v3693_v28 = vsel %vm3683_vm7, %v3679_v26, 1326507024  ;;  %v3685_v14 = vsel %vm3683_vm7, %v3673_v31, 2102212464  ;;  %v3689_v45 = vsel %vm3683_vm7, %v3676_v39, 920167782  ;;  %v3692_v10 = vsel %vm3680_vm8, %v3670_v37, %v3673_v31 }
0x10c3   :  { %v3694_v44 = vsel %vm3682_vm9, %v3676_v39, %v3693_v28  ;;  %v3684_v49 = vsel %vm3680_vm8, %v3664_v43, %v3667_v38  ;;  %v3686_v56 = vsel %vm3682_vm9, %v3670_v37, %v3685_v14  ;;  %v3688_v53 = vsel %vm3680_vm8, %v3667_v38, %v3670_v37 }
0x10c4   :  { %v3690_v58 = vsel %vm3682_vm9, %v3673_v31, %v3689_v45  ;;  %v6974_v22 = vsel %vm3681_vm10, %v3692_v10, %v3694_v44  ;;  %v3370_v8 = vshrl.u32 %v6389_v7, %v3355_v25  ;;  %v6978_v30 = vsel %vm3681_vm10, %v3684_v49, %v3686_v56 }
0x10c5   :  { %v6980_v63 = vshrl.u32 %v3352_v20, 5  ;;  %v3358_v15 = vshrl.u32 %v6393_v21, %v3355_v25  ;;  %v3361_v4 = vshrl.u32 %v6392_v18, %v3355_v25  ;;  %v3364_v5 = vshrl.u32 %v6390_v12, %v3355_v25 }
0x10c6   :  { %v3367_v50 = vshrl.u32 %v6391_v61, %v3355_v25  ;;  %v3369_v6 = vshll.u32 %v6391_v61, %v3354_v36  ;;  %v5599_v9 = vadd.s32 4294967169, %v3806_v62  ;;  %v6988_v60 = vsel %vm3681_vm10, %v3688_v53, %v3690_v58 }
0x10c7   :  { %v3700_v47 = vshrl.u32 %v6974_v22, 16  ;;  %v3357_v29 = vshll.u32 %v6394_v34, %v3354_v36  ;;  %v3360_v17 = vshll.u32 %v6393_v21, %v3354_v36  ;;  %v3363_v0 = vshll.u32 %v6392_v18, %v3354_v36 }
0x10c8   :  { %v3366_v19 = vshll.u32 %v6390_v12, %v3354_v36  ;;  %v3371_v1 = vor.u32 %v3370_v8, %v3369_v6  ;;  %v3812_v20 = vadd.s32 1, %v5599_v9  ;;  %v3699_v46 = vand.u32 65535, %v6974_v22 }
0x10c9   :  { %v3356_v13 = vshrl.u32 %v6394_v34, %v3355_v25  ;;  %v3359_v2 = vor.u32 %v3358_v15, %v3357_v29  ;;  %v3362_v27 = vor.u32 %v3361_v4, %v3360_v17  ;;  %v3365_v31 = vor.u32 %v3364_v5, %v3363_v0 }
0x10ca   :  { %v3368_v32 = vor.u32 %v3367_v50, %v3366_v19  ;;  %vm3813_vm11 = vcmp.gt.s32.totalorder %v3812_v20, 0  ;;  %v3721_v35 = vand.u32 65535, %v6988_v60  ;;  %vm3375_vm12 = vcmp.lt.s32.totalorder %v6980_v63, 4 }
0x10cb   :  { %v3814_v37 = vsel %vm3813_vm11, %v3812_v20, 0  ;;  %v3497_v36 = vand.u32 2139095040, %v6971_v55  ;;  %v7005_v39 = vmul.u32 %v3700_v47, %v6952_v42  ;;  %v3722_v38 = vshrl.u32 %v6988_v60, 16 }
0x10cc   :  { %v3385_v28 = vsel %vm3375_vm12, %v3371_v1, 1326507024  ;;  %v3816_v14 = vand.u32 31, %v3814_v37  ;;  %vm3372_vm0 = vcmp.lt.s32.totalorder %v6980_v63, 1  ;;  %vm3373_vm1 = vcmp.lt.s32.totalorder %v6980_v63, 2 }
0x10cd   :  { %vm3374_vm13 = vcmp.lt.s32.totalorder %v6980_v63, 3  ;;  %v3377_v24 = vsel %vm3375_vm12, %v3365_v31, 2102212464  ;;  %v3380_v43 = vsel %vm3372_vm0, %v3359_v2, %v3362_v27  ;;  %v3381_v25 = vsel %vm3375_vm12, %v3368_v32, 920167782 }
0x10ce   :  { %v7013_v48 = vsub.s32 32, %v3816_v14  ;;  %v7617_v45 = vmov 0   ;;  %v3384_v10 = vsel %vm3372_vm0, %v3362_v27, %v3365_v31  ;;  %v3386_v44 = vsel %vm3374_vm13, %v3368_v32, %v3385_v28 }
0x10cf   :  { %5894 = vset.pattern.permute.xlu0 %v7617_v45  ;;  %5895 = vset.pattern.permute.xlu2 %v7617_v45  ;;  %v7021_v49 = vshrl.u32 %v3814_v37, 5  ;;  %v3498_v56 = vshrl.u32 %v3497_v36, 23  ;;  %v3822_v53 = vshll.u32 %v6393_v21, %v3816_v14  ;;  %v3825_v8 = vshll.u32 %v6392_v18, %v3816_v14 }
0x10d0   :  { %5896 = vset.pattern.permute.xlu1 %v7617_v45  ;;  %v3823_v58 = vshrl.u32 %v6392_v18, %v7013_v48  ;;  %v3826_v62 = vshrl.u32 %v6390_v12, %v7013_v48  ;;  %v3828_v15 = vshll.u32 %v6390_v12, %v3816_v14  ;;  %v3829_v4 = vshrl.u32 %v6391_v61, %v7013_v48 }
0x10d1   :  { %v3831_v5 = vshll.u32 %v6391_v61, %v3816_v14  ;;  %v3832_v50 = vshrl.u32 %v6389_v7, %v7013_v48  ;;  %v3382_v6 = vsel %vm3374_vm13, %v3365_v31, %v3381_v25  ;;  %v7040_v9 = vsel %vm3373_vm1, %v3384_v10, %v3386_v44 }
0x10d2   :  { %v7042_v29 = vor.u32 %v3823_v58, %v3822_v53  ;;  %v3827_v17 = vor.u32 %v3826_v62, %v3825_v8  ;;  %v3820_v0 = vshrl.u32 %v6393_v21, %v7013_v48  ;;  %v3830_v19 = vor.u32 %v3829_v4, %v3828_v15 }
0x10d3   :  { %v3833_v1 = vor.u32 %v3832_v50, %v3831_v5  ;;  %v5593_v20 = vadd.s32 4294967169, %v3498_v56  ;;  %v3810_v32 = vor.u32 8388608, %v6968_v54  ;;  %vm3834_vm14 = vcmp.lt.s32.totalorder %v7021_v49, 1 }
0x10d4   :  { %vm3837_vm15 = vcmp.lt.s32.totalorder %v7021_v49, 4  ;;  %v7611_v31 = vand.u32 2147483647, %v6971_v55  ;;  %v3819_v37 = vshll.u32 %v6394_v34, %v3816_v14  ;;  %vm3836_vm2 = vcmp.lt.s32.totalorder %v7021_v49, 3 }
0x10d5   :  { %v3846_v36 = vsel %vm3834_vm14, %v7042_v29, %v3827_v17  ;;  %v3847_v28 = vsel %vm3837_vm15, %v3833_v1, 1326507024  ;;  %v3376_v54 = vsel %vm3372_vm0, %v3356_v13, %v3359_v2  ;;  %v3392_v25 = vshrl.u32 %v7040_v9, 16 }
0x10d6   :  { %v3848_v10 = vsel %vm3836_vm2, %v3830_v19, %v3847_v28  ;;  %v3504_v44 = vadd.s32 1, %v5593_v20  ;;  %v3378_v14 = vsel %vm3374_vm13, %v3362_v27, %v3377_v24  ;;  %v7066_v56 = vsel %vm3373_vm1, %v3380_v43, %v3382_v6 }
0x10d7   :  { %v3821_v53 = vor.u32 %v3820_v0, %v3819_v37  ;;  %vm3835_vm3 = vcmp.lt.s32.totalorder %v7021_v49, 2  ;;  %v3701_v13 = vmul.u32 %v3699_v46, %v6952_v42  ;;  %v3843_v2 = vsel %vm3837_vm15, %v3830_v19, 920167782 }
0x10d8   :  { %v7076_v58 = vsel %vm3835_vm3, %v3846_v36, %v3848_v10  ;;  %v3501_v27 = vand.u32 8388607, %v7611_v31  ;;  %v3704_v24 = vmul.u32 %v3700_v47, %v6958_v16  ;;  %v3705_v43 = vshll.u32 %v7005_v39, 16 }
0x10d9   :  { %v7084_v8 = vshll.u32 %v3810_v32, 8  ;;  %vm3505_vm4 = vcmp.gt.s32.totalorder %v3504_v44, 0  ;;  %v7088_v62 = vsel %vm3373_vm1, %v3376_v54, %v3378_v14  ;;  %v7091_v15 = vmul.u32 %v3392_v25, %v6961_v51 }
0x10da   :  { %v3414_v4 = vshrl.u32 %v7066_v56, 16  ;;  %v7097_v5 = vmul.u32 %v3699_v46, %v6958_v16  ;;  %v3842_v47 = vsel %vm3834_vm14, %v3821_v53, %v7042_v29  ;;  %v3844_v50 = vsel %vm3836_vm2, %v3827_v17, %v3843_v2 }
0x10db   :  { %v3854_v63 = vshrl.u32 %v7076_v58, 16  ;;  %v3506_v6 = vsel %vm3505_vm4, %v3504_v44, 0  ;;  %v7108_v0 = vmul.u32 %v3722_v38, %v6952_v42  ;;  %v7113_v22 = vmul.u32 %v3722_v38, %v6958_v16 }
0x10dc   :  { %v7616_v46 = vand.u32 65535, %v7040_v9  ;;  %v3502_v19 = vor.u32 8388608, %v3501_v27  ;;  %vm3709_vm5 = vc.u32 %v3701_v13, %v3705_v43  ;;  %v3711_v1 = vadd.s32 %v3705_v43, %v3701_v13 }
0x10dd   :  { %v7118_v32 = vand.u32 65535, %v7084_v8  ;;  %v3397_v37 = vshll.u32 %v7091_v15, 16  ;;  %v7125_v28 = vsel %vm3835_vm3, %v3842_v47, %v3844_v50  ;;  %v3508_v38 = vand.u32 31, %v3506_v6 }
0x10de   :  { %v7128_v54 = vmul.u32 %v3414_v4, %v6961_v51  ;;  %v7131_v10 = vmul.u32 %v3414_v4, %v6964_v52  ;;  %v3707_v14 = vshll.u32 %v7097_v5, 16  ;;  %v3393_v13 = vmul.u32 %v7616_v46, %v6961_v51 }
0x10df   :  { %v7134_v44 = vmul.u32 %v3854_v63, %v7118_v32  ;;  %v3839_v2 = vsel %vm3837_vm15, %v3827_v17, 2102212464  ;;  %v7142_v27 = vshll.u32 %v3502_v19, 8  ;;  %v3710_v43 = vsel %vm3709_vm5, 1, %v7617_v45 }
0x10e0   :  { %v3818_v4 = vshrl.u32 %v6394_v34, %v7013_v48  ;;  %v7615_v47 = vand.u32 65535, %v7076_v58  ;;  %v3876_v50 = vshrl.u32 %v7125_v28, 16  ;;  %vm3713_vm6 = vc.u32 %v3711_v1, %v3707_v14 }
0x10e1   :  { %v7150_v31 = vmul.u32 %v3392_v25, %v6964_v52  ;;  %v3403_v40 = vadd.s32 %v3397_v37, %v3393_v13  ;;  %v7153_v3 = vshrl.u32 %v7084_v8, 16  ;;  %v3509_v17 = vsub.s32 32, %v3508_v38 }
0x10e2   :  { %v7157_v19 = vsel %vm3834_vm14, %v3818_v4, %v3821_v53  ;;  %v7162_v48 = vsel %vm3836_vm2, %v7042_v29, %v3839_v2  ;;  %v3859_v57 = vshll.u32 %v7134_v44, 16  ;;  %v3712_v1 = vadd.s32 %v3710_v43, %v3704_v24 }
0x10e3   :  { %v7167_v14 = vand.u32 65535, %v7142_v27  ;;  %v3706_v36 = vshrl.u32 %v7005_v39, 16  ;;  %v3714_v26 = vsel %vm3713_vm6, 1, %v7617_v45  ;;  %vm7171_vm7 = vc.u32 %v3393_v13, %v3397_v37 }
0x10e4   :  { %v3855_v29 = vmul.u32 %v7615_v47, %v7118_v32  ;;  %v7179_v2 = vmul.u32 %v3854_v63, %v7153_v3  ;;  %v7182_v24 = vmul.u32 %v3876_v50, %v7118_v32  ;;  %v7185_v43 = vmul.u32 %v3876_v50, %v7153_v3 }
0x10e5   :  { %v7187_v39 = vshrl.u32 %v3506_v6, 5  ;;  %v3512_v37 = vshrl.u32 %v6393_v21, %v3509_v17  ;;  %v3708_v13 = vshrl.u32 %v7097_v5, 16  ;;  %v3723_v4 = vmul.u32 %v3721_v35, %v6952_v42 }
0x10e6   :  { %v7194_v25 = vadd.s32 %v3859_v57, %v3855_v29  ;;  %v3716_v63 = vadd.s32 %v3714_v26, %v3712_v1  ;;  %v3725_v47 = vmul.u32 %v3721_v35, %v6958_v16  ;;  %v3727_v50 = vshll.u32 %v7108_v0, 16 }
0x10e7   :  { %v3511_v6 = vshll.u32 %v6394_v34, %v3508_v38  ;;  %v3514_v20 = vshll.u32 %v6393_v21, %v3508_v38  ;;  %v3515_v46 = vshrl.u32 %v6392_v18, %v3509_v17  ;;  %v3518_v5 = vshrl.u32 %v6390_v12, %v3509_v17 }
0x10e8   :  { %v3517_v45 = vshll.u32 %v6392_v18, %v3508_v38  ;;  %v3520_v42 = vshll.u32 %v6390_v12, %v3508_v38  ;;  %v3521_v26 = vshrl.u32 %v6391_v61, %v3509_v17  ;;  %v3524_v1 = vshrl.u32 %v6389_v7, %v3509_v17 }
0x10e9   :  { %v3510_v16 = vshrl.u32 %v6394_v34, %v3509_v17  ;;  %v7209_v60 = vor.u32 %v3512_v37, %v3511_v6  ;;  %v3523_v35 = vshll.u32 %v6391_v61, %v3508_v38  ;;  %vm3526_vm8 = vcmp.lt.s32.totalorder %v7187_v39, 1 }
0x10ea   :  { %v3717_v21 = vadd.s32 %v3716_v63, %v3706_v36  ;;  %v3729_v55 = vshll.u32 %v3725_v47, 16  ;;  %vm3731_vm9 = vc.u32 %v3723_v4, %v3727_v50  ;;  %v3733_v33 = vadd.s32 %v3727_v50, %v3723_v4 }
0x10eb   :  { %vm7213_vm10 = vc.u32 %v3855_v29, %v3859_v57  ;;  %v7217_v12 = vor.u32 %v3515_v46, %v3514_v20  ;;  %v7219_v11 = vor.u32 %v3518_v5, %v3517_v45  ;;  %v7640_v7 = vmov 0  }
0x10ec   :  { %v3732_v34 = vsel %vm3731_vm9, 1, %v7640_v7  ;;  %v7641_v17 = vand.u32 65535, %v7040_v9  ;;  %v3522_v38 = vor.u32 %v3521_v26, %v3520_v42  ;;  %v3525_v37 = vor.u32 %v3524_v1, %v3523_v35 }
0x10ed   :  { %vm3528_vm11 = vcmp.lt.s32.totalorder %v7187_v39, 3  ;;  %v3734_v36 = vadd.s32 %v3732_v34, %v7113_v22  ;;  %vm3735_vm12 = vc.u32 %v3733_v33, %v3729_v55  ;;  %vm3529_vm0 = vcmp.lt.s32.totalorder %v7187_v39, 4 }
0x10ee   :  { %v3395_v61 = vmul.u32 %v7641_v17, %v6964_v52  ;;  %v7231_v57 = vsel %vm3526_vm8, %v3510_v16, %v7209_v60  ;;  %v3736_v45 = vsel %vm3735_vm12, 1, %v7640_v7  ;;  %v7234_v20 = vadd.s32 %v3717_v21, %v3708_v13 }
0x10ef   :  { %v3728_v9 = vshrl.u32 %v7108_v0, 16  ;;  %v3730_v29 = vshrl.u32 %v3725_v47, 16  ;;  %v3738_v4 = vadd.s32 %v3736_v45, %v3734_v36  ;;  %vm3527_vm1 = vcmp.lt.s32.totalorder %v7187_v39, 2 }
0x10f0   :  { %v3399_v46 = vshll.u32 %v3395_v61, 16  ;;  %v3402_v22 = vsel %vm7171_vm7, 1, %v7640_v7  ;;  %v7642_v63 = vand.u32 65535, %v7066_v56  ;;  %v3419_v42 = vshll.u32 %v7128_v54, 16 }
0x10f1   :  { %v3739_v5 = vadd.s32 %v3738_v4, %v3728_v9  ;;  %v3404_v0 = vadd.s32 %v3402_v22, %v7150_v31  ;;  %v3539_v53 = vsel %vm3529_vm0, %v3525_v37, 1326507024  ;;  %v7252_v26 = vadd.s32 %v3733_v33, %v3729_v55 }
0x10f2   :  { %vm3405_vm13 = vc.u32 %v3403_v40, %v3399_v46  ;;  %v3415_v50 = vmul.u32 %v7642_v63, %v6961_v51  ;;  %v7643_v6 = vmov %v7642_v63  ;;  %v3398_v40 = vshrl.u32 %v7091_v15, 16 }
0x10f3   :  { %v3417_v13 = vmul.u32 %v7643_v6, %v6964_v52  ;;  %v3406_v47 = vsel %vm3405_vm13, 1, %v7640_v7  ;;  %v3740_v51 = vadd.s32 %v3739_v5, %v3730_v29  ;;  %v3538_v52 = vsel %vm3526_vm8, %v7217_v12, %v7219_v11 }
0x10f4   :  { %v3408_v16 = vadd.s32 %v3406_v47, %v3404_v0  ;;  %vm3423_vm14 = vc.u32 %v3415_v50, %v3419_v42  ;;  %v3425_v56 = vadd.s32 %v3419_v42, %v3415_v50  ;;  %vm3743_vm15 = vc.u32 %v7234_v20, %v7252_v26 }
0x10f5   :  { %v3421_v1 = vshll.u32 %v3417_v13, 16  ;;  %v3424_v31 = vsel %vm3423_vm14, 1, %v7640_v7  ;;  %v7644_v33 = vand.u32 65535, %v7076_v58  ;;  %v3744_v15 = vadd.s32 1, %v3740_v51 }
0x10f6   :  { %v3409_v35 = vadd.s32 %v3408_v16, %v3398_v40  ;;  %v3426_v21 = vadd.s32 %v3424_v31, %v7131_v10  ;;  %v3540_v34 = vsel %vm3528_vm11, %v3522_v38, %v3539_v53  ;;  %v3400_v17 = vshrl.u32 %v3395_v61, 16 }
0x10f7   :  { %v7265_v55 = vmul.u32 %v7644_v33, %v7153_v3  ;;  %vm3427_vm2 = vc.u32 %v3425_v56, %v3421_v1  ;;  %v3745_v45 = vsel %vm3743_vm15, %v3744_v15, %v3740_v51  ;;  %v3420_v46 = vshrl.u32 %v7128_v54, 16 }
0x10f8   :  { %v3428_v37 = vsel %vm3427_vm2, 1, %v7640_v7  ;;  %v3864_v58 = vsel %vm7213_vm10, 1, %v7640_v7  ;;  %v7645_v10 = vmul.u32 %v6941_v23, %v6978_v30  ;;  %v7279_v4 = vadd.s32 %v3409_v35, %v3400_v17 }
0x10f9   :  { %v3861_v36 = vshll.u32 %v7265_v55, 16  ;;  %v3430_v9 = vadd.s32 %v3428_v37, %v3426_v21  ;;  %v3866_v61 = vadd.s32 %v3864_v58, %v7179_v2  ;;  %v7285_v22 = vsel %vm3527_vm1, %v3538_v52, %v3540_v34 }
0x10fa   :  { %v3746_v29 = vadd.s32 %v3745_v45, %v7645_v10  ;;  %v3422_v54 = vshrl.u32 %v3417_v13, 16  ;;  %v7288_v6 = vadd.s32 %v3425_v56, %v3421_v1  ;;  %v7646_v23 = vand.u32 65535, %v7125_v28 }
0x10fb   :  { %vm3867_vm4 = vc.u32 %v7194_v25, %v3861_v36  ;;  %v3431_v63 = vadd.s32 %v3430_v9, %v3420_v46  ;;  %v3881_v5 = vshll.u32 %v7182_v24, 16  ;;  %v3531_v25 = vsel %vm3529_vm0, %v7219_v11, 2102212464 }
0x10fc   :  { %v3868_v50 = vsel %vm3867_vm4, 1, %v7640_v7  ;;  %v3747_v18 = vadd.s32 536870912, %v3746_v29  ;;  %v3879_v30 = vmul.u32 %v7646_v23, %v7153_v3  ;;  %v3535_v2 = vsel %vm3529_vm0, %v3522_v38, 920167782 }
0x10fd   :  { %v3432_v13 = vadd.s32 %v3431_v63, %v3422_v54  ;;  %v7647_v0 = vmov %v7646_v23  ;;  %v3546_v42 = vshrl.u32 %v7285_v22, 16  ;;  %vm3435_vm5 = vc.u32 %v7279_v4, %v7288_v6 }
0x10fe   :  { %v3877_v47 = vmul.u32 %v7647_v0, %v7118_v32  ;;  %v7303_v53 = vshrl.u32 %v3747_v18, 30  ;;  %v3870_v3 = vadd.s32 %v3868_v50, %v3866_v61  ;;  %v3883_v1 = vshll.u32 %v3879_v30, 16 }
0x10ff   :  { %v3436_v40 = vadd.s32 1, %v3432_v13  ;;  %v3532_v38 = vsel %vm3528_vm11, %v7217_v12, %v3531_v25  ;;  %v3534_v32 = vsel %vm3526_vm8, %v7209_v60, %v7217_v12  ;;  %v3860_v52 = vshrl.u32 %v7134_v44, 16 }
0x1100   :  { %vm3885_vm6 = vc.u32 %v3877_v47, %v3881_v5  ;;  %v3887_v51 = vadd.s32 %v3881_v5, %v3877_v47  ;;  %v3749_v28 = vshll.u32 %v7303_v53, 30  ;;  %v3536_v33 = vsel %vm3528_vm11, %v7219_v11, %v3535_v2 }
0x1101   :  { %v3886_v16 = vsel %vm3885_vm6, 1, %v7640_v7  ;;  %v3437_v56 = vsel %vm3435_vm5, %v3436_v40, %v3432_v13  ;;  %v7648_v35 = vmul.u32 %v6949_v41, %v7088_v62  ;;  %v7328_v12 = vmul.u32 %v3546_v42, %v7167_v14 }
0x1102   :  { %v3888_v31 = vadd.s32 %v3886_v16, %v7185_v43  ;;  %vm3889_vm7 = vc.u32 %v3887_v51, %v3883_v1  ;;  %v3750_v15 = vsub.s32 %v3746_v29, %v3749_v28  ;;  %v3871_v44 = vadd.s32 %v3870_v3, %v3860_v52 }
0x1103   :  { %v3438_v21 = vadd.s32 %v3437_v56, %v7648_v35  ;;  %v3890_v60 = vsel %vm3889_vm7, 1, %v7640_v7  ;;  %v3882_v43 = vshrl.u32 %v7182_v24, 16  ;;  %v3545_v17 = vand.u32 65535, %v7285_v22 }
0x1104   :  { %v3892_v34 = vadd.s32 %v3890_v60, %v3888_v31  ;;  %vm3751_vm8 = vcmp.lt.s32.totalorder %v3750_v15, 0  ;;  %v3752_v11 = vsub.s32 0, %v3750_v15  ;;  %vm3650_vm9 = vcmp.lt.s32.totalorder %v6921_v59, 0 }
0x1105   :  { %v3439_v37 = vadd.s32 536870912, %v3438_v21  ;;  %v3841_v41 = vsel %vm3835_vm3, %v7157_v19, %v7162_v48  ;;  %v3862_v62 = vshrl.u32 %v7265_v55, 16  ;;  %v7341_v24 = vsel %vm3527_vm1, %v7231_v57, %v3532_v38 }
0x1106   :  { %v3893_v36 = vadd.s32 %v3892_v34, %v3882_v43  ;;  %v7345_v45 = vsel %vm3527_vm1, %v3534_v32, %v3536_v33  ;;  %v3753_v46 = vsel %vm3751_vm8, %v3752_v11, %v3750_v15  ;;  %v3551_v58 = vshll.u32 %v7328_v12, 16 }
0x1107   :  { %v7347_v9 = vshrl.u32 %v3439_v37, 30  ;;  %v3754_v10 = vclz %v3753_v46  ;;  %v7350_v49 = vadd.s32 %v3871_v44, %v3862_v62  ;;  %v3884_v19 = vshrl.u32 %v3879_v30, 16 }
0x1108   :  { %v3895_v48 = vmul.u32 %v7084_v8, %v3841_v41  ;;  %v3544_v55 = vshrl.u32 %v7142_v27, 16  ;;  %v3547_v57 = vmul.u32 %v3545_v17, %v7167_v14  ;;  %v7649_v29 = vand.u32 2147483647, %v6921_v59 }
0x1109   :  { %v3441_v61 = vshll.u32 %v7347_v9, 30  ;;  %v5597_v54 = vadd.s32 4294967294, %v3754_v10  ;;  %v3772_v63 = vsub.s32 4, %v7303_v53  ;;  %v7363_v50 = vadd.s32 %v3887_v51, %v3883_v1 }
0x110a   :  { %vm7357_vm3 = vcmp.le.f32.partialorder %v7649_v29, 0.7853982  ;;  %v3894_v18 = vadd.s32 %v3893_v36, %v3884_v19  ;;  %v3568_v8 = vshrl.u32 %v7345_v45, 16  ;;  %v3587_v23 = vmul.u32 %v7142_v27, %v7341_v24 }
0x110b   :  { %v3442_v30 = vsub.s32 %v3438_v21, %v3441_v61  ;;  %v7368_v5 = vmul.u32 %v3545_v17, %v3544_v55  ;;  %vm3555_vm10 = vc.u32 %v3547_v57, %v3551_v58  ;;  %vm5598_vm11 = vcmp.lt.s32.totalorder %v5597_v54, 0 }
0x110c   :  { %vm3897_vm12 = vc.u32 %v7350_v49, %v7363_v50  ;;  %v3898_v25 = vadd.s32 1, %v3894_v18  ;;  %v3557_v2 = vadd.s32 %v3551_v58, %v3547_v57  ;;  %v3757_v13 = vsel %vm5598_vm11, 0, %v5597_v54 }
0x110d   :  { %vm3443_vm0 = vcmp.lt.s32.totalorder %v3442_v30, 0  ;;  %v3444_v0 = vsub.s32 0, %v3442_v30  ;;  %v3742_v47 = vadd.s32 %v7252_v26, %v7234_v20  ;;  %v3758_v3 = vsub.s32 32, %v3757_v13 }
0x110e   :  { %v3762_v40 = vsub.s32 4294967266, %v3757_v13  ;;  %v3773_v1 = vsel %vm3650_vm9, %v3772_v63, %v7303_v53  ;;  %v3899_v38 = vsel %vm3897_vm12, %v3898_v25, %v3894_v18  ;;  %v3553_v32 = vshll.u32 %v7368_v5, 16 }
0x110f   :  { %v3445_v51 = vsel %vm3443_vm0, %v3444_v0, %v3442_v30  ;;  %v3556_v28 = vsel %vm3555_vm10, 1, %v7640_v7  ;;  %v3759_v16 = vshll.u32 %v3750_v15, %v3757_v13  ;;  %v3760_v56 = vshrl.u32 %v3742_v47, %v3758_v3 }
0x1110   :  { %v3763_v52 = vadd.s32 127, %v3762_v40  ;;  %v3446_v31 = vclz %v3445_v51  ;;  %v3550_v33 = vmul.u32 %v3546_v42, %v3544_v55  ;;  %v7382_v20 = vmul.u32 %v3568_v8, %v7167_v14 }
0x1111   :  { %v3900_v26 = vadd.s32 %v3899_v38, %v3895_v48  ;;  %vm3559_vm1 = vc.u32 %v3557_v2, %v3553_v32  ;;  %v3761_v35 = vor.u32 %v3760_v56, %v3759_v16  ;;  %v3775_v21 = vsel %vm7357_vm3, 0, %v3773_v1 }
0x1112   :  { %v3764_v53 = vshll.u32 %v3763_v52, 23  ;;  %v5591_v60 = vadd.s32 4294967294, %v3446_v31  ;;  %v3567_v44 = vand.u32 65535, %v7345_v45  ;;  %v3572_v15 = vmul.u32 %v3568_v8, %v3544_v55 }
0x1113   :  { %v3901_v43 = vadd.s32 536870912, %v3900_v26  ;;  %v3558_v34 = vadd.s32 %v3556_v28, %v3550_v33  ;;  %v3434_v22 = vadd.s32 %v7288_v6, %v7279_v4  ;;  %v3560_v42 = vsel %vm3559_vm1, 1, %v7640_v7  ;;  %v7652_v4 = vld [vmem:[#allocation32_spill] sm:$0xff] }
0x1114   :  { %v3765_v17 = vor.u32 4788187, %v3764_v53  ;;  %vm5592_vm13 = vcmp.lt.s32.totalorder %v5591_v60, 0  ;;  %v4414_v11 = vadd.s32 3, %v3775_v21  ;;  %v3573_v62 = vshll.u32 %v7382_v20, 16 }
0x1115   :  { %v3449_v37 = vsel %vm5592_vm13, 0, %v5591_v60  ;;  %v7390_v41 = vshrl.u32 %v3901_v43, 30  ;;  %v3768_v46 = vcvt.s32.f32 %v3761_v35  ;;  %v3562_v19 = vadd.s32 %v3560_v42, %v3558_v34 }
0x1116   :  { %v3766_v36 = vand.u32 2147483647, %v3765_v17  ;;  %v3450_v58 = vsub.s32 32, %v3449_v37  ;;  %v3454_v45 = vsub.s32 4294967266, %v3449_v37  ;;  %v3569_v48 = vmul.u32 %v3567_v44, %v7167_v14 }
0x1117   :  { %v3903_v10 = vshll.u32 %v7390_v41, 30  ;;  %v3571_v57 = vmul.u32 %v3567_v44, %v3544_v55  ;;  %vm3342_vm14 = vcmp.lt.s32.totalorder %v7652_v4, 0  ;;  %v3451_v29 = vshll.u32 %v3442_v30, %v3449_v37 }
0x1118   :  { %v3769_v6 = vmul.f32 %v3768_v46, %v3766_v36  ;;  %v3452_v61 = vshrl.u32 %v3434_v22, %v3450_v58  ;;  %v3455_v54 = vadd.s32 127, %v3454_v45  ;;  %v3552_v18 = vshrl.u32 %v7328_v12, 16 }
0x1119   :  { %v7396_v63 = vsub.s32 %v3900_v26, %v3903_v10  ;;  %vm3577_vm15 = vc.u32 %v3569_v48, %v3573_v62  ;;  %v3579_v8 = vadd.s32 %v3573_v62, %v3569_v48  ;;  %v3464_v0 = vsub.s32 4, %v7347_v9 }
0x111a   :  { %v3770_v25 = vxor.u32 2147483648, %v3769_v6  ;;  %v3453_v2 = vor.u32 %v3452_v61, %v3451_v29  ;;  %v3456_v13 = vshll.u32 %v3455_v54, 23  ;;  %v3575_v55 = vshll.u32 %v3571_v57, 16 }
0x111b   :  { %vm3905_vm2 = vcmp.lt.s32.totalorder %v7396_v63, 0  ;;  %v3906_v14 = vsub.s32 0, %v7396_v63  ;;  %v3578_v30 = vsel %vm3577_vm15, 1, %v7640_v7  ;;  %v7653_v3 = vand.u32 2147483647, %v7652_v4 }
0x111c   :  { %v3771_v47 = vsel %vm3650_vm9, %v3770_v25, %v3769_v6  ;;  %v3457_v40 = vor.u32 4788187, %v3456_v13  ;;  %v3460_v1 = vcvt.s32.f32 %v3453_v2  ;;  %v3563_v51 = vadd.s32 %v3562_v19, %v3552_v18 }
0x111d   :  { %vm7407_vm4 = vcmp.le.f32.partialorder %v7653_v3, 0.7853982  ;;  %v7414_v38 = vsel %vm7357_vm3, %v6921_v59, %v3771_v47  ;;  %v3907_v32 = vsel %vm3905_vm2, %v3906_v14, %v7396_v63  ;;  %v3580_v28 = vadd.s32 %v3578_v30, %v3572_v15  ;;  %v7656_v14 = vld [vmem:[#allocation33_spill] sm:$0xff] }
0x111e   :  { %vm3581_vm5 = vc.u32 %v3579_v8, %v3575_v55  ;;  %v3776_v16 = vmul.f32 %v7414_v38, %v7414_v38  ;;  %v3458_v56 = vand.u32 2147483647, %v3457_v40  ;;  %v3908_v52 = vclz %v3907_v32 }
0x111f   :  { %v3582_v31 = vsel %vm3581_vm5, 1, %v7640_v7  ;;  %v7420_v33 = vand.u32 3, %v4414_v11  ;;  %v7422_v26 = vand.u32 3, %v3775_v21  ;;  %v3896_v39 = vadd.s32 %v7363_v50, %v7350_v49 }
0x1120   :  { %v3554_v35 = vshrl.u32 %v7368_v5, 16  ;;  %v3777_v53 = vmul.f32 -0.001358992, %v3776_v16  ;;  %v3784_v60 = vmul.f32 -0.00019511016, %v3776_v16  ;;  %v3461_v44 = vmul.f32 %v3460_v1, %v3458_v56 }
0x1121   :  { %v5600_v15 = vadd.s32 4294967294, %v3908_v52  ;;  %v3465_v43 = vsel %vm3342_vm14, %v3464_v0, %v7347_v9  ;;  %v3574_v7 = vshrl.u32 %v7382_v20, 16  ;;  %v3584_v17 = vadd.s32 %v3582_v31, %v3580_v28 }
0x1122   :  { %v7430_v34 = vadd.s32 %v3563_v51, %v3554_v35  ;;  %v3778_v21 = vadd.f32 0.041655596, %v3777_v53  ;;  %v3785_v22 = vadd.f32 0.008332121, %v3784_v60  ;;  %v3462_v42 = vxor.u32 2147483648, %v3461_v44 }
0x1123   :  { %vm5601_vm6 = vcmp.lt.s32.totalorder %v5600_v15, 0  ;;  %v3576_v50 = vshrl.u32 %v3571_v57, 16  ;;  %v7433_v5 = vadd.s32 %v3579_v8, %v3575_v55  ;;  %v3585_v11 = vadd.s32 %v3584_v17, %v3574_v7 }
0x1124   :  { %v3911_v49 = vsel %vm5601_vm6, 0, %v5600_v15  ;;  %v3779_v37 = vmul.f32 %v3778_v21, %v3776_v16  ;;  %v3786_v62 = vmul.f32 %v3785_v22, %v3776_v16  ;;  %v3463_v36 = vsel %vm3342_vm14, %v3462_v42, %v3461_v44 }
0x1125   :  { %v3912_v9 = vsub.s32 32, %v3911_v49  ;;  %v7440_v20 = vsel %vm7407_vm4, %v7652_v4, %v3463_v36  ;;  %v3916_v46 = vsub.s32 4294967266, %v3911_v49  ;;  %v3586_v58 = vadd.s32 %v3585_v11, %v3576_v50 }
0x1126   :  { %vm3589_vm7 = vc.u32 %v7430_v34, %v7433_v5  ;;  %v3780_v45 = vadd.f32 -0.4999988, %v3779_v37  ;;  %v3787_v10 = vadd.f32 -0.16666654, %v3786_v62  ;;  %v3468_v19 = vmul.f32 %v7440_v20, %v7440_v20 }
0x1127   :  { %v3914_v48 = vshrl.u32 %v3896_v39, %v3912_v9  ;;  %v3467_v57 = vsel %vm7407_vm4, 0, %v3465_v43  ;;  %v3913_v6 = vshll.u32 %v7396_v63, %v3911_v49  ;;  %v3917_v29 = vadd.s32 127, %v3916_v46 }
0x1128   :  { %v3590_v61 = vadd.s32 1, %v3586_v58  ;;  %v3781_v54 = vmul.f32 %v3780_v45, %v3776_v16  ;;  %v3788_v18 = vmul.f32 %v3787_v10, %v3776_v16  ;;  %v3469_v8 = vmul.f32 -0.001358992, %v3468_v19 }
0x1129   :  { %v3476_v25 = vmul.f32 -0.00019511016, %v3468_v19  ;;  %vm3791_vm8 = vweird.f32 %v6921_v59  ;;  %vm4416_vm9 = vcmp.lt.s32.totalorder %v7420_v33, 2  ;;  %v3915_v2 = vor.u32 %v3914_v48, %v3913_v6 }
0x112a   :  { %v3918_v13 = vshll.u32 %v3917_v29, 23  ;;  %v3591_v0 = vsel %vm3589_vm7, %v3590_v61, %v3586_v58  ;;  %vm3804_vm3 = vcmp.lt.s32.totalorder %v7656_v14, 0  ;;  %v3782_v55 = vadd.f32 1.0, %v3781_v54 }
0x112b   :  { %v3789_v63 = vadd.f32 1.0, %v3788_v18  ;;  %v3470_v30 = vadd.f32 0.041655596, %v3469_v8  ;;  %v3477_v47 = vadd.f32 0.008332121, %v3476_v25  ;;  %vm3794_vm10 = vcmp.eq.s32.totalorder %v7422_v26, 0 }
0x112c   :  { %v4104_v3 = vadd.s32 3, %v3467_v57  ;;  %v7456_v12 = vand.u32 3, %v3467_v57  ;;  %v7657_v40 = vand.u32 2147483647, %v7656_v14  ;;  %v3919_v51 = vor.u32 4788187, %v3918_v13 }
0x112d   :  { %v3592_v32 = vadd.s32 %v3591_v0, %v3587_v23  ;;  %v3790_v28 = vmul.f32 %v3789_v63, %v7414_v38  ;;  %v3798_v16 = vxor.u32 2147483648, %v3782_v55  ;;  %v3471_v56 = vmul.f32 %v3470_v30, %v3468_v19 }
0x112e   :  { %vm7460_vm11 = vcmp.le.f32.partialorder %v7657_v40, 0.7853982  ;;  %v3478_v52 = vmul.f32 %v3477_v47, %v3468_v19  ;;  %vm3797_vm12 = vcmp.eq.s32.totalorder %v7422_v26, 2  ;;  %vm4417_vm0 = vcmp.eq.s32.totalorder %v7420_v33, 0 }
0x112f   :  { %vm3793_vm1 = vcmp.lt.s32.totalorder %v7422_v26, 2  ;;  %v3920_v31 = vand.u32 2147483647, %v3919_v51  ;;  %v3922_v39 = vcvt.s32.f32 %v3915_v2  ;;  %v3593_v35 = vadd.s32 536870912, %v3592_v32 }
0x1130   :  { %v3795_v53 = vxor.u32 2147483648, %v3790_v28  ;;  %vm4420_vm13 = vcmp.eq.s32.totalorder %v7420_v33, 2  ;;  %v3472_v60 = vadd.f32 -0.4999988, %v3471_v56  ;;  %v3479_v27 = vadd.f32 -0.16666654, %v3478_v52 }
0x1131   :  { %v4105_v24 = vand.u32 3, %v4104_v3  ;;  %vm3486_vm14 = vcmp.eq.s32.totalorder %v7456_v12, 0  ;;  %v3923_v23 = vmul.f32 %v3922_v39, %v3920_v31  ;;  %v7473_v38 = vshrl.u32 %v3593_v35, 30 }
0x1132   :  { %v4419_v44 = vsel %vm4417_vm0, %v3782_v55, %v3795_v53  ;;  %v4422_v15 = vsel %vm4420_vm13, %v3798_v16, %v3790_v28  ;;  %v3473_v43 = vmul.f32 %v3472_v60, %v3468_v19  ;;  %v3480_v7 = vmul.f32 %v3479_v27, %v3468_v19 }
0x1133   :  { %vm3485_vm15 = vcmp.lt.s32.totalorder %v7456_v12, 2  ;;  %v4423_v17 = vsel %vm4416_vm9, %v4419_v44, %v4422_v15  ;;  %vm3483_vm2 = vweird.f32 %v7652_v4  ;;  %vm3489_vm4 = vcmp.eq.s32.totalorder %v7456_v12, 2 }
0x1134   :  { %v3924_v21 = vxor.u32 2147483648, %v3923_v23  ;;  %v3595_v22 = vshll.u32 %v7473_v38, 30  ;;  %v7483_v42 = vsel %vm3791_vm8, nan, %v4423_v17  ;;  %v3474_v49 = vadd.f32 1.0, %v3473_v43 }
0x1135   :  { %v3481_v50 = vadd.f32 1.0, %v3480_v7  ;;  %v3926_v11 = vsub.s32 4, %v7390_v41  ;;  %4612 = vrot.lane.b32.xlu1 %v7483_v42, %s6396_s17  ;;  %vm4106_vm5 = vcmp.lt.s32.totalorder %v4105_v24, 2  ;;  %v3796_v33 = vsel %vm3794_vm10, %v3782_v55, %v3795_v53 }
0x1136   :  { %v3925_v37 = vsel %vm3804_vm3, %v3924_v21, %v3923_v23  ;;  %v3596_v62 = vsub.s32 %v3592_v32, %v3595_v22  ;;  %v3490_v9 = vxor.u32 2147483648, %v3474_v49  ;;  %vm4107_vm6 = vcmp.eq.s32.totalorder %v4105_v24, 0 }
0x1137   :  { %v3482_v36 = vmul.f32 %v3481_v50, %v7440_v20  ;;  %v3928_v46 = vsel %vm7460_vm11, %v7656_v14, %v3925_v37  ;;  %v3799_v58 = vsel %vm3797_vm12, %v3798_v16, %v3790_v28  ;;  %vm4110_vm9 = vcmp.eq.s32.totalorder %v4105_v24, 2 }
0x1138   :  { %v3930_v45 = vmul.f32 %v3928_v46, %v3928_v46  ;;  %vm3597_vm7 = vcmp.lt.s32.totalorder %v3596_v62, 0  ;;  %v3598_v10 = vsub.s32 0, %v3596_v62  ;;  %v3800_v48 = vsel %vm3793_vm1, %v3796_v33, %v3799_v58 }
0x1139   :  { %v3487_v19 = vxor.u32 2147483648, %v3482_v36  ;;  %v3927_v20 = vsel %vm3804_vm3, %v3926_v11, %v7390_v41  ;;  %v4112_v57 = vsel %vm4110_vm9, %v3490_v9, %v3482_v36  ;;  %v3491_v8 = vsel %vm3489_vm4, %v3490_v9, %v3482_v36  ;;  %v7660_v11 = vld [vmem:[#allocation34_spill] sm:$0xff] }
0x113a   :  { %v3931_v6 = vmul.f32 -0.001358992, %v3930_v45  ;;  %v3938_v29 = vmul.f32 -0.00019511016, %v3930_v45  ;;  %v3599_v61 = vsel %vm3597_vm7, %v3598_v10, %v3596_v62  ;;  %v7524_v30 = vsel %vm3791_vm8, nan, %v3800_v48 }
0x113b   :  { %v4109_v54 = vsel %vm4107_vm6, %v3474_v49, %v3487_v19  ;;  %v3488_v18 = vsel %vm3486_vm14, %v3474_v49, %v3487_v19  ;;  %v3600_v25 = vclz %v3599_v61  ;;  %v7528_v47 = vsel %vm7460_vm11, 0, %v3927_v20 }
0x113c   :  { %v4113_v2 = vsel %vm4106_vm5, %v4109_v54, %v4112_v57  ;;  %v3492_v26 = vsel %vm3485_vm15, %v3488_v18, %v3491_v8  ;;  %v3932_v13 = vadd.f32 0.041655596, %v3931_v6  ;;  %v3939_v0 = vadd.f32 0.008332121, %v3938_v29 }
0x113d   :  { %v7512_v41 = vsel %vm3483_vm2, nan, %v4113_v2  ;;  %v7516_v55 = vsel %vm3483_vm2, nan, %v3492_v26  ;;  %v5594_v63 = vadd.s32 4294967294, %v3600_v25  ;;  %4592 = vrot.lane.b32.xlu1 %v7524_v30, %s6396_s17  ;;  %v4569_v32 = vadd.s32 3, %v7528_v47 }
0x113e   :  { %4608 = vrot.lane.b32.xlu0 %v7512_v41, %s6396_s17  ;;  %4588 = vrot.lane.b32.xlu2 %v7516_v55, %s6396_s17  ;;  %v3933_v3 = vmul.f32 %v3932_v13, %v3930_v45  ;;  %v3940_v12 = vmul.f32 %v3939_v0, %v3930_v45  ;;  %v3588_v59 = vadd.s32 %v7433_v5, %v7430_v34  ;;  %vm3945_vm12 = vweird.f32 %v7656_v14 }
0x113f   :  { %vm5595_vm3 = vcmp.lt.s32.totalorder %v5594_v63, 0  ;;  %v4570_v60 = vand.u32 3, %v4569_v32  ;;  %vm3496_vm0 = vcmp.lt.s32.totalorder %v7660_v11, 0  ;;  %v7661_v33 = vand.u32 2147483647, %v7660_v11 }
0x1140   :  { %v3934_v4 = vadd.f32 -0.4999988, %v3933_v3  ;;  %v3941_v40 = vadd.f32 -0.16666654, %v3940_v12  ;;  %v3603_v51 = vsel %vm5595_vm3, 0, %v5594_v63  ;;  %vm3637_vm6 = vweird.f32 %v7660_v11 }
0x1141   :  { %v3604_v28 = vsub.s32 32, %v3603_v51  ;;  %v3608_v16 = vsub.s32 4294967266, %v3603_v51  ;;  %v3605_v52 = vshll.u32 %v3596_v62, %v3603_v51  ;;  %vm4572_vm8 = vcmp.eq.s32.totalorder %v4570_v60, 0 }
0x1142   :  { %v3935_v56 = vmul.f32 %v3934_v4, %v3930_v45  ;;  %v3942_v1 = vmul.f32 %v3941_v40, %v3930_v45  ;;  %vm4575_vm10 = vcmp.eq.s32.totalorder %v4570_v60, 2  ;;  %vm4571_vm11 = vcmp.lt.s32.totalorder %v4570_v60, 2 }
0x1143   :  { %v3606_v31 = vshrl.u32 %v3588_v59, %v3604_v28  ;;  %v3609_v39 = vadd.s32 127, %v3608_v16  ;;  %vm3495_vm1 = vcmp.le.f32.partialorder %v7661_v33, 0.7853982  ;;  %v3618_v62 = vsub.s32 4, %v7473_v38 }
0x1144   :  { %v7535_v35 = vadd.f32 1.0, %v3935_v56  ;;  %v3943_v53 = vadd.f32 1.0, %v3942_v1  ;;  %v3956_v1 = vmul.f32 3.806, %v7516_v55  ;;  %v4582_v60 = vmul.f32 3.806, %v7483_v42 }
0x1145   :  { %v3607_v27 = vor.u32 %v3606_v31, %v3605_v52  ;;  %v3610_v24 = vshll.u32 %v3609_v39, 23  ;;  %v4580_v31 = vmul.f32 3.806, %v7512_v41  ;;  %v3958_v42 = vmul.f32 3.806, %v7524_v30 }
0x1146   :  { %v7537_v23 = vmul.f32 %v3943_v53, %v3928_v46  ;;  %v3952_v44 = vxor.u32 2147483648, %v7535_v35  ;;  %v3619_v46 = vsel %vm3496_vm0, %v3618_v62, %v7473_v38  ;;  %v3946_v38 = vand.u32 3, %v7528_v47 }
0x1147   :  { %v3611_v15 = vor.u32 4788187, %v3610_v24  ;;  %v3614_v43 = vcvt.s32.f32 %v3607_v27  ;;  %v3621_v48 = vsel %vm3495_vm1, 0, %v3619_v46 }
0x1148   :  { %v3949_v34 = vxor.u32 2147483648, %v7537_v23  ;;  %v4577_v17 = vsel %vm4575_vm10, %v3952_v44, %v7537_v23  ;;  %v4259_v61 = vadd.s32 3, %v3621_v48  ;;  %v3638_v26 = vand.u32 3, %v3621_v48 }
0x1149   :  { %v3612_v5 = vand.u32 2147483647, %v3611_v15  ;;  %vm3948_vm7 = vcmp.eq.s32.totalorder %v3946_v38, 0  ;;  %vm3951_vm9 = vcmp.eq.s32.totalorder %v3946_v38, 2  ;;  %vm3947_vm3 = vcmp.lt.s32.totalorder %v3946_v38, 2 }
0x114a   :  { %v4574_v7 = vsel %vm4572_vm8, %v7535_v35, %v3949_v34  ;;  %v4260_v2 = vand.u32 3, %v4259_v61  ;;  %vm3639_vm14 = vcmp.lt.s32.totalorder %v3638_v26, 2  ;;  %vm3640_vm4 = vcmp.eq.s32.totalorder %v3638_v26, 0 }
0x114b   :  { %v4578_v21 = vsel %vm4571_vm11, %v4574_v7, %v4577_v17  ;;  %v3615_v22 = vmul.f32 %v3614_v43, %v3612_v5  ;;  %vm3643_vm5 = vcmp.eq.s32.totalorder %v3638_v26, 2  ;;  %v3950_v47 = vsel %vm3948_vm7, %v7535_v35, %v3949_v34 }
0x114c   :  { %v7548_v49 = vsel %vm3945_vm12, nan, %v4578_v21  ;;  %vm4261_vm13 = vcmp.lt.s32.totalorder %v4260_v2, 2  ;;  %vm4262_vm15 = vcmp.eq.s32.totalorder %v4260_v2, 0  ;;  %vm4265_vm2 = vcmp.eq.s32.totalorder %v4260_v2, 2 }
0x114d   :  { %4614 = vrot.lane.b32.xlu0 %v7548_v49, %s6396_s17  ;;  %v3616_v50 = vxor.u32 2147483648, %v3615_v22  ;;  %v3953_v16 = vsel %vm3951_vm9, %v3952_v44, %v7537_v23  ;;  %v4583_v34 = vmul.f32 3.806, %v7548_v49  ;;  %v4624_v49 = vlaneseq }
0x114e   :  { %v3954_v56 = vsel %vm3947_vm3, %v3950_v47, %v3953_v16 }
0x114f   :  { %v3617_v37 = vsel %vm3496_vm0, %v3616_v50, %v3615_v22  ;;  %v3955_v52 = vsel %vm3945_vm12, nan, %v3954_v56 }
0x1150   :  { %v3620_v36 = vsel %vm3495_vm1, %v7660_v11, %v3617_v37  ;;  %v3959_v11 = vmul.f32 3.806, %v3955_v52  ;;  %v4625_v37 = vand.u32 127, %v4624_v49 }
0x1151   :  { %v3622_v9 = vmul.f32 %v3620_v36, %v3620_v36 }
0x1152   :  { %vm4627_vm8 = vcmp.eq.s32.totalorder %v4625_v37, 1  ;;  %vm4628_vm10 = vcmp.eq.s32.totalorder %v4625_v37, 2  ;;  %vm4626_vm11 = vcmp.eq.s32.totalorder %v4625_v37, 0 }
0x1153   :  { %v3623_v58 = vmul.f32 -0.001358992, %v3622_v9  ;;  %v3630_v45 = vmul.f32 -0.00019511016, %v3622_v9 }
0x1155   :  { %v3624_v10 = vadd.f32 0.041655596, %v3623_v58  ;;  %v3631_v19 = vadd.f32 0.008332121, %v3630_v45 }
0x1157   :  { %v3625_v20 = vmul.f32 %v3624_v10, %v3622_v9  ;;  %v3632_v57 = vmul.f32 %v3631_v19, %v3622_v9 }
0x1159   :  { %v3626_v6 = vadd.f32 -0.4999988, %v3625_v20  ;;  %v3633_v29 = vadd.f32 -0.16666654, %v3632_v57 }
0x115b   :  { %v3627_v54 = vmul.f32 %v3626_v6, %v3622_v9  ;;  %v3634_v18 = vmul.f32 %v3633_v29, %v3622_v9 }
0x115d   :  { %v3628_v8 = vadd.f32 1.0, %v3627_v54  ;;  %v3635_v25 = vadd.f32 1.0, %v3634_v18 }
0x115f   :  { %v3636_v13 = vmul.f32 %v3635_v25, %v3620_v36  ;;  %v3644_v0 = vxor.u32 2147483648, %v3628_v8 }
0x1161   :  { %v3641_v63 = vxor.u32 2147483648, %v3636_v13  ;;  %v4267_v12 = vsel %vm4265_vm2, %v3644_v0, %v3636_v13  ;;  %v3645_v40 = vsel %vm3643_vm5, %v3644_v0, %v3636_v13 }
0x1163   :  { %v4264_v3 = vsel %vm4262_vm15, %v3628_v8, %v3641_v63  ;;  %v3642_v4 = vsel %vm3640_vm4, %v3628_v8, %v3641_v63 }
0x1164   :  { %v4268_v51 = vsel %vm4261_vm13, %v4264_v3, %v4267_v12  ;;  %v3646_v32 = vsel %vm3639_vm14, %v3642_v4, %v3645_v40 }
0x1165   :  { %v4269_v59 = vsel %vm3637_vm6, nan, %v4268_v51  ;;  %v3647_v28 = vsel %vm3637_vm6, nan, %v3646_v32 }
0x1166   :  { %4610 = vrot.lane.b32.xlu2 %v4269_v59, %s6396_s17  ;;  %4590 = vrot.lane.b32.xlu0 %v3647_v28, %s6396_s17  ;;  %v4581_v55 = vmul.f32 3.806, %v4269_v59  ;;  %v3957_v22 = vmul.f32 3.806, %v3647_v28 }
0x116e   :  { %4594 = vrot.lane.b32.xlu2 %v3955_v52, %s6396_s17  ;;  %4679 = vperm.xlu0 %5894, %v3956_v1  }
0x1198   :  { %v4589_v39 = vpop.permute.xlu2 %4588 }
0x1199   :  { %v4600_v53 = vmul.f32 %v4589_v39, %v4580_v31 }
0x119b   :  { %4655 = vperm.xlu2 %5895, %v4600_v53  }
0x11a7   :  { %v4613_v27 = vpop.permute.xlu1 %4612 }
0x11a8   :  { %v4622_v24 = vmul.f32 %v4613_v27, %v4582_v60 }
0x11aa   :  { %4641 = vperm.xlu2 %5895, %v4622_v24  }
0x11af   :  { %v4593_v15 = vpop.permute.xlu1 %4592 }
0x11b0   :  { %v4609_v35 = vpop.permute.xlu0 %4608  ;;  %v4602_v5 = vmul.f32 %v4593_v15, %v4582_v60 }
0x11b1   :  { %v4620_v23 = vmul.f32 %v4609_v35, %v4580_v31 }
0x11b3   :  { %4631 = vperm.xlu0 %5894, %v4620_v23  }
0x11bf   :  { %v4615_v7 = vpop.permute.xlu0 %4614 }
0x11c0   :  { %v4611_v44 = vpop.permute.xlu2 %4610  ;;  %v4623_v17 = vmul.f32 %v4615_v7, %v4583_v34 }
0x11c1   :  { %v4621_v14 = vmul.f32 %v4611_v44, %v4581_v55 }
0x11c3   :  { %4636 = vperm.xlu1 %5896, %v4621_v14  }
0x11c8   :  { %v4595_v41 = vpop.permute.xlu2 %4594 }
0x11c9   :  { %v4603_v43 = vmul.f32 %v4595_v41, %v4583_v34 }
0x11cb   :  { %4670 = vperm.xlu2 %5895, %v4603_v43   ;;  %4665 = vperm.xlu1 %5896, %v4602_v5  }
0x11d3   :  { %4689 = vperm.xlu2 %5895, %v3958_v42   ;;  %4646 = vperm.xlu1 %5896, %v4623_v17  }
0x11d8   :  { %v4591_v21 = vpop.permute.xlu0 %4590 }
0x11d9   :  { %v4601_v50 = vmul.f32 %v4591_v21, %v4581_v55 }
0x11db   :  { %4660 = vperm.xlu0 %5894, %v4601_v50   ;;  %4684 = vperm.xlu1 %5896, %v3957_v22  }
0x11e0   :  { %v4680_v33 = vpop.permute.xlu0 %4679 }
0x11e3   :  { %4694 = vperm.xlu0 %5894, %v3959_v11  }
0x11f5   :  { %v4656_v62 = vpop.permute.xlu2 %4655 }
0x1204   :  { %v4642_v58 = vpop.permute.xlu2 %4641 }
0x1205   :  { %v4651_v19 = vsel %vm4628_vm10, %v4642_v58, 0.0 }
0x1225   :  { %v4632_v36 = vpop.permute.xlu0 %4631  ;;  %v4671_v45 = vpop.permute.xlu2 %4670 }
0x1226   :  { %v4649_v30 = vsel %vm4628_vm10, %v4632_v36, 0.0 }
0x1227   :  { %v4673_v9 = vsel %vm4627_vm8, %v4656_v62, %v4649_v30 }
0x1228   :  { %v4697_v46 = vsel %vm4626_vm11, %v4680_v33, %v4673_v9 }
0x1229   :  { %4701 = vst [vmem:[#allocation23] sm:$0xff] %v4697_v46 }
0x122d   :  { %v4690_v20 = vpop.permute.xlu2 %4689 }
0x1235   :  { %v4637_v10 = vpop.permute.xlu1 %4636 }
0x1236   :  { %v4650_v61 = vsel %vm4628_vm10, %v4637_v10, 0.0 }
0x123d   :  { %v4666_v48 = vpop.permute.xlu1 %4665 }
0x123e   :  { %v4675_v57 = vsel %vm4627_vm8, %v4666_v48, %v4651_v19 }
0x123f   :  { %v4699_v6 = vsel %vm4626_vm11, %v4690_v20, %v4675_v57 }
0x1240   :  { %4703 = vst [vmem:[#allocation23 + $0x10] sm:$0xff] %v4699_v6 }
0x1245   :  { %v4647_v29 = vpop.permute.xlu1 %4646 }
0x1246   :  { %v4652_v2 = vsel %vm4628_vm10, %v4647_v29, 0.0 }
0x1247   :  { %v4676_v26 = vsel %vm4627_vm8, %v4671_v45, %v4652_v2 }
0x124d   :  { %v4661_v54 = vpop.permute.xlu0 %4660  ;;  %v4685_v18 = vpop.permute.xlu1 %4684 }
0x124e   :  { %v4674_v8 = vsel %vm4627_vm8, %v4661_v54, %v4650_v61 }
0x124f   :  { %v4698_v25 = vsel %vm4626_vm11, %v4685_v18, %v4674_v8 }
0x1250   :  { %4702 = vst [vmem:[#allocation23 + $0x8] sm:$0xff] %v4698_v25 }
0x1255   :  { %v4695_v13 = vpop.permute.xlu0 %4694 }
0x1256   :  { %v4700_v0 = vsel %vm4626_vm11, %v4695_v13, %v4676_v26 }
0x1257   :  { %4704 = vst [vmem:[#allocation23 + $0x18] sm:$0xff] %v4700_v0 }
0x1258   :  { %4717 = dma.vmem_to_hbm [thread:$0]  %s4710_s23, 512, %s4712_s9, [#allocation4], %s6365_s22, %s6365_s22, %s6366_s2  }
0x1259   :  { %6362 = dma.done.wait [#allocation4], 512  }
0x125a   :  { %6363 = vsyncadd [#allocation4], 4294966784 }
0x125b   :  { %4722 = vsyncpa [#allocation3], 1 }
0x125c   :  { %4723 = vsyncpa [#allocation6], 1 }
0x125d   :  { %4724 = vsyncpa [#allocation9], 1 }
0x125e   :  { %4725 = vsyncpa [#allocation12], 1 }
0x125f   :  { %4726 = vsyncpa [#allocation15], 1 }
0x1260   :  { %4727 = vsyncpa [#allocation18], 1 }
0x1261   :  { %4728 = vsyncpa [#allocation21], 1 }
0x1262   :  { %4729 = vsyncpa [#allocation4], 1 }

</bundles_post_ra>
